<compile_context>
chip_gen: v5e
topology: v5e:2x2
jax: 0.10.0
libtpu: 0.0.40
codegen_flags: <defaults>
</compile_context>

<pallas_src>
from functools import partial

import numpy as np
import jax
import jax.numpy as jnp
from jax import lax
from jax.experimental import pallas as pl
from jax.experimental.pallas import tpu as pltpu

_EPS = 1e-6
_SELECT_GATHER_MAX_B = 32       # gather stats with VPU selects up to this many graphs
_TARGET_BLOCK_BYTES = 1 << 20   # ~1 MiB node tile


def _split_bf16(v):
    """f32 -> (hi, lo) bf16 with v ~= hi + lo (~16 significant bits)."""
    hi = v.astype(jnp.bfloat16)
    lo = (v - hi.astype(jnp.float32)).astype(jnp.bfloat16)
    return hi, lo


def _split_dot(onehot_bf16, vals_f32):
    """onehot @ vals: exact 0/1 one-hot in bf16, data split hi+lo -> two
    DEFAULT-precision MXU passes with f32 accumulation (portable stand-in for
    per-operand precision=(DEFAULT, HIGHEST))."""
    hi, lo = _split_bf16(vals_f32)
    return (jnp.dot(onehot_bf16, hi, preferred_element_type=jnp.float32) +
            jnp.dot(onehot_bf16, lo, preferred_element_type=jnp.float32))


@partial(jax.jit, static_argnums=(3, 4, 5))
def _graph_norm_impl(x, gnw, gnb, lengths, fused_stats, block_bytes):
    N, D = x.shape
    lengths_np = np.asarray(lengths, dtype=np.int64)
    B = int(lengths_np.shape[0])
    assert int(lengths_np.sum()) == N, "sum(batch_num_nodes) must equal x.shape[0]"

    B_pad = max(8, -(-B // 8) * 8)
    use_select = B_pad <= _SELECT_GATHER_MAX_B
    concat_gather = (not use_select) and (D % 128 == 0)

    # Node tiling: ~block_bytes per x tile, rows a multiple of 128 unless one
    # full-extent tile covers all of N.
    rows = max(128, block_bytes // (4 * D))
    rows = max(128, (rows // 128) * 128)
    if rows >= N:
        tile_n, n_t = N, 1
    else:
        tile_n, n_t = rows, -(-N // rows)
    ragged = (n_t * tile_n) != N

    # Feature chunking for the reduction pass: 2 'parallel' chunks when
    # possible so both v7x TensorCores take part (harmless on v5e/v6e).
    n_d = 2 if (D % 256 == 0) else 1
    Dc = D // n_d

    # Static segment bookkeeping: only two tiny int32 vectors go on device.
    seg_np = np.repeat(np.arange(B, dtype=np.int32), lengths_np)
    seg_row = jnp.asarray(seg_np.reshape(N, 1))    # node-major (stat gathers)
    seg_col = jnp.asarray(seg_np.reshape(1, N))    # lane-major (reductions)
    inv_cnt_np = np.ones((B_pad, 1), np.float32)
    inv_cnt_np[:B, 0] = 1.0 / np.maximum(lengths_np, 1)   # guard empty graphs
    inv_cnt = jnp.asarray(inv_cnt_np)

    x = x.astype(jnp.float32)
    w2d = gnw.astype(jnp.float32).reshape(1, D)
    b2d = gnb.astype(jnp.float32).reshape(1, D)

    # ---------------- in-kernel helpers (statics captured by closure) -------
    def _mask_tail_rows(t, v):
        if not ragged:
            return v
        rid = lax.broadcasted_iota(jnp.int32, (tile_n, 1), 0) + t * tile_n
        return jnp.where(rid < N, v, 0.0)

    def _onehot_bn(seg_col_blk):
        iota_b = lax.broadcasted_iota(jnp.int32, (B_pad, seg_col_blk.shape[1]), 0)
        return (iota_b == seg_col_blk).astype(jnp.float32)

    def _gather_rows(stats, seg_row_blk):
        """row_stats[n, :] = stats[seg[n], :]."""
        n_rows = seg_row_blk.shape[0]
        if use_select:
            # VPU selects: keeps the MXU push slot free in the normalize pass.
            out = jnp.zeros((n_rows, stats.shape[1]), jnp.float32)
            for b in range(B):
                out = jnp.where(seg_row_blk == b, stats[b:b + 1, :], out)
            return out
        # Large B: exact one-hot selection on the MXU.
        oh = (seg_row_blk == lax.broadcasted_iota(
            jnp.int32, (n_rows, B_pad), 1)).astype(jnp.float32)
        return jnp.dot(oh, stats, preferred_element_type=jnp.float32,
                       precision=lax.Precision.HIGHEST)

    # ---------------- kernels ------------------------------------------------
    def fused_stats_kernel(seg_col_ref, x_ref, inv_cnt_ref, w_ref,
                           mean_ref, scale_ref, sum_acc, sq_acc):
        t = pl.program_id(1)

        @pl.when(t == 0)
        def _():
            sum_acc[...] = jnp.zeros_like(sum_acc)
            sq_acc[...] = jnp.zeros_like(sq_acc)

        xv = _mask_tail_rows(t, x_ref[...])
        oh = _onehot_bn(seg_col_ref[...])
        # sum(x): full precision so degenerate graphs keep x - mean exactly 0.
        sum_acc[...] += jnp.dot(oh, xv, preferred_element_type=jnp.float32,
                                precision=lax.Precision.HIGHEST)
        # sum(x^2): cheap hi/lo bf16 split (2 MXU passes instead of 6).
        sq_acc[...] += _split_dot(oh.astype(jnp.bfloat16), xv * xv)

        @pl.when(t == n_t - 1)
        def _():
            mean = sum_acc[...] * inv_cnt_ref[...]
            var = jnp.maximum(sq_acc[...] * inv_cnt_ref[...] - mean * mean, 0.0)
            mean_ref[...] = mean
            scale_ref[...] = w_ref[...] * lax.rsqrt(var + _EPS)

    def mean_kernel(seg_col_ref, x_ref, inv_cnt_ref, mean_ref, sum_acc):
        t = pl.program_id(1)

        @pl.when(t == 0)
        def _():
            sum_acc[...] = jnp.zeros_like(sum_acc)

        xv = _mask_tail_rows(t, x_ref[...])
        oh = _onehot_bn(seg_col_ref[...])
        sum_acc[...] += jnp.dot(oh, xv, preferred_element_type=jnp.float32,
                                precision=lax.Precision.HIGHEST)

        @pl.when(t == n_t - 1)
        def _():
            mean_ref[...] = sum_acc[...] * inv_cnt_ref[...]

    def var_kernel(seg_col_ref, seg_row_ref, x_ref, mean_ref, inv_cnt_ref,
                   w_ref, scale_ref, sq_acc):
        t = pl.program_id(1)

        @pl.when(t == 0)
        def _():
            sq_acc[...] = jnp.zeros_like(sq_acc)

        row_mean = _gather_rows(mean_ref[...], seg_row_ref[...])
        sub = _mask_tail_rows(t, x_ref[...] - row_mean)
        oh = _onehot_bn(seg_col_ref[...])
        sq_acc[...] += jnp.dot(oh, sub * sub, preferred_element_type=jnp.float32,
                               precision=lax.Precision.HIGHEST)

        @pl.when(t == n_t - 1)
        def _():
            var = jnp.maximum(sq_acc[...] * inv_cnt_ref[...], 0.0)
            scale_ref[...] = w_ref[...] * lax.rsqrt(var + _EPS)

    def normalize_kernel(seg_row_ref, x_ref, mean_ref, scale_ref, b_ref, o_ref):
        seg = seg_row_ref[...]
        if concat_gather:
            # One MXU gather against [mean | scale]: halves one-hot pushes.
            row = _gather_rows(
                jnp.concatenate([mean_ref[...], scale_ref[...]], axis=-1), seg)
            row_mean, row_scale = row[:, :D], row[:, D:]
        else:
            row_mean = _gather_rows(mean_ref[...], seg)
            row_scale = _gather_rows(scale_ref[...], seg)
        o_ref[...] = (x_ref[...] - row_mean) * row_scale + b_ref[...]

    # ---------------- pallas_call plumbing -----------------------------------
    seg_col_spec = pl.BlockSpec((1, tile_n), lambda d, t: (0, t))
    seg_row_spec2 = pl.BlockSpec((tile_n, 1), lambda d, t: (t, 0))
    x_spec2 = pl.BlockSpec((tile_n, Dc), lambda d, t: (t, d))
    cnt_spec2 = pl.BlockSpec((B_pad, 1), lambda d, t: (0, 0))
    w_spec2 = pl.BlockSpec((1, Dc), lambda d, t: (0, d))
    stat_spec2 = pl.BlockSpec((B_pad, Dc), lambda d, t: (0, d))
    stats_shape = jax.ShapeDtypeStruct((B_pad, D), jnp.float32)

    compiler_kw = {}
    est_vmem = 4 * tile_n * D * 4 + 8 * B_pad * D * 4
    if est_vmem > 12 * (1 << 20):   # only very wide feature dims need a raise
        compiler_kw["vmem_limit_bytes"] = min(2 * est_vmem, 64 * (1 << 20))
    reduce_params = pltpu.CompilerParams(
        dimension_semantics=("parallel", "arbitrary"), **compiler_kw)
    norm_params = pltpu.CompilerParams(
        dimension_semantics=("parallel",), **compiler_kw)

    if fused_stats:
        mean, scale = pl.pallas_call(
            fused_stats_kernel,
            out_shape=(stats_shape, stats_shape),
            grid=(n_d, n_t),
            in_specs=[seg_col_spec, x_spec2, cnt_spec2, w_spec2],
            out_specs=(stat_spec2, stat_spec2),
            scratch_shapes=[pltpu.VMEM((B_pad, Dc), jnp.float32),
                            pltpu.VMEM((B_pad, Dc), jnp.float32)],
            compiler_params=reduce_params,
        )(seg_col, x, inv_cnt, w2d)
    else:
        mean = pl.pallas_call(
            mean_kernel,
            out_shape=stats_shape,
            grid=(n_d, n_t),
            in_specs=[seg_col_spec, x_spec2, cnt_spec2],
            out_specs=stat_spec2,
            scratch_shapes=[pltpu.VMEM((B_pad, Dc), jnp.float32)],
            compiler_params=reduce_params,
        )(seg_col, x, inv_cnt)
        scale = pl.pallas_call(
            var_kernel,
            out_shape=stats_shape,
            grid=(n_d, n_t),
            in_specs=[seg_col_spec, seg_row_spec2, x_spec2, stat_spec2,
                      cnt_spec2, w_spec2],
            out_specs=stat_spec2,
            scratch_shapes=[pltpu.VMEM((B_pad, Dc), jnp.float32)],
            compiler_params=reduce_params,
        )(seg_col, seg_row, x, mean, inv_cnt, w2d)

    out = pl.pallas_call(
        normalize_kernel,
        out_shape=jax.ShapeDtypeStruct((N, D), jnp.float32),
        grid=(n_t,),
        in_specs=[pl.BlockSpec((tile_n, 1), lambda t: (t, 0)),
                  pl.BlockSpec((tile_n, D), lambda t: (t, 0)),
                  pl.BlockSpec((B_pad, D), lambda t: (0, 0)),
                  pl.BlockSpec((B_pad, D), lambda t: (0, 0)),
                  pl.BlockSpec((1, D), lambda t: (0, 0))],
        out_specs=pl.BlockSpec((tile_n, D), lambda t: (t, 0)),
        compiler_params=norm_params,
    )(seg_row, x, mean, scale, b2d)
    return out


def graph_norm(x, batch_num_nodes, gnw, gnb, *, fused_stats=True,
               block_target_bytes=_TARGET_BLOCK_BYTES):
    """GraphNorm 'gn' forward.  x: [N, D] float32; batch_num_nodes: node counts.

    fused_stats=True  -> single reduction pass over x (fast path).
    fused_stats=False -> exact two-pass scatter-add variance (torch-faithful).
    """
    lengths = tuple(int(n) for n in np.asarray(batch_num_nodes).reshape(-1))
    return _graph_norm_impl(jnp.asarray(x), jnp.asarray(gnw), jnp.asarray(gnb),
                            lengths, bool(fused_stats), int(block_target_bytes))


def ref_graph_norm_np(x, batch_num_nodes, gnw, gnb):
    """NumPy reference mirroring the PyTorch 'gn' branch."""
    x = np.asarray(x, dtype=np.float32)
    lengths = np.asarray(batch_num_nodes, dtype=np.int64)
    seg = np.repeat(np.arange(len(lengths)), lengths)
    B, D = len(lengths), x.shape[1]
    mean = np.zeros((B, D), np.float32)
    np.add.at(mean, seg, x)
    mean = (mean.T / lengths).T.astype(np.float32)
    sub = x - mean[seg]
    var = np.zeros((B, D), np.float32)
    np.add.at(var, seg, sub ** 2)
    std = np.sqrt((var.T / lengths).T + 1e-6).astype(np.float32)
    return np.asarray(gnw, np.float32) * sub / std[seg] + np.asarray(gnb, np.float32)


if __name__ == "__main__":
    key = jax.random.PRNGKey(0)

    # (hidden_dim, graph sizes, block_target_bytes): cover ragged multi-tile
    # node grids, the D%256==0 two-way 'parallel' feature split, select- and
    # MXU-gather paths, non-128-multiple feature dims and a single-node graph.
    test_cases = [
        (128, [150, 230, 90, 130], 128 * 1024),  # 3 ragged node tiles, select gather
        (32, [3, 1, 7, 5, 9], _TARGET_BLOCK_BYTES),      # tiny, incl. 1-node graph
        (256, [70, 42, 60], 128 * 1024),         # D%256==0 -> 2-way feature split
        (128, [10] * 40, _TARGET_BLOCK_BYTES),   # B>32 -> MXU gather + [mean|scale]
        (96, [7] * 40, _TARGET_BLOCK_BYTES),     # B>32 with non-128-multiple D
    ]
    for case_idx, (hidden_dim, batch_num_nodes, blk) in enumerate(test_cases):
        N = int(sum(batch_num_nodes))
        key, kx, kw, kb = jax.random.split(key, 4)
        x = jax.random.normal(kx, (N, hidden_dim), dtype=jnp.float32)
        # nn.Parameter defaults are ones/zeros; perturb so the affine path is
        # actually exercised by the check.
        gnw = 1.0 + 0.1 * jax.random.normal(kw, (hidden_dim,), dtype=jnp.float32)
        gnb = 0.1 * jax.random.normal(kb, (hidden_dim,), dtype=jnp.float32)
        expected = ref_graph_norm_np(np.asarray(x), batch_num_nodes,
                                     np.asarray(gnw), np.asarray(gnb))
        # Fused single-pass stats everywhere; also check the exact two-pass
        # (torch scatter_add) fallback on the first two cases.
        for fused in ((True, False) if case_idx < 2 else (True,)):
            out = jax.block_until_ready(
                graph_norm(x, batch_num_nodes, gnw, gnb,
                           fused_stats=fused, block_target_bytes=blk))
            np.testing.assert_allclose(np.asarray(out), expected,
                                       rtol=1e-4, atol=1e-4)
    print("KERNEL_OK")
</pallas_src>

<mosaic_0001>
module attributes {stable_mosaic.version = 11 : i64} {
  func.func @fused_stats_kernel(%arg0: i32, %arg1: i32, %arg2: memref<1x256xi32, #tpu.memory_space<vmem>>, %arg3: memref<256x128xf32, #tpu.memory_space<vmem>>, %arg4: memref<8x1xf32, #tpu.memory_space<vmem>>, %arg5: memref<1x128xf32, #tpu.memory_space<vmem>>, %arg6: memref<8x128xf32, #tpu.memory_space<vmem>>, %arg7: memref<8x128xf32, #tpu.memory_space<vmem>>, %arg8: memref<8x128xf32, #tpu.memory_space<vmem>>, %arg9: memref<8x128xf32, #tpu.memory_space<vmem>>) attributes {dimension_semantics = [#tpu.dimension_semantics<parallel>, #tpu.dimension_semantics<arbitrary>], iteration_bounds = array<i64: 1, 3>, scalar_prefetch = 0 : i64, scratch_operands = 2 : i64, tpu.core_type = #tpu.core_type<tc>, window_params = [{transform_indices = @transform_0, window_bounds = array<i64: 1, 256>}, {transform_indices = @transform_1, window_bounds = array<i64: 256, 128>}, {pipeline_mode = #tpu.pipeline_mode<synchronous>, transform_indices = @transform_2, window_bounds = array<i64: 8, 1>}, {transform_indices = @transform_3, window_bounds = array<i64: 1, 128>}, {transform_indices = @transform_4, window_bounds = array<i64: 8, 128>}, {transform_indices = @transform_5, window_bounds = array<i64: 8, 128>}]} {
    %c0_i32 = arith.constant 0 : i32
    %0 = arith.cmpi eq, %arg1, %c0_i32 : i32
    %1 = arith.extui %0 : i1 to i32
    %c0_i32_0 = arith.constant 0 : i32
    %2 = arith.cmpi ne, %1, %c0_i32_0 : i32
    scf.if %2 {
      %cst_16 = arith.constant 0.000000e+00 : f32
      %39 = vector.broadcast %cst_16 : f32 to vector<8x128xf32>
      %c0_17 = arith.constant 0 : index
      %c0_18 = arith.constant 0 : index
      %40 = vector.load %arg8[%c0_17, %c0_18] : memref<8x128xf32, #tpu.memory_space<vmem>>, vector<8x128xf32>
      tpu.vector_store %arg8[%c0_17, %c0_18], %39 {strides = array<i32>} : memref<8x128xf32, #tpu.memory_space<vmem>>, vector<8x128xf32>,
      %cst_19 = arith.constant 0.000000e+00 : f32
      %41 = vector.broadcast %cst_19 : f32 to vector<8x128xf32>
      %c0_20 = arith.constant 0 : index
      %c0_21 = arith.constant 0 : index
      %42 = vector.load %arg9[%c0_20, %c0_21] : memref<8x128xf32, #tpu.memory_space<vmem>>, vector<8x128xf32>
      tpu.vector_store %arg9[%c0_20, %c0_21], %41 {strides = array<i32>} : memref<8x128xf32, #tpu.memory_space<vmem>>, vector<8x128xf32>,
    } else {
    }
    %c0 = arith.constant 0 : index
    %c0_1 = arith.constant 0 : index
    %3 = vector.load %arg3[%c0, %c0_1] : memref<256x128xf32, #tpu.memory_space<vmem>>, vector<256x128xf32>
    %4 = tpu.iota {dimensions = array<i32: 0>} : vector<256x1xi32>
    %c256_i32 = arith.constant 256 : i32
    %5 = arith.muli %arg1, %c256_i32 : i32
    %6 = vector.broadcast %5 : i32 to vector<256x1xi32>
    %7 = arith.addi %4, %6 : vector<256x1xi32>
    %c600_i32 = arith.constant 600 : i32
    %8 = vector.broadcast %c600_i32 : i32 to vector<256x1xi32>
    %9 = arith.cmpi slt, %7, %8 : vector<256x1xi32>
    %cst = arith.constant 0.000000e+00 : f32
    %10 = vector.shape_cast %9 : vector<256x1xi1> to vector<256x1xi1>
    %11 = vector.broadcast %10 : vector<256x1xi1> to vector<256x128xi1>
    %12 = vector.broadcast %cst : f32 to vector<256x128xf32>
    %13 = arith.select %11, %3, %12 : vector<256x128xi1>, vector<256x128xf32>
    %c0_2 = arith.constant 0 : index
    %c0_3 = arith.constant 0 : index
    %14 = vector.load %arg2[%c0_2, %c0_3] : memref<1x256xi32, #tpu.memory_space<vmem>>, vector<1x256xi32>
    %15 = tpu.iota {dimensions = array<i32: 0>} : vector<8x256xi32>
    %16 = vector.broadcast %14 : vector<1x256xi32> to vector<8x256xi32>
    %17 = arith.cmpi eq, %15, %16 : vector<8x256xi32>
    %18 = arith.extui %17 : vector<8x256xi1> to vector<8x256xi32>
    %19 = arith.sitofp %18 : vector<8x256xi32> to vector<8x256xf32>
    %c0_4 = arith.constant 0 : index
    %c0_5 = arith.constant 0 : index
    %20 = vector.load %arg8[%c0_4, %c0_5] : memref<8x128xf32, #tpu.memory_space<vmem>>, vector<8x128xf32>
    %cst_6 = arith.constant dense<0.000000e+00> : vector<8x128xf32>
    %21 = tpu.matmul %19, %13, %cst_6 {dimension_numbers = #tpu.dot_dimension_numbers<[1], [0], [0], [1], [0, 0, 1, 1], [], []>, precision = #tpu.contract_precision<fp32>} : vector<8x256xf32>, vector<256x128xf32>, vector<8x128xf32> -> vector<8x128xf32>
    %22 = arith.addf %20, %21 : vector<8x128xf32>
    %c0_7 = arith.constant 0 : index
    %c0_8 = arith.constant 0 : index
    %23 = vector.load %arg8[%c0_7, %c0_8] : memref<8x128xf32, #tpu.memory_space<vmem>>, vector<8x128xf32>
    tpu.vector_store %arg8[%c0_7, %c0_8], %22 {strides = array<i32>} : memref<8x128xf32, #tpu.memory_space<vmem>>, vector<8x128xf32>,
    %c0_9 = arith.constant 0 : index
    %c0_10 = arith.constant 0 : index
    %24 = vector.load %arg9[%c0_9, %c0_10] : memref<8x128xf32, #tpu.memory_space<vmem>>, vector<8x128xf32>
    %25 = arith.truncf %19 : vector<8x256xf32> to vector<8x256xbf16>
    %26 = arith.mulf %13, %13 : vector<256x128xf32>
    %27 = arith.truncf %26 : vector<256x128xf32> to vector<256x128xbf16>
    %28 = arith.extf %27 : vector<256x128xbf16> to vector<256x128xf32>
    %29 = arith.subf %26, %28 : vector<256x128xf32>
    %30 = arith.truncf %29 : vector<256x128xf32> to vector<256x128xbf16>
    %cst_11 = arith.constant dense<0.000000e+00> : vector<8x128xf32>
    %31 = tpu.matmul %25, %27, %cst_11 {dimension_numbers = #tpu.dot_dimension_numbers<[1], [0], [0], [1], [0, 0, 1, 1], [], []>} : vector<8x256xbf16>, vector<256x128xbf16>, vector<8x128xf32> -> vector<8x128xf32>
    %cst_12 = arith.constant dense<0.000000e+00> : vector<8x128xf32>
    %32 = tpu.matmul %25, %30, %cst_12 {dimension_numbers = #tpu.dot_dimension_numbers<[1], [0], [0], [1], [0, 0, 1, 1], [], []>} : vector<8x256xbf16>, vector<256x128xbf16>, vector<8x128xf32> -> vector<8x128xf32>
    %33 = arith.addf %31, %32 : vector<8x128xf32>
    %34 = arith.addf %24, %33 : vector<8x128xf32>
    %c0_13 = arith.constant 0 : index
    %c0_14 = arith.constant 0 : index
    %35 = vector.load %arg9[%c0_13, %c0_14] : memref<8x128xf32, #tpu.memory_space<vmem>>, vector<8x128xf32>
    tpu.vector_store %arg9[%c0_13, %c0_14], %34 {strides = array<i32>} : memref<8x128xf32, #tpu.memory_space<vmem>>, vector<8x128xf32>,
    %c2_i32 = arith.constant 2 : i32
    %36 = arith.cmpi eq, %arg1, %c2_i32 : i32
    %37 = arith.extui %36 : i1 to i32
    %c0_i32_15 = arith.constant 0 : i32
    %38 = arith.cmpi ne, %37, %c0_i32_15 : i32
    scf.if %38 {
      %c0_16 = arith.constant 0 : index
      %c0_17 = arith.constant 0 : index
      %39 = vector.load %arg8[%c0_16, %c0_17] : memref<8x128xf32, #tpu.memory_space<vmem>>, vector<8x128xf32>
      %c0_18 = arith.constant 0 : index
      %c0_19 = arith.constant 0 : index
      %40 = vector.load %arg4[%c0_18, %c0_19] : memref<8x1xf32, #tpu.memory_space<vmem>>, vector<8x1xf32>
      %41 = vector.broadcast %40 : vector<8x1xf32> to vector<8x128xf32>
      %42 = arith.mulf %39, %41 : vector<8x128xf32>
      %c0_20 = arith.constant 0 : index
      %c0_21 = arith.constant 0 : index
      %43 = vector.load %arg9[%c0_20, %c0_21] : memref<8x128xf32, #tpu.memory_space<vmem>>, vector<8x128xf32>
      %c0_22 = arith.constant 0 : index
      %c0_23 = arith.constant 0 : index
      %44 = vector.load %arg4[%c0_22, %c0_23] : memref<8x1xf32, #tpu.memory_space<vmem>>, vector<8x1xf32>
      %45 = vector.broadcast %44 : vector<8x1xf32> to vector<8x128xf32>
      %46 = arith.mulf %43, %45 : vector<8x128xf32>
      %47 = arith.mulf %42, %42 : vector<8x128xf32>
      %48 = arith.subf %46, %47 : vector<8x128xf32>
      %cst_24 = arith.constant 0.000000e+00 : f32
      %49 = vector.broadcast %cst_24 : f32 to vector<8x128xf32>
      %50 = arith.maximumf %48, %49 : vector<8x128xf32>
      %c0_25 = arith.constant 0 : index
      %c0_26 = arith.constant 0 : index
      %51 = vector.load %arg6[%c0_25, %c0_26] : memref<8x128xf32, #tpu.memory_space<vmem>>, vector<8x128xf32>
      tpu.vector_store %arg6[%c0_25, %c0_26], %42 {strides = array<i32>} : memref<8x128xf32, #tpu.memory_space<vmem>>, vector<8x128xf32>,
      %c0_27 = arith.constant 0 : index
      %c0_28 = arith.constant 0 : index
      %52 = vector.load %arg5[%c0_27, %c0_28] : memref<1x128xf32, #tpu.memory_space<vmem>>, vector<1x128xf32>
      %cst_29 = arith.constant 9.99999997E-7 : f32
      %53 = vector.broadcast %cst_29 : f32 to vector<8x128xf32>
      %54 = arith.addf %50, %53 : vector<8x128xf32>
      %55 = math.rsqrt %54 : vector<8x128xf32>
      %56 = vector.broadcast %52 : vector<1x128xf32> to vector<8x128xf32>
      %57 = arith.mulf %56, %55 : vector<8x128xf32>
      %c0_30 = arith.constant 0 : index
      %c0_31 = arith.constant 0 : index
      %58 = vector.load %arg7[%c0_30, %c0_31] : memref<8x128xf32, #tpu.memory_space<vmem>>, vector<8x128xf32>
      tpu.vector_store %arg7[%c0_30, %c0_31], %57 {strides = array<i32>} : memref<8x128xf32, #tpu.memory_space<vmem>>, vector<8x128xf32>,
    } else {
    }
    return
  }
  func.func @transform_0(%arg0: i32, %arg1: i32) -> (i32, i32) {
    %c0_i32 = arith.constant 0 : i32
    %c0_i32_0 = arith.constant 0 : i32
    return %c0_i32, %arg1 : i32, i32
  }
  func.func @transform_1(%arg0: i32, %arg1: i32) -> (i32, i32) {
    %c0_i32 = arith.constant 0 : i32
    return %arg1, %arg0 : i32, i32
  }
  func.func @transform_2(%arg0: i32, %arg1: i32) -> (i32, i32) {
    %c0_i32 = arith.constant 0 : i32
    %c0_i32_0 = arith.constant 0 : i32
    %c0_i32_1 = arith.constant 0 : i32
    return %c0_i32, %c0_i32_0 : i32, i32
  }
  func.func @transform_3(%arg0: i32, %arg1: i32) -> (i32, i32) {
    %c0_i32 = arith.constant 0 : i32
    %c0_i32_0 = arith.constant 0 : i32
    return %c0_i32, %arg0 : i32, i32
  }
  func.func @transform_4(%arg0: i32, %arg1: i32) -> (i32, i32) {
    %c0_i32 = arith.constant 0 : i32
    %c0_i32_0 = arith.constant 0 : i32
    return %c0_i32, %arg0 : i32, i32
  }
  func.func @transform_5(%arg0: i32, %arg1: i32) -> (i32, i32) {
    %c0_i32 = arith.constant 0 : i32
    %c0_i32_0 = arith.constant 0 : i32
    return %c0_i32, %arg0 : i32, i32
  }
}

module attributes {stable_mosaic.version = 11 : i64} {
  func.func @normalize_kernel(%arg0: i32, %arg1: memref<256x1xi32, #tpu.memory_space<vmem>>, %arg2: memref<256x128xf32, #tpu.memory_space<vmem>>, %arg3: memref<8x128xf32, #tpu.memory_space<vmem>>, %arg4: memref<8x128xf32, #tpu.memory_space<vmem>>, %arg5: memref<1x128xf32, #tpu.memory_space<vmem>>, %arg6: memref<256x128xf32, #tpu.memory_space<vmem>>) attributes {dimension_semantics = [#tpu.dimension_semantics<parallel>], iteration_bounds = array<i64: 3>, scalar_prefetch = 0 : i64, scratch_operands = 0 : i64, tpu.core_type = #tpu.core_type<tc>, window_params = [{transform_indices = @transform_0, window_bounds = array<i64: 256, 1>}, {transform_indices = @transform_1, window_bounds = array<i64: 256, 128>}, {pipeline_mode = #tpu.pipeline_mode<synchronous>, transform_indices = @transform_2, window_bounds = array<i64: 8, 128>}, {pipeline_mode = #tpu.pipeline_mode<synchronous>, transform_indices = @transform_3, window_bounds = array<i64: 8, 128>}, {pipeline_mode = #tpu.pipeline_mode<synchronous>, transform_indices = @transform_4, window_bounds = array<i64: 1, 128>}, {transform_indices = @transform_5, window_bounds = array<i64: 256, 128>}]} {
    %c0 = arith.constant 0 : index
    %c0_0 = arith.constant 0 : index
    %0 = vector.load %arg1[%c0, %c0_0] : memref<256x1xi32, #tpu.memory_space<vmem>>, vector<256x1xi32>
    %c0_1 = arith.constant 0 : index
    %c0_2 = arith.constant 0 : index
    %1 = vector.load %arg3[%c0_1, %c0_2] : memref<8x128xf32, #tpu.memory_space<vmem>>, vector<8x128xf32>
    %cst = arith.constant 0.000000e+00 : f32
    %2 = vector.broadcast %cst : f32 to vector<256x128xf32>
    %c0_i32 = arith.constant 0 : i32
    %3 = vector.broadcast %c0_i32 : i32 to vector<256x1xi32>
    %4 = arith.cmpi eq, %0, %3 : vector<256x1xi32>
    %5 = vector.extract_strided_slice %1 {offsets = [0, 0], sizes = [1, 128], strides = [1, 1]} : vector<8x128xf32> to vector<1x128xf32>
    %6 = vector.shape_cast %4 : vector<256x1xi1> to vector<256x1xi1>
    %7 = vector.broadcast %6 : vector<256x1xi1> to vector<256x128xi1>
    %8 = vector.shape_cast %5 : vector<1x128xf32> to vector<1x128xf32>
    %9 = vector.broadcast %8 : vector<1x128xf32> to vector<256x128xf32>
    %10 = arith.select %7, %9, %2 : vector<256x128xi1>, vector<256x128xf32>
    %c1_i32 = arith.constant 1 : i32
    %11 = vector.broadcast %c1_i32 : i32 to vector<256x1xi32>
    %12 = arith.cmpi eq, %0, %11 : vector<256x1xi32>
    %13 = vector.extract_strided_slice %1 {offsets = [1, 0], sizes = [1, 128], strides = [1, 1]} : vector<8x128xf32> to vector<1x128xf32>
    %14 = vector.shape_cast %12 : vector<256x1xi1> to vector<256x1xi1>
    %15 = vector.broadcast %14 : vector<256x1xi1> to vector<256x128xi1>
    %16 = vector.shape_cast %13 : vector<1x128xf32> to vector<1x128xf32>
    %17 = vector.broadcast %16 : vector<1x128xf32> to vector<256x128xf32>
    %18 = arith.select %15, %17, %10 : vector<256x128xi1>, vector<256x128xf32>
    %c2_i32 = arith.constant 2 : i32
    %19 = vector.broadcast %c2_i32 : i32 to vector<256x1xi32>
    %20 = arith.cmpi eq, %0, %19 : vector<256x1xi32>
    %21 = vector.extract_strided_slice %1 {offsets = [2, 0], sizes = [1, 128], strides = [1, 1]} : vector<8x128xf32> to vector<1x128xf32>
    %22 = vector.shape_cast %20 : vector<256x1xi1> to vector<256x1xi1>
    %23 = vector.broadcast %22 : vector<256x1xi1> to vector<256x128xi1>
    %24 = vector.shape_cast %21 : vector<1x128xf32> to vector<1x128xf32>
    %25 = vector.broadcast %24 : vector<1x128xf32> to vector<256x128xf32>
    %26 = arith.select %23, %25, %18 : vector<256x128xi1>, vector<256x128xf32>
    %c3_i32 = arith.constant 3 : i32
    %27 = vector.broadcast %c3_i32 : i32 to vector<256x1xi32>
    %28 = arith.cmpi eq, %0, %27 : vector<256x1xi32>
    %29 = vector.extract_strided_slice %1 {offsets = [3, 0], sizes = [1, 128], strides = [1, 1]} : vector<8x128xf32> to vector<1x128xf32>
    %30 = vector.shape_cast %28 : vector<256x1xi1> to vector<256x1xi1>
    %31 = vector.broadcast %30 : vector<256x1xi1> to vector<256x128xi1>
    %32 = vector.shape_cast %29 : vector<1x128xf32> to vector<1x128xf32>
    %33 = vector.broadcast %32 : vector<1x128xf32> to vector<256x128xf32>
    %34 = arith.select %31, %33, %26 : vector<256x128xi1>, vector<256x128xf32>
    %c0_3 = arith.constant 0 : index
    %c0_4 = arith.constant 0 : index
    %35 = vector.load %arg4[%c0_3, %c0_4] : memref<8x128xf32, #tpu.memory_space<vmem>>, vector<8x128xf32>
    %cst_5 = arith.constant 0.000000e+00 : f32
    %36 = vector.broadcast %cst_5 : f32 to vector<256x128xf32>
    %c0_i32_6 = arith.constant 0 : i32
    %37 = vector.broadcast %c0_i32_6 : i32 to vector<256x1xi32>
    %38 = arith.cmpi eq, %0, %37 : vector<256x1xi32>
    %39 = vector.extract_strided_slice %35 {offsets = [0, 0], sizes = [1, 128], strides = [1, 1]} : vector<8x128xf32> to vector<1x128xf32>
    %40 = vector.shape_cast %38 : vector<256x1xi1> to vector<256x1xi1>
    %41 = vector.broadcast %40 : vector<256x1xi1> to vector<256x128xi1>
    %42 = vector.shape_cast %39 : vector<1x128xf32> to vector<1x128xf32>
    %43 = vector.broadcast %42 : vector<1x128xf32> to vector<256x128xf32>
    %44 = arith.select %41, %43, %36 : vector<256x128xi1>, vector<256x128xf32>
    %c1_i32_7 = arith.constant 1 : i32
    %45 = vector.broadcast %c1_i32_7 : i32 to vector<256x1xi32>
    %46 = arith.cmpi eq, %0, %45 : vector<256x1xi32>
    %47 = vector.extract_strided_slice %35 {offsets = [1, 0], sizes = [1, 128], strides = [1, 1]} : vector<8x128xf32> to vector<1x128xf32>
    %48 = vector.shape_cast %46 : vector<256x1xi1> to vector<256x1xi1>
    %49 = vector.broadcast %48 : vector<256x1xi1> to vector<256x128xi1>
    %50 = vector.shape_cast %47 : vector<1x128xf32> to vector<1x128xf32>
    %51 = vector.broadcast %50 : vector<1x128xf32> to vector<256x128xf32>
    %52 = arith.select %49, %51, %44 : vector<256x128xi1>, vector<256x128xf32>
    %c2_i32_8 = arith.constant 2 : i32
    %53 = vector.broadcast %c2_i32_8 : i32 to vector<256x1xi32>
    %54 = arith.cmpi eq, %0, %53 : vector<256x1xi32>
    %55 = vector.extract_strided_slice %35 {offsets = [2, 0], sizes = [1, 128], strides = [1, 1]} : vector<8x128xf32> to vector<1x128xf32>
    %56 = vector.shape_cast %54 : vector<256x1xi1> to vector<256x1xi1>
    %57 = vector.broadcast %56 : vector<256x1xi1> to vector<256x128xi1>
    %58 = vector.shape_cast %55 : vector<1x128xf32> to vector<1x128xf32>
    %59 = vector.broadcast %58 : vector<1x128xf32> to vector<256x128xf32>
    %60 = arith.select %57, %59, %52 : vector<256x128xi1>, vector<256x128xf32>
    %c3_i32_9 = arith.constant 3 : i32
    %61 = vector.broadcast %c3_i32_9 : i32 to vector<256x1xi32>
    %62 = arith.cmpi eq, %0, %61 : vector<256x1xi32>
    %63 = vector.extract_strided_slice %35 {offsets = [3, 0], sizes = [1, 128], strides = [1, 1]} : vector<8x128xf32> to vector<1x128xf32>
    %64 = vector.shape_cast %62 : vector<256x1xi1> to vector<256x1xi1>
    %65 = vector.broadcast %64 : vector<256x1xi1> to vector<256x128xi1>
    %66 = vector.shape_cast %63 : vector<1x128xf32> to vector<1x128xf32>
    %67 = vector.broadcast %66 : vector<1x128xf32> to vector<256x128xf32>
    %68 = arith.select %65, %67, %60 : vector<256x128xi1>, vector<256x128xf32>
    %c0_10 = arith.constant 0 : index
    %c0_11 = arith.constant 0 : index
    %69 = vector.load %arg2[%c0_10, %c0_11] : memref<256x128xf32, #tpu.memory_space<vmem>>, vector<256x128xf32>
    %70 = arith.subf %69, %34 : vector<256x128xf32>
    %71 = arith.mulf %70, %68 : vector<256x128xf32>
    %c0_12 = arith.constant 0 : index
    %c0_13 = arith.constant 0 : index
    %72 = vector.load %arg5[%c0_12, %c0_13] : memref<1x128xf32, #tpu.memory_space<vmem>>, vector<1x128xf32>
    %73 = vector.broadcast %72 : vector<1x128xf32> to vector<256x128xf32>
    %74 = arith.addf %71, %73 : vector<256x128xf32>
    %c0_14 = arith.constant 0 : index
    %c0_15 = arith.constant 0 : index
    %75 = vector.load %arg6[%c0_14, %c0_15] : memref<256x128xf32, #tpu.memory_space<vmem>>, vector<256x128xf32>
    tpu.vector_store %arg6[%c0_14, %c0_15], %74 {strides = array<i32>} : memref<256x128xf32, #tpu.memory_space<vmem>>, vector<256x128xf32>,
    return
  }
  func.func @transform_0(%arg0: i32) -> (i32, i32) {
    %c0_i32 = arith.constant 0 : i32
    %c0_i32_0 = arith.constant 0 : i32
    return %arg0, %c0_i32 : i32, i32
  }
  func.func @transform_1(%arg0: i32) -> (i32, i32) {
    %c0_i32 = arith.constant 0 : i32
    %c0_i32_0 = arith.constant 0 : i32
    return %arg0, %c0_i32 : i32, i32
  }
  func.func @transform_2(%arg0: i32) -> (i32, i32) {
    %c0_i32 = arith.constant 0 : i32
    %c0_i32_0 = arith.constant 0 : i32
    %c0_i32_1 = arith.constant 0 : i32
    return %c0_i32, %c0_i32_0 : i32, i32
  }
  func.func @transform_3(%arg0: i32) -> (i32, i32) {
    %c0_i32 = arith.constant 0 : i32
    %c0_i32_0 = arith.constant 0 : i32
    %c0_i32_1 = arith.constant 0 : i32
    return %c0_i32, %c0_i32_0 : i32, i32
  }
  func.func @transform_4(%arg0: i32) -> (i32, i32) {
    %c0_i32 = arith.constant 0 : i32
    %c0_i32_0 = arith.constant 0 : i32
    %c0_i32_1 = arith.constant 0 : i32
    return %c0_i32, %c0_i32_0 : i32, i32
  }
  func.func @transform_5(%arg0: i32) -> (i32, i32) {
    %c0_i32 = arith.constant 0 : i32
    %c0_i32_0 = arith.constant 0 : i32
    return %arg0, %c0_i32 : i32, i32
  }
}

</mosaic_0001>

<bundles_post_ra>
// kernel: _graph_norm_impl.2
= control target key start
LH: loop header
LB: loop body
LE: loop exit
PB: predicated region body
PF: predicated region fallthrough
CT: control target
= control target key end

     0   :  { %11 = vsyncpa [#allocation5], 0  ;;  %s3268_s0 = inlined_call_operand.vmem [shape: s32[1,600], index: 0, kind: input, shape index: {}]   ;;  %s3269_s1 = inlined_call_operand.hbm [shape: f32[600,128], index: 1, kind: input, shape index: {}]   ;;  %s3270_s2 = inlined_call_operand.hbm [shape: f32[8,1], index: 2, kind: input, shape index: {}]   ;;  %s3271_s3 = inlined_call_operand.hbm [shape: f32[1,128], index: 3, kind: input, shape index: {}]   ;;  %s3272_s4 = inlined_call_operand.vmem [shape: f32[8,128], index: 4, kind: output, shape index: {0}]   ;;  %s3273_s5 = inlined_call_operand.vmem [shape: f32[8,128], index: 5, kind: output, shape index: {1}]  }
   0x1   :  { %13 = vsyncpa [#allocation5 + $0x1], 0 }
   0x2   :  { %14 = vsyncpa [#allocation7], 0  ;;  %s2057_s18 = smov 0   ;;  %s2059_s19 = smov 0  }
   0x3   :  { %s2061_s20 = smov 0   ;;  %s2063_s21 = smov 0  }
   0x4   :  { %s2065_s22 = smov 0   ;;  %s2067_s23 = smov 0  }
   0x5 LB: > { %s1740_s24 = sadd.s32 4294967295, %s2015_s23   ;;  %s29_s25 = sadd.s32 1, %s2011_s22  ;;  %s2015_s23 = sphi %s2067_s23, %s20_s23   ;;  %s2011_s22 = sphi %s2065_s22, %s3423_s22   ;;  %s2007_s21 = sphi %s2063_s21, %s3422_s21   ;;  %s2003_s20 = sphi %s2061_s20, %s3421_s20   ;;  %s1999_s19 = sphi %s2059_s19, %s3420_s19   ;;  %s1995_s18 = sphi %s2057_s18, %s3419_s18  }
   0x6   : > { %p30_p0 = scmp.ge.s32.totalorder %s29_s25, 3  ;;  %s67_s26 = sadd.s32 1, %s2003_s20 }
   0x7   : > { %p74_p1 = scmp.ne.s32.totalorder %s2003_s20, %s1999_s19  ;;  %p75_p2 = scmp.eq.s32.totalorder %s2015_s23, 0 }
   0x8   : > { %s3425_s25 = smov (%p30_p0, %s29_s25), 0  ;;  %p80_p4 = scmp.ne.s32.totalorder %s1999_s19, %s1995_s18 }
   0x9   : > { %p2093_p3 = por %p75_p2, %p74_p1  ;;  %s62_s28 = ssub.s32 %s2011_s22, %s3425_s25 }
   0xa   : > { %p2100_p5 = scmp.eq.s32.totalorder %s1740_s24, 0  ;;  %p65_p6 = scmp.eq.s32.totalorder %s62_s28, 0 }
   0xb   : > { %p1741_p7 = scmp.ge.s32.totalorder %s2015_s23, 1  ;;  %p190_p9 = scmp.lt.s32.totalorder %s2015_s23, 4 }
   0xc   : > { %p2107_p8 = por %p2100_p5, %p80_p4  ;;  %s202_s10 = sshll.u32 %s3270_s2, 4  ;;  %s203_s10 = int_to_ptr.hbm [resolvable:$true] %s202_s10 }
   0xd   : > { %s2113_s6 = scalar_select %p65_p6, %s2003_s20, %s67_s26  }
   0xe   : > { %p2115_p10 = pnand %p1741_p7, %p190_p9  ;;  %s2017_s11 = smov [#allocation6]  }
   0xf   : > { %s204_s12 = sshll.u32 %s2017_s11, 4  ;;  %s215_s15 = sshll.u32 %s3271_s3, 4  ;;  %s205_s12 = int_to_ptr.vmem [resolvable:$true] %s204_s12  ;;  %s216_s15 = int_to_ptr.hbm [resolvable:$true] %s215_s15 }
  0x10   : > { %p1790_p11 = pneg %p2115_p10  ;;  %s2018_s16 = smov [#allocation8]  }
  0x11   : > { %s217_s17 = sshll.u32 %s2018_s16, 4  ;;  %p1744_p13 = scmp.ge.s32.totalorder %s2015_s23, 3  ;;  %s218_s17 = int_to_ptr.vmem [resolvable:$true] %s217_s17 }
  0x12   : > { %p1791_p12 = pnand %p1790_p11, %p2100_p5 }
  0x13   : > { %224 = sbr.rel (%p1744_p13) target bundleno = 60 (0x3c), region = 24 }
  0x14   : > { %1793 = dma.hbm_to_vmem [thread:$0]  (!%p1791_p12), %s203_s10, 128, %s205_s12, [#allocation7]  }
  0x15   : > { %1796 = dma.hbm_to_vmem [thread:$0]  (!%p1791_p12), %s216_s15, 16, %s218_s17, [#allocation7]  }
  0x18   : > { %241 = sbr.rel (!%p2093_p3) target bundleno = 60 (0x3c), region = 32  ;;  %s242_s18 = sand.u32 (%p2093_p3), 1, %s2003_s20  }
  0x19   : > { %s1746_s24 = sshll.u32 (%p2093_p3), %s2011_s22, 5  ;;  %s1745_s26 = sshll.u32 (%p2093_p3), %s242_s18, 8 }
  0x1a   : > { %s248_s28 = ssub.s32 (%p2093_p3), 75, %s1746_s24  ;;  %s2137_s11 = scalar_lea.sflag (%p2093_p3), [#allocation5], %s242_s18 }
  0x1b   : > { %p249_p0 = scmp.lt.s32.totalorder (%p2093_p3), %s248_s28, 32  ;;  %s246_s12 = scalar_lea.vmem (%p2093_p3), [#allocation4], %s1745_s26 }
  0x1d   : > { %s3427_s28 = smov (!%p249_p0, %s248_s28), 32 }
  0x1e   : > { %s1747_s8 = sshll.u32 %s3427_s28, 3 }
  0x1f   : > { %s252_s9 = ssub.s32 256, %s1747_s8 }
  0x20   : > { %s253_s10 = sshll.u32 %s252_s9, 4 }
  0x21   : > { %254 = vsyncadd %s2137_s11, %s253_s10  ;;  %p2140_p1 = scmp.ne.s32.totalorder %s1747_s8, 0  ;;  %s1780_s13 = sshll.u32 %s2011_s22, 8 }
  0x22   : > { %s258_s16 = scalar_lea.hbm %s3269_s1, %s1780_s13  ;;  %s2148_s17 = sshll.u32 %s246_s12, 4  ;;  %s263_s17 = int_to_ptr.vmem [resolvable:$true] %s2148_s17 }
  0x23   : > { %s260_s18 = sshll.u32 %s258_s16, 4  ;;  %s1751_s24 = sshll.u32 %s3427_s28, 7  ;;  %s2151_s18 = int_to_ptr.hbm [resolvable:$true] %s260_s18 }
  0x24   : > { %s1922_s26 = sshra.s32 %s2151_s18, 4  ;;  %s1924_s8 = sshrl.u32 %s1751_s24, 4  ;;  %s1923_s26 = int_to_ptr.hbm [resolvable:$true] %s1922_s26 }
  0x25   : > { %s1929_s9 = scalar_lea.hbm %s1923_s26, %s1924_s8  ;;  %s1933_s12 = scalar_lea.hbm %s3269_s1, 600 }
  0x26   : > { %p1930_p2 = scmp.ne.s32.totalorder %s1923_s26, %s1929_s9  ;;  %p1935_p6 = scmp.lt.s32.totalorder %s1933_s12, %s1929_s9 }
  0x28   : > { %p1931_p3 = pnand %p1930_p2, %p2140_p1 }
  0x2a   : > { %p1932_p4 = pneg %p1931_p3 }
  0x2c   : > { %p1937_p7 = pnand %p1935_p6, %p1932_p4 }
  0x2e   : > { %1940 = shalt.err (!%p1937_p7)
}
  0x2f   : > { %s1941_s14 = sshra.s32 %s263_s17, 4  ;;  %s2019_s16 = smov [#allocation4]   ;;  %s1942_s14 = int_to_ptr.vmem [resolvable:$true] %s1941_s14 }
  0x30   : > { %s1948_s15 = scalar_lea.vmem %s1942_s14, %s1924_s8  ;;  %s1952_s26 = scalar_lea.vmem %s2019_s16, 512 }
  0x31   : > { %p1949_p9 = scmp.ne.s32.totalorder %s1942_s14, %s1948_s15  ;;  %p1954_p13 = scmp.lt.s32.totalorder %s1952_s26, %s1948_s15 }
  0x33   : > { %p1950_p11 = pnand %p1949_p9, %p2140_p1 }
  0x35   : > { %p1951_p12 = pneg %p1950_p11 }
  0x37   : > { %p1956_p0 = pnand %p1954_p13, %p1951_p12 }
  0x39   : > { %1959 = shalt.err (!%p1956_p0)
}
  0x3a   : > { %s2020_s10 = smov 128   ;;  %s2021_s9 = smov 8  }
  0x3b   : > { %268 = dma.hbm_to_vmem [thread:$0]  (%p2140_p1), %s2151_s18, %s1751_s24, %s263_s17, %s2137_s11, %s2020_s10, %s2020_s10, %s2021_s9  }
  0x3c PF: > { %274 = sbr.rel (%p2115_p10) target bundleno = 524 (0x20c), region = 36 }
  0x41   : > { %s276_s8 = sand.u32 1, %s1999_s19  }
  0x42   : > { %s1753_s13 = sshll.u32 %s276_s8, 8  ;;  %s277_s12 = scalar_lea.sflag [#allocation5], %s276_s8 }
  0x43   : > { %s2177_s14 = scalar_lea.vmem [#allocation4], %s1753_s13 }
  0x44   : > { %1986 = dma.done.wait (%p2107_p8), %s277_s12, 4096  }
  0x45   : > { %1988 = vsyncadd (%p2107_p8), %s277_s12, 4294963200 }
  0x46   : > { %1990 = dma.done.wait (%p2100_p5), [#allocation7], 144  }
  0x47   : > { %1992 = vsyncadd (%p2100_p5), [#allocation7], 4294967152  ;;  %s1756_s7 = sshll.u32 %s2007_s21, 1  ;;  %p1757_p1 = scmp.ne.s32.totalorder %s2007_s21, 0 }
  0x48   : > { %p332_p10 = scmp.lt.s32.totalorder %s1756_s7, 4 }
  0x49   : > { %355 = sbr.rel (%p1757_p1) target bundleno = 81 (0x51), region = 52 }
  0x4a   : > { %s3429_s7 = smov (!%p332_p10, %s1756_s7), 4 }
  0x4b   : > { %s334_s27 = scalar_lea.vmem %s3268_s0, %s3429_s7 }
  0x4e   : > { %v2022_v0 = vmov 0.0  }
  0x4f   : > { %356 = vst [vmem:[#allocation2] sm:$0xff] %v2022_v0 }
  0x50   : > { %357 = vst [vmem:[#allocation3] sm:$0xff] %v2022_v0 }
  0x51 PF: > { %v390_v1 = vlaneseq  ;;  %s1758_s29 = sshll.u32 %s2007_s21, 8  ;;  %v373_v8 = vld [vmem:[%s2177_s14 + $0x78] sm:$0xff]  ;;  %v372_v14 = vld [vmem:[%s2177_s14 + $0x70] sm:$0xff]  ;;  %v371_v16 = vld [vmem:[%s2177_s14 + $0x68] sm:$0xff]  ;;  %p1775_p5 = scmp.ne.s32.totalorder %s2007_s21, 2 }
  0x52   : > { %v2198_v3 = vstv %s1758_s29  ;;  %v370_v18 = vld [vmem:[%s2177_s14 + $0x60] sm:$0xff]  ;;  %v369_v28 = vld [vmem:[%s2177_s14 + $0x58] sm:$0xff]  ;;  %v368_v33 = vld [vmem:[%s2177_s14 + $0x50] sm:$0xff] }
  0x53   : > { %v2196_v2 = vshrl.u32 %v390_v1, 7  ;;  %v367_v34 = vld [vmem:[%s2177_s14 + $0x48] sm:$0xff]  ;;  %v366_v39 = vld [vmem:[%s2177_s14 + $0x40] sm:$0xff] }
  0x55   : > { %v406_v4 = vadd.s32 120, %v2196_v2  ;;  %v405_v5 = vadd.s32 112, %v2196_v2  ;;  %v404_v6 = vadd.s32 104, %v2196_v2  ;;  %v403_v7 = vadd.s32 96, %v2196_v2 }
  0x56   : > { %v402_v9 = vadd.s32 88, %v2196_v2  ;;  %v401_v10 = vadd.s32 80, %v2196_v2  ;;  %v400_v11 = vadd.s32 72, %v2196_v2  ;;  %v399_v12 = vadd.s32 64, %v2196_v2 }
  0x57   : > { %v440_v13 = vadd.s32 %v2198_v3, %v406_v4  ;;  %v439_v15 = vadd.s32 %v2198_v3, %v405_v5  ;;  %v438_v17 = vadd.s32 %v2198_v3, %v404_v6  ;;  %v437_v19 = vadd.s32 %v2198_v3, %v403_v7  ;;  %v365_v4 = vld [vmem:[%s2177_s14 + $0x38] sm:$0xff] }
  0x58   : > { %v436_v20 = vadd.s32 %v2198_v3, %v402_v9  ;;  %v435_v21 = vadd.s32 %v2198_v3, %v401_v10  ;;  %v434_v22 = vadd.s32 %v2198_v3, %v400_v11  ;;  %v433_v23 = vadd.s32 %v2198_v3, %v399_v12  ;;  %v364_v11 = vld [vmem:[%s2177_s14 + $0x30] sm:$0xff] }
  0x59   : > { %vm472_vm0 = vcmp.lt.s32.totalorder %v440_v13, 600  ;;  %vm471_vm1 = vcmp.lt.s32.totalorder %v439_v15, 600  ;;  %vm470_vm2 = vcmp.lt.s32.totalorder %v438_v17, 600  ;;  %vm469_vm3 = vcmp.lt.s32.totalorder %v437_v19, 600 }
  0x5a   : > { %v2220_v24 = vsel %vm472_vm0, %v373_v8, 0.0  ;;  %v2222_v25 = vsel %vm471_vm1, %v372_v14, 0.0  ;;  %v2224_v26 = vsel %vm470_vm2, %v371_v16, 0.0  ;;  %v2226_v27 = vsel %vm469_vm3, %v370_v18, 0.0  ;;  %v363_v18 = vld [vmem:[%s2177_s14 + $0x28] sm:$0xff] }
  0x5b   : > { %3332 = vst [vmem:[#allocation11_spill] sm:$0xff] %v2224_v26  ;;  %v2230_v29 = vand.u32 4294901760, %v2220_v24  ;;  %v2233_v30 = vand.u32 4294901760, %v2222_v25  ;;  %v2236_v31 = vand.u32 4294901760, %v2224_v26  ;;  %v2239_v32 = vand.u32 4294901760, %v2226_v27 }
  0x5c   : > { %vm468_vm4 = vcmp.lt.s32.totalorder %v436_v20, 600  ;;  %vm467_vm5 = vcmp.lt.s32.totalorder %v435_v21, 600  ;;  %vm466_vm6 = vcmp.lt.s32.totalorder %v434_v22, 600  ;;  %vm465_vm7 = vcmp.lt.s32.totalorder %v433_v23, 600 }
  0x5d   : > { %596 = vmatpush.msra.mxu0 %v2230_v29  ;;  %792 = vmatpush.msra.mxu3 %v2230_v29  ;;  %v2247_v35 = vsub.f32 %v2220_v24, %v2230_v29  ;;  %v2251_v36 = vsub.f32 %v2222_v25, %v2233_v30  ;;  %v2255_v37 = vsub.f32 %v2224_v26, %v2236_v31  ;;  %v2257_v38 = vsel %vm468_vm4, %v369_v28, 0.0 }
  0x5e   : > { %3333 = vst [vmem:[#allocation12_spill] sm:$0xff] %v2257_v38  ;;  %v2261_v40 = vand.u32 4294901760, %v2257_v38  ;;  %v2265_v41 = vsub.f32 %v2226_v27, %v2239_v32  ;;  %v2267_v42 = vsel %vm467_vm5, %v368_v33, 0.0  ;;  %v2269_v43 = vsel %vm466_vm6, %v367_v34, 0.0  ;;  %v362_v33 = vld [vmem:[%s2177_s14 + $0x20] sm:$0xff] }
  0x5f   : > { %3334 = vst [vmem:[#allocation13_spill] sm:$0xff] %v2267_v42  ;;  %598 = vmatpush.msra.mxu0 %v2233_v30  ;;  %739 = vmatpush.msra.mxu2 %v2247_v35  ;;  %v3285_v44 = vand.u32 4294901760, %v2247_v35  ;;  %v2275_v45 = vand.u32 4294901760, %v2267_v42  ;;  %v3283_v46 = vand.u32 4294901760, %v2251_v36  ;;  %v2279_v47 = vand.u32 4294901760, %v2269_v43 }
  0x60   : > { %3335 = vst [vmem:[#allocation14_spill] sm:$0xff] %v2269_v43  ;;  %794 = vmatpush.msra.mxu3 %v2233_v30  ;;  %v2284_v48 = vsub.f32 %v2257_v38, %v2261_v40  ;;  %v3282_v49 = vand.u32 4294901760, %v2255_v37  ;;  %v2288_v50 = vsel %vm465_vm7, %v366_v39, 0.0  ;;  %v3281_v51 = vand.u32 4294901760, %v2265_v41  ;;  %v381_v38 = vld [vmem:[%s2177_s14 + $0xb8] sm:$0xff] }
  0x61   : > { %3336 = vst [vmem:[#allocation15_spill] sm:$0xff] %v2288_v50  ;;  %600 = vmatpush.msra.mxu0 %v2236_v31  ;;  %742 = vmatpush.msra.mxu2 %v2251_v36  ;;  %v639_v52 = vsub.f32 %v2247_v35, %v3285_v44  ;;  %v645_v53 = vsub.f32 %v2251_v36, %v3283_v46  ;;  %v2304_v55 = vand.u32 4294901760, %v2288_v50  ;;  %v398_v59 = vadd.s32 56, %v2196_v2  ;;  %v388_v46 = vld [vmem:[%s2177_s14 + $0xf0] sm:$0xff] }
  0x62   : > { %v2301_v54 = vsub.f32 %v2267_v42, %v2275_v45  ;;  %796 = vmatpush.msra.mxu3 %v2236_v31  ;;  %v651_v56 = vsub.f32 %v2255_v37, %v3282_v49  ;;  %v657_v57 = vsub.f32 %v2265_v41, %v3281_v51  ;;  %v2315_v58 = vsub.f32 %v2269_v43, %v2279_v47 }
  0x63   : > { %602 = vmatpush.msra.mxu0 %v2239_v32  ;;  %745 = vmatpush.msra.mxu2 %v2255_v37  ;;  %v640_v60 = vand.u32 4294901760, %v639_v52  ;;  %v646_v61 = vand.u32 4294901760, %v645_v53  ;;  %v3280_v62 = vand.u32 4294901760, %v2284_v48  ;;  %v2323_v63 = vsub.f32 %v2288_v50, %v2304_v55  ;;  %v384_v50 = vld [vmem:[%s2177_s14 + $0xd0] sm:$0xff] }
  0x64   : > { %798 = vmatpush.msra.mxu3 %v2239_v32  ;;  %v652_v0 = vand.u32 4294901760, %v651_v56  ;;  %v658_v1 = vand.u32 4294901760, %v657_v57  ;;  %v432_v5 = vadd.s32 %v2198_v3, %v398_v59  ;;  %v397_v6 = vadd.s32 48, %v2196_v2 }
  0x65   : > { %604 = vmatpush.msra.mxu0 %v2261_v40  ;;  %641 = vmatpush.msra.mxu1 %v640_v60  ;;  %v663_v7 = vsub.f32 %v2284_v48, %v3280_v62  ;;  %v3279_v8 = vand.u32 4294901760, %v2301_v54  ;;  %v396_v9 = vadd.s32 40, %v2196_v2  ;;  %v3278_v10 = vand.u32 4294901760, %v2315_v58 }
  0x66   : > { %748 = vmatpush.msra.mxu2 %v2265_v41  ;;  %800 = vmatpush.msra.mxu3 %v2261_v40  ;;  %vm464_vm8 = vcmp.lt.s32.totalorder %v432_v5, 600  ;;  %v431_v12 = vadd.s32 %v2198_v3, %v397_v6  ;;  %v395_v13 = vadd.s32 32, %v2196_v2  ;;  %v3277_v14 = vand.u32 4294901760, %v2323_v63 }
  0x67   : > { %606 = vmatpush.msra.mxu0 %v2275_v45  ;;  %647 = vmatpush.msra.mxu1 %v646_v61  ;;  %v2343_v15 = vsel %vm464_vm8, %v365_v4, 0.0  ;;  %v664_v16 = vand.u32 4294901760, %v663_v7  ;;  %v669_v17 = vsub.f32 %v2301_v54, %v3279_v8  ;;  %v430_v19 = vadd.s32 %v2198_v3, %v396_v9  ;;  %v361_v7 = vld [vmem:[%s2177_s14 + $0x18] sm:$0xff] }
  0x68   : > { %3337 = vst [vmem:[#allocation16_spill] sm:$0xff] %v2343_v15  ;;  %751 = vmatpush.msra.mxu2 %v2284_v48  ;;  %802 = vmatpush.msra.mxu3 %v2275_v45  ;;  %v2353_v20 = vand.u32 4294901760, %v2343_v15  ;;  %vm463_vm9 = vcmp.lt.s32.totalorder %v431_v12, 600  ;;  %v675_v21 = vsub.f32 %v2315_v58, %v3278_v10  ;;  %v429_v22 = vadd.s32 %v2198_v3, %v395_v13  ;;  %v360_v13 = vld [vmem:[%s2177_s14 + $0x10] sm:$0xff]  ;;  %v389_v8 = vld [vmem:[%s2177_s14 + $0xf8] sm:$0xff] }
  0x69   : > { %608 = vmatpush.msra.mxu0 %v2279_v47  ;;  %653 = vmatpush.msra.mxu1 %v652_v0  ;;  %v2360_v23 = vsel %vm463_vm9, %v364_v11, 0.0  ;;  %v670_v28 = vand.u32 4294901760, %v669_v17  ;;  %vm462_vm10 = vcmp.lt.s32.totalorder %v430_v19, 600  ;;  %v681_v34 = vsub.f32 %v2323_v63, %v3277_v14 }
  0x6a   : > { %3338 = vst [vmem:[#allocation17_spill] sm:$0xff] %v2360_v23  ;;  %754 = vmatpush.msra.mxu2 %v2301_v54  ;;  %804 = vmatpush.msra.mxu3 %v2279_v47  ;;  %v2369_v39 = vand.u32 4294901760, %v2360_v23  ;;  %v2373_v52 = vsub.f32 %v2343_v15, %v2353_v20  ;;  %v2375_v53 = vsel %vm462_vm10, %v363_v18, 0.0  ;;  %v676_v56 = vand.u32 4294901760, %v675_v21  ;;  %v359_v21 = vld [vmem:[%s2177_s14 + $0x8] sm:$0xff] }
  0x6b   : > { %3339 = vst [vmem:[#allocation18_spill] sm:$0xff] %v2375_v53  ;;  %610 = vmatpush.msra.mxu0 %v2304_v55  ;;  %659 = vmatpush.msra.mxu1 %v658_v1  ;;  %v2379_v57 = vand.u32 4294901760, %v2375_v53  ;;  %vm461_vm11 = vcmp.lt.s32.totalorder %v429_v22, 600  ;;  %v682_v59 = vand.u32 4294901760, %v681_v34  ;;  %v394_v60 = vadd.s32 24, %v2196_v2 }
  0x6c   : > { %757 = vmatpush.msra.mxu2 %v2315_v58  ;;  %806 = vmatpush.msra.mxu3 %v2304_v55  ;;  %v2386_v61 = vsub.f32 %v2360_v23, %v2369_v39  ;;  %v2388_v0 = vsel %vm461_vm11, %v362_v33, 0.0  ;;  %v3276_v1 = vand.u32 4294901760, %v2373_v52  ;;  %v393_v4 = vadd.s32 16, %v2196_v2 }
  0x6d   : > { %3340 = vst [vmem:[#allocation19_spill] sm:$0xff] %v2388_v0  ;;  %612 = vmatpush.msra.mxu0 %v2353_v20  ;;  %665 = vmatpush.msra.mxu1 %v664_v16  ;;  %v2394_v5 = vand.u32 4294901760, %v2388_v0  ;;  %v2398_v6 = vsub.f32 %v2375_v53, %v2379_v57  ;;  %v428_v9 = vadd.s32 %v2198_v3, %v394_v60  ;;  %v392_v11 = vadd.s32 8, %v2196_v2 }
  0x6e   : > { %760 = vmatpush.msra.mxu2 %v2323_v63  ;;  %808 = vmatpush.msra.mxu3 %v2353_v20  ;;  %v687_v12 = vsub.f32 %v2373_v52, %v3276_v1  ;;  %v427_v16 = vadd.s32 %v2198_v3, %v393_v4  ;;  %v3274_v17 = vand.u32 4294901760, %v2386_v61  ;;  %v425_v18 = vadd.s32 %v2198_v3, %v2196_v2  ;;  %v358_v4 = vld [vmem:[%s2177_s14] sm:$0xff] }
  0x6f   : > { %614 = vmatpush.msra.mxu0 %v2369_v39  ;;  %671 = vmatpush.msra.mxu1 %v670_v28  ;;  %vm460_vm12 = vcmp.lt.s32.totalorder %v428_v9, 600  ;;  %v2416_v19 = vsub.f32 %v2388_v0, %v2394_v5  ;;  %v426_v22 = vadd.s32 %v2198_v3, %v392_v11  ;;  %v3275_v33 = vand.u32 4294901760, %v2398_v6  ;;  %v385_v0 = vld [vmem:[%s2177_s14 + $0xd8] sm:$0xff] }
  0x70   : > { %763 = vmatpush.msra.mxu2 %v2373_v52  ;;  %810 = vmatpush.msra.mxu3 %v2369_v39  ;;  %v2423_v34 = vsel %vm460_vm12, %v361_v7, 0.0  ;;  %v688_v60 = vand.u32 4294901760, %v687_v12  ;;  %vm459_vm13 = vcmp.lt.s32.totalorder %v427_v16, 600  ;;  %v693_v28 = vsub.f32 %v2386_v61, %v3274_v17 }
  0x71   : > { %3341 = vst [vmem:[#allocation20_spill] sm:$0xff] %v2423_v34  ;;  %616 = vmatpush.msra.mxu0 %v2379_v57  ;;  %677 = vmatpush.msra.mxu1 %v676_v56  ;;  %v2431_v9 = vand.u32 4294901760, %v2423_v34  ;;  %v2433_v11 = vsel %vm459_vm13, %v360_v13, 0.0  ;;  %vm458_vm14 = vcmp.lt.s32.totalorder %v426_v22, 600  ;;  %v699_v7 = vsub.f32 %v2398_v6, %v3275_v33 }
  0x72   : > { %3342 = vst [vmem:[#allocation21_spill] sm:$0xff] %v2433_v11  ;;  %766 = vmatpush.msra.mxu2 %v2386_v61  ;;  %812 = vmatpush.msra.mxu3 %v2379_v57  ;;  %v2441_v12 = vand.u32 4294901760, %v2433_v11  ;;  %v694_v16 = vand.u32 4294901760, %v693_v28  ;;  %v2443_v17 = vsel %vm458_vm14, %v359_v21, 0.0  ;;  %vm457_vm15 = vcmp.lt.s32.totalorder %v425_v18, 600 }
  0x73   : > { %3343 = vst [vmem:[#allocation22_spill] sm:$0xff] %v2443_v17  ;;  %618 = vmatpush.msra.mxu0 %v2394_v5  ;;  %683 = vmatpush.msra.mxu1 %v682_v59  ;;  %v2448_v56 = vsub.f32 %v2423_v34, %v2431_v9  ;;  %v2451_v13 = vand.u32 4294901760, %v2443_v17  ;;  %v700_v22 = vand.u32 4294901760, %v699_v7  ;;  %v2453_v33 = vsel %vm457_vm15, %v358_v4, 0.0 }
  0x74   : > { %3344 = vst [vmem:[#allocation23_spill] sm:$0xff] %v2453_v33  ;;  %769 = vmatpush.msra.mxu2 %v2398_v6  ;;  %814 = vmatpush.msra.mxu3 %v2394_v5  ;;  %v2459_v18 = vsub.f32 %v2433_v11, %v2441_v12  ;;  %v2462_v59 = vand.u32 4294901760, %v2453_v33  ;;  %v3284_v21 = vand.u32 4294901760, %v2416_v19  ;;  %v422_v28 = vadd.s32 248, %v2196_v2 }
  0x75   : > { %620 = vmatpush.msra.mxu0 %v2431_v9  ;;  %689 = vmatpush.msra.mxu1 %v688_v60  ;;  %v2469_v4 = vsub.f32 %v2443_v17, %v2451_v13  ;;  %v3288_v7 = vand.u32 4294901760, %v2448_v56  ;;  %v421_v1 = vadd.s32 240, %v2196_v2  ;;  %v420_v14 = vadd.s32 232, %v2196_v2 }
  0x76   : > { %772 = vmatpush.msra.mxu2 %v2416_v19  ;;  %816 = vmatpush.msra.mxu3 %v2431_v9  ;;  %v705_v10 = vsub.f32 %v2416_v19, %v3284_v21  ;;  %v456_v60 = vadd.s32 %v2198_v3, %v422_v28  ;;  %v2483_v62 = vsub.f32 %v2453_v33, %v2462_v59  ;;  %v3289_v51 = vand.u32 4294901760, %v2459_v18  ;;  %v387_v33 = vld [vmem:[%s2177_s14 + $0xe8] sm:$0xff] }
  0x77   : > { %622 = vmatpush.msra.mxu0 %v2441_v12  ;;  %695 = vmatpush.msra.mxu1 %v694_v16  ;;  %v711_v49 = vsub.f32 %v2448_v56, %v3288_v7  ;;  %v455_v21 = vadd.s32 %v2198_v3, %v421_v1  ;;  %v454_v44 = vadd.s32 %v2198_v3, %v420_v14  ;;  %v3290_v28 = vand.u32 4294901760, %v2469_v4 }
  0x78   : > { %775 = vmatpush.msra.mxu2 %v2448_v56  ;;  %818 = vmatpush.msra.mxu3 %v2441_v12  ;;  %v706_v17 = vand.u32 4294901760, %v705_v10  ;;  %vm488_vm0 = vcmp.lt.s32.totalorder %v456_v60, 600  ;;  %v717_v16 = vsub.f32 %v2459_v18, %v3289_v51  ;;  %v419_v7 = vadd.s32 224, %v2196_v2 }
  0x79   : > { %624 = vmatpush.msra.mxu0 %v2451_v13  ;;  %701 = vmatpush.msra.mxu1 %v700_v22  ;;  %v2502_v1 = vsel %vm488_vm0, %v389_v8, 0.0  ;;  %v712_v14 = vand.u32 4294901760, %v711_v49  ;;  %vm487_vm1 = vcmp.lt.s32.totalorder %v455_v21, 600  ;;  %vm486_vm2 = vcmp.lt.s32.totalorder %v454_v44, 600  ;;  %v386_v21 = vld [vmem:[%s2177_s14 + $0xe0] sm:$0xff] }
  0x7a   : > { %778 = vmatpush.msra.mxu2 %v2459_v18  ;;  %820 = vmatpush.msra.mxu3 %v2451_v13  ;;  %v2507_v10 = vand.u32 4294901760, %v2502_v1  ;;  %v2509_v60 = vsel %vm487_vm1, %v388_v46, 0.0  ;;  %v718_v8 = vand.u32 4294901760, %v717_v16  ;;  %v2515_v49 = vsel %vm486_vm2, %v387_v33, 0.0 }
  0x7b   : > { %626 = vmatpush.msra.mxu0 %v2462_v59  ;;  %707 = vmatpush.msra.mxu1 %v706_v17  ;;  %v2513_v22 = vand.u32 4294901760, %v2509_v60  ;;  %v723_v44 = vsub.f32 %v2469_v4, %v3290_v28  ;;  %v2527_v17 = vand.u32 4294901760, %v2515_v49  ;;  %v453_v16 = vadd.s32 %v2198_v3, %v419_v7 }
  0x7c   : > { %781 = vmatpush.msra.mxu2 %v2469_v4  ;;  %822 = vmatpush.msra.mxu3 %v2462_v59  ;;  %v2524_v46 = vsub.f32 %v2502_v1, %v2507_v10  ;;  %v3298_v33 = vand.u32 4294901760, %v2483_v62  ;;  %v3345_v51 = vand.u32 4294901760, %v2247_v35  ;;  %v418_v11 = vadd.s32 216, %v2196_v2 }
  0x7d   : > { %713 = vmatpush.msra.mxu1 %v712_v14  ;;  %v2536_v28 = vsub.f32 %v2509_v60, %v2513_v22  ;;  %v724_v34 = vand.u32 4294901760, %v723_v44  ;;  %v417_v53 = vadd.s32 208, %v2196_v2  ;;  %v2544_v35 = vsub.f32 %v2515_v49, %v2527_v17 }
  0x7e   : > { %833 = vmatpush.msrb.mxu0 %v3345_v51  ;;  %784 = vmatpush.msra.mxu2 %v2483_v62  ;;  %vm485_vm3 = vcmp.lt.s32.totalorder %v453_v16, 600  ;;  %v729_v51 = vsub.f32 %v2483_v62, %v3298_v33  ;;  %v3346_v7 = vand.u32 4294901760, %v2251_v36  ;;  %v452_v15 = vadd.s32 %v2198_v3, %v418_v11 }
  0x7f   : > { %v3300_v14 = vand.u32 4294901760, %v2536_v28  ;;  %v2553_v44 = vsel %vm485_vm3, %v386_v21, 0.0  ;;  %v451_v23 = vadd.s32 %v2198_v3, %v417_v53  ;;  %v3347_v16 = vand.u32 4294901760, %v2524_v46  ;;  %719 = vmatpush.msra.mxu1 %v718_v8 }
  0x80   : > { %837 = vmatpush.msrb.mxu0 %v3346_v7  ;;  %937 = vmatpush.msrb.mxu2 %v2507_v10  ;;  %v3301_v33 = vand.u32 4294901760, %v2544_v35  ;;  %v2563_v36 = vand.u32 4294901760, %v2553_v44  ;;  %v730_v7 = vand.u32 4294901760, %v729_v51  ;;  %v3348_v11 = vand.u32 4294901760, %v2255_v37 }
  0x81   : > { %v980_v43 = vsub.f32 %v2524_v46, %v3347_v16  ;;  %v986_v21 = vsub.f32 %v2536_v28, %v3300_v14  ;;  %vm484_vm4 = vcmp.lt.s32.totalorder %v452_v15, 600  ;;  %vm483_vm5 = vcmp.lt.s32.totalorder %v451_v23, 600  ;;  %725 = vmatpush.msra.mxu1 %v724_v34  ;;  %v383_v23 = vld [vmem:[%s2177_s14 + $0xc8] sm:$0xff] }
  0x82   : > { %841 = vmatpush.msrb.mxu0 %v3348_v11  ;;  %939 = vmatpush.msrb.mxu2 %v2513_v22  ;;  %v416_v53 = vadd.s32 200, %v2196_v2  ;;  %v992_v51 = vsub.f32 %v2544_v35, %v3301_v33  ;;  %v2578_v16 = vsub.f32 %v2553_v44, %v2563_v36  ;;  %v2580_v14 = vsel %vm484_vm4, %v385_v0, 0.0 }
  0x83   : > { %v981_v8 = vand.u32 4294901760, %v980_v43  ;;  %3349 = vst [vmem:[#allocation24_spill] sm:$0xff] %v2580_v14  ;;  %v987_v37 = vand.u32 4294901760, %v986_v21  ;;  %v3350_v11 = vand.u32 4294901760, %v2265_v41  ;;  %v2586_v15 = vand.u32 4294901760, %v2580_v14  ;;  %731 = vmatpush.msra.mxu1 %v730_v7 }
  0x84   : > { %941 = vmatpush.msrb.mxu2 %v2527_v17  ;;  %v2588_v43 = vsel %vm483_vm5, %v384_v50, 0.0  ;;  %v450_v34 = vadd.s32 %v2198_v3, %v416_v53  ;;  %v993_v33 = vand.u32 4294901760, %v992_v51  ;;  %v3302_v0 = vand.u32 4294901760, %v2578_v16  ;;  %v382_v51 = vld [vmem:[%s2177_s14 + $0xc0] sm:$0xff] }
  0x85   : > { %845 = vmatpush.msrb.mxu0 %v3350_v11  ;;  %982 = vmatpush.msrb.mxu3 %v981_v8  ;;  %v2594_v21 = vand.u32 4294901760, %v2588_v43  ;;  %v415_v41 = vadd.s32 192, %v2196_v2  ;;  %v3351_v11 = vand.u32 4294901760, %v2284_v48  ;;  %v2602_v50 = vsub.f32 %v2580_v14, %v2586_v15 }
  0x86   : > { %900 = vmatpush.msrb.mxu1 %v2230_v29  ;;  %vm482_vm6 = vcmp.lt.s32.totalorder %v450_v34, 600  ;;  %v414_v53 = vadd.s32 184, %v2196_v2  ;;  %v413_v7 = vadd.s32 176, %v2196_v2  ;;  %v998_v8 = vsub.f32 %v2578_v16, %v3302_v0  ;;  %943 = vmatpush.msrb.mxu2 %v2563_v36 }
  0x87   : > { %849 = vmatpush.msrb.mxu0 %v3351_v11  ;;  %988 = vmatpush.msrb.mxu3 %v987_v37  ;;  %v2612_v29 = vsub.f32 %v2588_v43, %v2594_v21  ;;  %v2614_v48 = vsel %vm482_vm6, %v383_v23, 0.0  ;;  %v449_v34 = vadd.s32 %v2198_v3, %v415_v41  ;;  %v3352_v37 = vand.u32 4294901760, %v2301_v54  ;;  %v380_v11 = vld [vmem:[%s2177_s14 + $0xb0] sm:$0xff] }
  0x88   : > { %902 = vmatpush.msrb.mxu1 %v2233_v30  ;;  %v2623_v0 = vand.u32 4294901760, %v2614_v48  ;;  %v448_v42 = vadd.s32 %v2198_v3, %v414_v53  ;;  %v447_v14 = vadd.s32 %v2198_v3, %v413_v7  ;;  %v999_v23 = vand.u32 4294901760, %v998_v8  ;;  %945 = vmatpush.msrb.mxu2 %v2586_v15 }
  0x89   : > { %853 = vmatpush.msrb.mxu0 %v3352_v37  ;;  %994 = vmatpush.msrb.mxu3 %v993_v33  ;;  %v3307_v41 = vand.u32 4294901760, %v2612_v29  ;;  %vm481_vm7 = vcmp.lt.s32.totalorder %v449_v34, 600  ;;  %v412_v54 = vadd.s32 168, %v2196_v2  ;;  %v3353_v30 = vand.u32 4294901760, %v2602_v50 }
  0x8a   : > { %v3354_v26 = vand.u32 4294901760, %v2315_v58  ;;  %904 = vmatpush.msrb.mxu1 %v2236_v31  ;;  %v2640_v33 = vsub.f32 %v2614_v48, %v2623_v0  ;;  %v2642_v53 = vsel %vm481_vm7, %v382_v51, 0.0  ;;  %vm480_vm8 = vcmp.lt.s32.totalorder %v448_v42, 600  ;;  %947 = vmatpush.msrb.mxu2 %v2594_v21 }
  0x8b   : > { %v1004_v37 = vsub.f32 %v2602_v50, %v3353_v30  ;;  %1000 = vmatpush.msrb.mxu3 %v999_v23  ;;  %v1010_v7 = vsub.f32 %v2612_v29, %v3307_v41  ;;  %v2649_v58 = vand.u32 4294901760, %v2642_v53  ;;  %vm479_vm9 = vcmp.lt.s32.totalorder %v447_v14, 600  ;;  %v379_v30 = vld [vmem:[%s2177_s14 + $0xa8] sm:$0xff] }
  0x8c   : > { %857 = vmatpush.msrb.mxu0 %v3354_v26  ;;  %v2651_v26 = vsel %vm480_vm8, %v381_v38, 0.0  ;;  %v3308_v8 = vand.u32 4294901760, %v2640_v33  ;;  %v3357_v51 = vand.u32 4294901760, %v2323_v63  ;;  %906 = vmatpush.msrb.mxu1 %v2239_v32  ;;  %v2660_v34 = vsel %vm479_vm9, %v380_v11, 0.0 }
  0x8d   : > { %3355 = vst [vmem:[#allocation25_spill] sm:$0xff] %v2649_v58  ;;  %v1005_v31 = vand.u32 4294901760, %v1004_v37  ;;  %v2658_v42 = vand.u32 4294901760, %v2651_v26  ;;  %v1011_v23 = vand.u32 4294901760, %v1010_v7  ;;  %949 = vmatpush.msrb.mxu2 %v2623_v0  ;;  %v2665_v38 = vsub.f32 %v2642_v53, %v2649_v58 }
  0x8e   : > { %3356 = vst [vmem:[#allocation26_spill] sm:$0xff] %v2651_v26  ;;  %861 = vmatpush.msrb.mxu0 %v3357_v51  ;;  %v2668_v14 = vand.u32 4294901760, %v2660_v34  ;;  %v446_v63 = vadd.s32 %v2198_v3, %v412_v54  ;;  %v1016_v32 = vsub.f32 %v2640_v33, %v3308_v8  ;;  %v3360_v11 = vand.u32 4294901760, %v2373_v52  ;;  %908 = vmatpush.msrb.mxu1 %v2261_v40  ;;  %v378_v40 = vld [vmem:[%s2177_s14 + $0xa0] sm:$0xff] }
  0x8f   : > { %3358 = vst [vmem:[#allocation27_spill] sm:$0xff] %v2658_v42  ;;  %1006 = vmatpush.msrb.mxu3 %v1005_v31  ;;  %v2679_v37 = vsub.f32 %v2651_v26, %v2658_v42  ;;  %v411_v7 = vadd.s32 160, %v2196_v2  ;;  %v410_v51 = vadd.s32 152, %v2196_v2  ;;  %951 = vmatpush.msrb.mxu2 %v2649_v58  ;;  %v409_v52 = vadd.s32 144, %v2196_v2 }
  0x90   : > { %3359 = vst [vmem:[#allocation28_spill] sm:$0xff] %v2660_v34  ;;  %865 = vmatpush.msrb.mxu0 %v3360_v11  ;;  %v2688_v54 = vsub.f32 %v2660_v34, %v2668_v14  ;;  %vm478_vm10 = vcmp.lt.s32.totalorder %v446_v63, 600  ;;  %v1017_v31 = vand.u32 4294901760, %v1016_v32  ;;  %v3361_v8 = vand.u32 4294901760, %v2386_v61  ;;  %910 = vmatpush.msrb.mxu1 %v2275_v45  ;;  %v377_v45 = vld [vmem:[%s2177_s14 + $0x98] sm:$0xff] }
  0x91   : > { %1012 = vmatpush.msrb.mxu3 %v1011_v23  ;;  %v3315_v11 = vand.u32 4294901760, %v2679_v37  ;;  %v2694_v41 = vsel %vm478_vm10, %v379_v30, 0.0  ;;  %v445_v26 = vadd.s32 %v2198_v3, %v411_v7  ;;  %v3362_v34 = vand.u32 4294901760, %v2665_v38  ;;  %953 = vmatpush.msrb.mxu2 %v2658_v42 }
  0x92   : > { %869 = vmatpush.msrb.mxu0 %v3361_v8  ;;  %v2705_v32 = vand.u32 4294901760, %v2694_v41  ;;  %v444_v61 = vadd.s32 %v2198_v3, %v410_v51  ;;  %v3363_v30 = vand.u32 4294901760, %v2398_v6  ;;  %v443_v7 = vadd.s32 %v2198_v3, %v409_v52  ;;  %912 = vmatpush.msrb.mxu1 %v2279_v47  ;;  %v585_v47 = vld [vmem:[%s334_s27] sm:$0x3] }
  0x93   : > { %v1022_v63 = vsub.f32 %v2665_v38, %v3362_v34  ;;  %1018 = vmatpush.msrb.mxu3 %v1017_v31  ;;  %v1028_v8 = vsub.f32 %v2679_v37, %v3315_v11  ;;  %vm477_vm11 = vcmp.lt.s32.totalorder %v445_v26, 600  ;;  %v376_v34 = vld [vmem:[%s2177_s14 + $0x90] sm:$0xff]  ;;  %v408_v23 = vadd.s32 136, %v2196_v2  ;;  %955 = vmatpush.msrb.mxu2 %v2668_v14 }
  0x94   : > { %873 = vmatpush.msrb.mxu0 %v3363_v30  ;;  %v3364_v58 = vand.u32 4294901760, %v2688_v54  ;;  %v2724_v6 = vsub.f32 %v2694_v41, %v2705_v32  ;;  %v2726_v26 = vsel %vm477_vm11, %v378_v40, 0.0  ;;  %v3365_v52 = vand.u32 4294901760, %v2416_v19  ;;  %914 = vmatpush.msrb.mxu1 %v2304_v55  ;;  %v375_v55 = vld [vmem:[%s2177_s14 + $0x88] sm:$0xff] }
  0x95   : > { %v1023_v42 = vand.u32 4294901760, %v1022_v63  ;;  %v1029_v31 = vand.u32 4294901760, %v1028_v8  ;;  %v2731_v63 = vand.u32 4294901760, %v2726_v26  ;;  %vm476_vm12 = vcmp.lt.s32.totalorder %v444_v61, 600  ;;  %957 = vmatpush.msrb.mxu2 %v2705_v32 }
  0x96   : > { %v1034_v51 = vsub.f32 %v2688_v54, %v3364_v58  ;;  %877 = vmatpush.msrb.mxu0 %v3365_v52  ;;  %vm475_vm13 = vcmp.lt.s32.totalorder %v443_v7, 600  ;;  %v3316_v40 = vand.u32 4294901760, %v2724_v6  ;;  %v2740_v8 = vsel %vm476_vm12, %v377_v45, 0.0  ;;  %916 = vmatpush.msrb.mxu1 %v2353_v20 }
  0x97   : > { %1024 = vmatpush.msrb.mxu3 %v1023_v42  ;;  %3366 = vst [vmem:[#allocation29_spill] sm:$0xff] %v2740_v8  ;;  %v2742_v19 = vsel %vm475_vm13, %v376_v34, 0.0  ;;  %v2747_v61 = vsub.f32 %v2726_v26, %v2731_v63  ;;  %v3367_v30 = vand.u32 4294901760, %v2448_v56  ;;  %v2752_v42 = vand.u32 4294901760, %v2740_v8  ;;  %959 = vmatpush.msrb.mxu2 %v2731_v63 }
  0x98   : > { %v1035_v58 = vand.u32 4294901760, %v1034_v51  ;;  %v2755_v7 = vand.u32 4294901760, %v2742_v19  ;;  %v442_v45 = vadd.s32 %v2198_v3, %v408_v23  ;;  %v1040_v34 = vsub.f32 %v2724_v6, %v3316_v40  ;;  %918 = vmatpush.msrb.mxu1 %v2369_v39 }
  0x99   : > { %881 = vmatpush.msrb.mxu0 %v3367_v30  ;;  %1030 = vmatpush.msrb.mxu3 %v1029_v31  ;;  %v407_v51 = vadd.s32 128, %v2196_v2  ;;  %v586_v56 = vperm.slane %v585_v47, 0  ;;  %v587_v52 = vperm.slane %v585_v47, 1  ;;  %v2768_v11 = vsub.f32 %v2740_v8, %v2752_v42 }
  0x9a   : > { %v3368_v23 = vand.u32 4294901760, %v2459_v18  ;;  %v2774_v31 = vsub.f32 %v2742_v19, %v2755_v7  ;;  %vm474_vm14 = vcmp.lt.s32.totalorder %v442_v45, 600  ;;  %v1041_v20 = vand.u32 4294901760, %v1040_v34  ;;  %961 = vmatpush.msrb.mxu2 %v2752_v42  ;;  %920 = vmatpush.msrb.mxu1 %v2379_v57 }
  0x9b   : > { %1036 = vmatpush.msrb.mxu3 %v1035_v58  ;;  %v2777_v47 = vsel %vm474_vm14, %v375_v55, 0.0  ;;  %v441_v40 = vadd.s32 %v2198_v3, %v407_v51  ;;  %vm2781_vm15 = vcmp.eq.s32.totalorder %v2196_v2, %v586_v56  ;;  %v3370_v30 = vmov 0  ;;  %v374_v55 = vld [vmem:[%s2177_s14 + $0x80] sm:$0xff] }
  0x9c   : > { %885 = vmatpush.msrb.mxu0 %v3368_v23  ;;  %3369 = vst [vmem:[#allocation30_spill] sm:$0xff] %v2777_v47  ;;  %v3371_v30 = vsel %vm2781_vm15, 4294967295, %v3370_v30  ;;  %v3373_v18 = vand.u32 4294901760, %v2747_v61  ;;  %v3320_v8 = vand.u32 4294901760, %v2768_v11  ;;  %v3319_v58 = vand.u32 4294901760, %v2774_v31  ;;  %963 = vmatpush.msrb.mxu2 %v2755_v7  ;;  %vm1767_vm2 = vmpackc.low %vm2781_vm15, %vm2781_vm15 }
  0x9d   : > { %3372 = vst [vmem:[#allocation31_spill] sm:$0xff] %v3371_v30  ;;  %v3374_v39 = vand.u32 4294901760, %v2469_v4  ;;  %v2794_v3 = vand.u32 4294901760, %v2777_v47  ;;  %v2799_v45 = vmul.f32 %v2502_v1, %v2502_v1  ;;  %1042 = vmatpush.msrb.mxu3 %v1041_v20  ;;  %vm473_vm0 = vcmp.lt.s32.totalorder %v441_v40, 600  ;;  %922 = vmatpush.msrb.mxu1 %v2394_v5 }
  0x9e   : > { %v1046_v23 = vsub.f32 %v2747_v61, %v3373_v18  ;;  %vm2803_vm1 = vcmp.eq.s32.totalorder %v2196_v2, %v587_v52  ;;  %v1052_v4 = vsub.f32 %v2768_v11, %v3320_v8  ;;  %v1058_v56 = vsub.f32 %v2774_v31, %v3319_v58 }
  0x9f   : > { %889 = vmatpush.msrb.mxu0 %v3374_v39  ;;  %v2816_v57 = vsub.f32 %v2777_v47, %v2794_v3  ;;  %v3377_v2 = vand.u32 4294901760, %v2483_v62  ;;  %v2822_v1 = vmul.f32 %v2509_v60, %v2509_v60  ;;  %v2825_v40 = vsel %vm473_vm0, %v374_v55, 0.0  ;;  %965 = vmatpush.msrb.mxu2 %v2794_v3  ;;  %vm1769_vm3 = vmpackc.low %vm2803_vm1, %vm2803_vm1 }
  0xa0   : > { %v1047_v51 = vand.u32 4294901760, %v1046_v23  ;;  %v2023_v52 = vmov 0.0   ;;  %v1053_v23 = vand.u32 4294901760, %v1052_v4  ;;  %v1059_v39 = vand.u32 4294901760, %v1058_v56  ;;  %924 = vmatpush.msrb.mxu1 %v2431_v9 }
  0xa1   : > { %893 = vmatpush.msrb.mxu0 %v3377_v2  ;;  %v1759_v20 = vsel %vm2781_vm15, 1.0, %v2023_v52  ;;  %v1760_v18 = vsel %vm2803_vm1, 1.0, %v2023_v52  ;;  %v3318_v62 = vand.u32 4294901760, %v2816_v57  ;;  %v2834_v60 = vand.u32 4294901760, %v2825_v40 }
  0xa2   : > { %1048 = vmatpush.msrb.mxu3 %v1047_v51  ;;  %v628_v5 = vsub.f32 %v1759_v20, %v1759_v20  ;;  %v2837_v55 = vsub.f32 %v1760_v18, %v1760_v18  ;;  %926 = vmatpush.msrb.mxu1 %v2441_v12  ;;  %v3378_v20 = vand.u32 4294901760, %v2524_v46  ;;  %v1344_v18 = vpack.c.bf16 %v2822_v1, %v2822_v1 }
  0xa3   : > { %v1064_v2 = vsub.f32 %v2816_v57, %v3318_v62  ;;  %v2844_v51 = vsub.f32 %v2825_v40, %v2834_v60  ;;  %967 = vmatpush.msrb.mxu2 %v2834_v60  ;;  %v3321_v58 = vmov 1.0   ;;  %v1296_v8 = vmul.f32 %v2222_v25, %v2222_v25 }
  0xa4   : > { %1054 = vmatpush.msrb.mxu3 %v1053_v23  ;;  %v629_v4 = vand.u32 4294901760, %v628_v5  ;;  %787 = vmatmul.f32.vlgmr.msra.gmra.mxu2 %v628_v5  ;;  %v3324_v56 = vand.u32 4294901760, %v2837_v55  ;;  %v1345_v23 = vpack.c.bf16 %v2799_v45, %v2799_v45  ;;  %v3380_v47 = vand.u32 4294901760, %v2544_v35 }
  0xa5   : > { %v1065_v9 = vand.u32 4294901760, %v1064_v2  ;;  %v3325_v52 = vand.u32 4294901760, %v2844_v51  ;;  %1174 = vmatpush.msra.mxu2 %v3378_v20  ;;  %1761 = vmatmul.msk.f32.vlgmr.msra.gmra.mxu1 %vm2781_vm15, %v3321_v58  ;;  %v3379_v2 = vand.u32 4294901760, %v2536_v28  ;;  %v1514_v20 = vunpack.c.l.b16 %v1344_v18 }
  0xa6   : > { %1060 = vmatpush.msrb.mxu3 %v1059_v39  ;;  %v630_v62 = vsub.f32 %v628_v5, %v629_v4  ;;  %v971_v12 = vsub.f32 %v2837_v55, %v3324_v56  ;;  %v1515_v5 = vunpack.c.l.b16 %v1345_v23  ;;  %928 = vmatpush.msrb.mxu1 %v2451_v13  ;;  %v1310_v13 = vmul.f32 %v2553_v44, %v2553_v44 }
  0xa7   : > { %826 = vmatmul.f32.vlgmr.msra.gmra.mxu3 %v629_v4  ;;  %v1070_v39 = vsub.f32 %v2844_v51, %v3325_v52  ;;  %1178 = vmatpush.msra.mxu2 %v3379_v2  ;;  %v1311_v25 = vmul.f32 %v2515_v49, %v2515_v49  ;;  %v1377_v44 = vunpack.c.l.bf16 %v1345_v23 }
  0xa8   : > { %1066 = vmatpush.msrb.mxu3 %v1065_v9  ;;  %v631_v4 = vand.u32 4294901760, %v630_v62  ;;  %v1297_v9 = vmul.f32 %v2220_v24, %v2220_v24  ;;  %v2874_v56 = vpack.c.b16 %v1515_v5, %v1514_v20  ;;  %930 = vmatpush.msrb.mxu1 %v2462_v59  ;;  %v972_v2 = vand.u32 4294901760, %v971_v12 }
  0xa9   : > { %v1071_v58 = vand.u32 4294901760, %v1070_v39  ;;  %1182 = vmatpush.msra.mxu2 %v3380_v47  ;;  %v2884_v24 = vpack.c.bf16 %v1296_v8, %v1296_v8  ;;  %v3381_v59 = vand.u32 4294901760, %v2578_v16  ;;  %v1376_v62 = vunpack.c.l.bf16 %v1344_v18 }
  0xaa   : > { %632 = vmatmul.f32.vlgmr.msra.gmra.mxu0 %v631_v4  ;;  %1133 = vmatpush.msra.mxu1 %v2507_v10  ;;  %v2889_v47 = vpack.c.bf16 %v1297_v9, %v1297_v9  ;;  %v3383_v18 = vmov 1.0   ;;  %v2909_v23 = vsub.f32 %v2799_v45, %v1377_v44  ;;  %v1308_v20 = vmul.f32 %v2588_v43, %v2588_v43  ;;  %v3385_v4 = vld [vmem:[#allocation24_spill] sm:$0xff] }
  0xab   : > { %1072 = vmatpush.msrb.mxu3 %v1071_v58  ;;  %1080 = vmatpush.msra.mxu0 %v2524_v46  ;;  %v1342_v46 = vpack.c.bf16 %v1310_v13, %v1310_v13  ;;  %v1343_v58 = vpack.c.bf16 %v1311_v25, %v1311_v25  ;;  %v1360_v12 = vunpack.c.l.bf16 %v2884_v24  ;;  %v2899_v39 = vsub.f32 %v2822_v1, %v1376_v62  ;;  %v3384_v1 = vld [vmem:[#allocation11_spill] sm:$0xff] }
  0xac   : > { %1186 = vmatpush.msra.mxu2 %v3381_v59  ;;  %1135 = vmatpush.msra.mxu1 %v2513_v22  ;;  %v2923_v5 = vmul.f32 %v3384_v1, %v3384_v1  ;;  %v1309_v45 = vmul.f32 %v3385_v4, %v3385_v4  ;;  %v3387_v59 = vld [vmem:[#allocation13_spill] sm:$0xff] }
  0xad   : > { %1241 = vmatpush.msra.mxu3 %v2507_v10  ;;  %1083 = vmatpush.msra.mxu0 %v2536_v28  ;;  %v1512_v10 = vunpack.c.l.b16 %v1342_v46  ;;  %v1513_v49 = vunpack.c.l.b16 %v1343_v58  ;;  %v3382_v28 = vand.u32 4294901760, %v2602_v50  ;;  %v2936_v62 = vmul.f32 %v3387_v59, %v3387_v59 }
  0xae   : > { %973 = vmatmul.f32.vlgmr.msrb.gmra.mxu2 %v972_v2  ;;  %1137 = vmatpush.msra.mxu1 %v2527_v17  ;;  %v1340_v2 = vpack.c.bf16 %v1308_v20, %v1308_v20  ;;  %v1374_v44 = vunpack.c.l.bf16 %v1342_v46  ;;  %v1375_v4 = vunpack.c.l.bf16 %v1343_v58  ;;  %v2965_v58 = vmul.f32 %v2642_v53, %v2642_v53 }
  0xaf   : > { %1243 = vmatpush.msra.mxu3 %v2513_v22  ;;  %1086 = vmatpush.msra.mxu0 %v2544_v35  ;;  %v1361_v22 = vunpack.c.l.bf16 %v2889_v47  ;;  %v2906_v35 = vpack.c.b16 %v1513_v49, %v1512_v10  ;;  %v3388_v10 = vld [vmem:[#allocation12_spill] sm:$0xff] }
  0xb0   : > { %1190 = vmatpush.msra.mxu2 %v3382_v28  ;;  %1764 = vmatmul.msk.f32.vlgmr.msrb.gmra.mxu3 %vm2803_vm1, %v3383_v18  ;;  %v2940_v49 = vmul.f32 %v3388_v10, %v3388_v10  ;;  %v1510_v1 = vunpack.c.l.b16 %v1340_v2  ;;  %v2956_v59 = vsub.f32 %v1310_v13, %v1374_v44  ;;  %v2975_v13 = vpack.c.bf16 %v2936_v62, %v2936_v62  ;;  %v3391_v10 = vld [vmem:[#allocation25_spill] sm:$0xff] }
  0xb1   : > { %1245 = vmatpush.msra.mxu3 %v2527_v17  ;;  %1089 = vmatpush.msra.mxu0 %v2578_v16  ;;  %v2919_v16 = vmul.f32 %v2226_v27, %v2226_v27  ;;  %v3386_v27 = vand.u32 4294901760, %v2612_v29  ;;  %v2946_v17 = vsub.f32 %v1296_v8, %v1360_v12  ;;  %v2948_v28 = vsub.f32 %v1297_v9, %v1361_v22  ;;  %v3393_v12 = vld [vmem:[#allocation27_spill] sm:$0xff] }
  0xb2   : > { %1762 = vmatmul.msk.f32.vlgmr.msrb.gmra.mxu0 %vm2781_vm15, %v3383_v18  ;;  %1763 = vmatmul.msk.f32.vlgmr.msrb.gmra.mxu1 %vm2781_vm15, %v3383_v18  ;;  %v3389_v8 = vand.u32 4294901760, %v2640_v33  ;;  %v2961_v9 = vsub.f32 %v1311_v25, %v1375_v4  ;;  %v1372_v53 = vunpack.c.l.bf16 %v1340_v2  ;;  %v1498_v2 = vunpack.c.l.b16 %v2884_v24 }
  0xb3   : > { %1247 = vmatpush.msra.mxu3 %v2563_v36  ;;  %1092 = vmatpush.msra.mxu0 %v2602_v50  ;;  %v1341_v50 = vpack.c.bf16 %v1309_v45, %v1309_v45  ;;  %v1499_v44 = vunpack.c.l.b16 %v2889_v47 }
  0xb4   : > { %1194 = vmatpush.msra.mxu2 %v3386_v27  ;;  %1139 = vmatpush.msra.mxu1 %v2563_v36  ;;  %v1326_v27 = vpack.c.bf16 %v2919_v16, %v2919_v16  ;;  %v2969_v36 = vmul.f32 %v2614_v48, %v2614_v48  ;;  %v3390_v48 = vand.u32 4294901760, %v2665_v38  ;;  %v3003_v47 = vsub.f32 %v1308_v20, %v1372_v53  ;;  %v3395_v20 = vld [vmem:[#allocation28_spill] sm:$0xff] }
  0xb5   : > { %1249 = vmatpush.msra.mxu3 %v2586_v15  ;;  %1095 = vmatpush.msra.mxu0 %v2612_v29  ;;  %v1327_v29 = vpack.c.bf16 %v2923_v5, %v2923_v5  ;;  %v1511_v46 = vunpack.c.l.b16 %v1341_v50 }
  0xb6   : > { %1198 = vmatpush.msra.mxu2 %v3389_v8  ;;  %1141 = vmatpush.msra.mxu1 %v2586_v15  ;;  %v1338_v15 = vpack.c.bf16 %v2965_v58, %v2965_v58  ;;  %v1339_v22 = vpack.c.bf16 %v2969_v36, %v2969_v36  ;;  %v1358_v4 = vunpack.c.l.bf16 %v1326_v27  ;;  %v1496_v24 = vunpack.c.l.b16 %v1326_v27 }
  0xb7   : > { %1251 = vmatpush.msra.mxu3 %v2594_v21  ;;  %1098 = vmatpush.msra.mxu0 %v2640_v33  ;;  %v2979_v33 = vpack.c.bf16 %v2940_v49, %v2940_v49  ;;  %v2981_v25 = vpack.c.b16 %v1511_v46, %v1510_v1  ;;  %v1373_v1 = vunpack.c.l.bf16 %v1341_v50  ;;  %v1359_v46 = vunpack.c.l.bf16 %v1327_v29 }
  0xb8   : > { %1202 = vmatpush.msra.mxu2 %v3390_v48  ;;  %1143 = vmatpush.msra.mxu1 %v2594_v21  ;;  %v1508_v8 = vunpack.c.l.b16 %v1338_v15  ;;  %v1509_v48 = vunpack.c.l.b16 %v1339_v22  ;;  %v1417_v21 = vpack.c.bf16 %v2948_v28, %v2946_v17  ;;  %v1497_v43 = vunpack.c.l.b16 %v1327_v29  ;;  %v3396_v29 = vld [vmem:[#allocation26_spill] sm:$0xff] }
  0xb9   : > { %1253 = vmatpush.msra.mxu3 %v2623_v0  ;;  %1101 = vmatpush.msra.mxu0 %v2665_v38  ;;  %v3392_v38 = vand.u32 4294901760, %v2679_v37  ;;  %v1356_v50 = vunpack.c.l.bf16 %v2975_v13  ;;  %v3012_v30 = vsub.f32 %v1309_v45, %v1373_v1  ;;  %v1304_v27 = vmul.f32 %v3395_v20, %v3395_v20 }
  0xba   : > { %1145 = vmatpush.msra.mxu1 %v2623_v0  ;;  %v3010_v52 = vpack.c.b16 %v1509_v48, %v1508_v8  ;;  %v3016_v0 = vpack.c.b16 %v1499_v44, %v1498_v2  ;;  %v1370_v53 = vunpack.c.l.bf16 %v1338_v15  ;;  %v3397_v8 = vand.u32 4294901760, %v2724_v6 }
  0xbb   : > { %1255 = vmatpush.msra.mxu3 %v3391_v10  ;;  %1104 = vmatpush.msra.mxu0 %v2679_v37  ;;  %v3394_v37 = vand.u32 4294901760, %v2688_v54  ;;  %v3026_v45 = vsub.f32 %v2919_v16, %v1358_v4  ;;  %v3029_v1 = vsub.f32 %v2923_v5, %v1359_v46  ;;  %v1371_v2 = vunpack.c.l.bf16 %v1339_v22  ;;  %v3399_v22 = vld [vmem:[#allocation15_spill] sm:$0xff] }
  0xbc   : > { %1206 = vmatpush.msra.mxu2 %v3392_v38  ;;  %v1357_v38 = vunpack.c.l.bf16 %v2979_v33  ;;  %1147 = vmatpush.msra.mxu1 %v3391_v10  ;;  %v1423_v10 = vpack.c.bf16 %v3012_v30, %v3003_v47  ;;  %v3035_v15 = vpack.c.b16 %v1497_v43, %v1496_v24  ;;  %v1336_v44 = vpack.c.bf16 %v1304_v27, %v1304_v27  ;;  %v3400_v43 = vld [vmem:[#allocation14_spill] sm:$0xff]  ;;  %v3402_v24 = vld [vmem:[#allocation17_spill] sm:$0xff] }
  0xbd   : > { %1257 = vmatpush.msra.mxu3 %v3393_v12  ;;  %1107 = vmatpush.msra.mxu0 %v2688_v54  ;;  %v1305_v54 = vmul.f32 %v3396_v29, %v3396_v29  ;;  %v3041_v16 = vsub.f32 %v2936_v62, %v1356_v50  ;;  %v3048_v4 = vmul.f32 %v3399_v22, %v3399_v22  ;;  %v3403_v50 = vld [vmem:[#allocation16_spill] sm:$0xff] }
  0xbe   : > { %1210 = vmatpush.msra.mxu2 %v3394_v37  ;;  %1149 = vmatpush.msra.mxu1 %v3393_v12  ;;  %v3044_v5 = vsub.f32 %v2940_v49, %v1357_v38  ;;  %v3054_v12 = vmul.f32 %v3400_v43, %v3400_v43  ;;  %v3057_v62 = vsub.f32 %v2965_v58, %v1370_v53  ;;  %v3401_v49 = vand.u32 4294901760, %v2768_v11 }
  0xbf   : > { %1259 = vmatpush.msra.mxu3 %v2668_v14  ;;  %1110 = vmatpush.msra.mxu0 %v2724_v6  ;;  %v1337_v48 = vpack.c.bf16 %v1305_v54, %v1305_v54  ;;  %v3398_v6 = vand.u32 4294901760, %v2747_v61  ;;  %v3064_v37 = vmul.f32 %v3402_v24, %v3402_v24  ;;  %v3071_v38 = vsub.f32 %v2969_v36, %v1371_v2 }
  0xc0   : > { %1214 = vmatpush.msra.mxu2 %v3397_v8  ;;  %1151 = vmatpush.msra.mxu1 %v2668_v14  ;;  %v3068_v14 = vmul.f32 %v3403_v50, %v3403_v50  ;;  %v3083_v20 = vmul.f32 %v2694_v41, %v2694_v41  ;;  %v1368_v29 = vunpack.c.l.bf16 %v1336_v44  ;;  %v3404_v36 = vand.u32 4294901760, %v2774_v31 }
  0xc1   : > { %1261 = vmatpush.msra.mxu3 %v2705_v32  ;;  %1113 = vmatpush.msra.mxu0 %v2747_v61  ;;  %v1506_v61 = vunpack.c.l.b16 %v1336_v44  ;;  %v1507_v46 = vunpack.c.l.b16 %v1337_v48  ;;  %v1416_v53 = vpack.c.bf16 %v3029_v1, %v3026_v45  ;;  %v3100_v41 = vpack.c.bf16 %v3054_v12, %v3054_v12 }
  0xc2   : > { %1218 = vmatpush.msra.mxu2 %v3398_v6  ;;  %1153 = vmatpush.msra.mxu1 %v2705_v32  ;;  %v3092_v32 = vpack.c.bf16 %v3048_v4, %v3048_v4  ;;  %v1335_v8 = vpack.c.bf16 %v3083_v20, %v3083_v20  ;;  %v1369_v45 = vunpack.c.l.bf16 %v1337_v48  ;;  %v3405_v1 = vand.u32 4294901760, %v2816_v57 }
  0xc3   : > { %1263 = vmatpush.msra.mxu3 %v2731_v63  ;;  %1116 = vmatpush.msra.mxu0 %v2768_v11  ;;  %v3075_v58 = vpack.c.b16 %v1507_v46, %v1506_v61  ;;  %v3079_v11 = vmul.f32 %v2726_v26, %v2726_v26  ;;  %v1422_v26 = vpack.c.bf16 %v3071_v38, %v3057_v62  ;;  %v1495_v44 = vunpack.c.l.b16 %v2979_v33  ;;  %v3407_v33 = vld [vmem:[#allocation19_spill] sm:$0xff]  ;;  %v3408_v46 = vld [vmem:[#allocation18_spill] sm:$0xff] }
  0xc4   : > { %1222 = vmatpush.msra.mxu2 %v3401_v49  ;;  %1155 = vmatpush.msra.mxu1 %v2731_v63  ;;  %v1415_v2 = vpack.c.bf16 %v3044_v5, %v3041_v16  ;;  %v1494_v63 = vunpack.c.l.b16 %v2975_v13  ;;  %v3115_v6 = vpack.c.bf16 %v3064_v37, %v3064_v37  ;;  %v3121_v48 = vpack.c.bf16 %v3068_v14, %v3068_v14 }
  0xc5   : > { %1265 = vmatpush.msra.mxu3 %v2752_v42  ;;  %1119 = vmatpush.msra.mxu0 %v2774_v31  ;;  %v1334_v31 = vpack.c.bf16 %v3079_v11, %v3079_v11  ;;  %v1505_v22 = vunpack.c.l.b16 %v1335_v8  ;;  %v3123_v43 = vsub.f32 %v1304_v27, %v1368_v29  ;;  %v3406_v13 = vand.u32 4294901760, %v2844_v51  ;;  %v3409_v29 = vld [vmem:[#allocation29_spill] sm:$0xff] }
  0xc6   : > { %1226 = vmatpush.msra.mxu2 %v3404_v36  ;;  %1157 = vmatpush.msra.mxu1 %v2752_v42  ;;  %v3130_v61 = vmul.f32 %v3407_v33, %v3407_v33  ;;  %v3134_v42 = vmul.f32 %v3408_v46, %v3408_v46  ;;  %v3136_v49 = vsub.f32 %v1305_v54, %v1369_v45  ;;  %v1354_v27 = vunpack.c.l.bf16 %v3092_v32 }
  0xc7   : > { %1267 = vmatpush.msra.mxu3 %v2755_v7  ;;  %1122 = vmatpush.msra.mxu0 %v2816_v57  ;;  %v1504_v57 = vunpack.c.l.b16 %v1334_v31  ;;  %v1355_v24 = vunpack.c.l.bf16 %v3100_v41  ;;  %v1300_v50 = vmul.f32 %v2742_v19, %v2742_v19  ;;  %v1301_v36 = vmul.f32 %v3409_v29, %v3409_v29 }
  0xc8   : > { %1230 = vmatpush.msra.mxu2 %v3405_v1  ;;  %v1421_v54 = vpack.c.bf16 %v3136_v49, %v3123_v43  ;;  %v1366_v45 = vunpack.c.l.bf16 %v1334_v31  ;;  %v1367_v1 = vunpack.c.l.bf16 %v1335_v8  ;;  %1159 = vmatpush.msra.mxu1 %v2755_v7  ;;  %v1352_v19 = vunpack.c.l.bf16 %v3115_v6  ;;  %v3410_v31 = vld [vmem:[#allocation21_spill] sm:$0xff] }
  0xc9   : > { %1269 = vmatpush.msra.mxu3 %v2794_v3  ;;  %1125 = vmatpush.msra.mxu0 %v2844_v51  ;;  %v3142_v51 = vpack.c.b16 %v1505_v22, %v1504_v57  ;;  %v1521_v57 = vpack.c.b16 %v1495_v44, %v1494_v63  ;;  %v1353_v17 = vunpack.c.l.bf16 %v3121_v48  ;;  %v1332_v28 = vpack.c.bf16 %v1300_v50, %v1300_v50  ;;  %v3411_v63 = vld [vmem:[#allocation20_spill] sm:$0xff] }
  0xca   : > { %1234 = vmatpush.msra.mxu2 %v3406_v13  ;;  %1128 = vmatmul.f32.vlgmr.msra.gmra.mxu0 %v2837_v55  ;;  %v3170_v7 = vpack.c.bf16 %v3134_v42, %v3134_v42  ;;  %v1284_v8 = vmul.f32 %v3410_v31, %v3410_v31  ;;  %v1285_v44 = vmul.f32 %v3411_v63, %v3411_v63  ;;  %v1493_v46 = vunpack.c.l.b16 %v3100_v41 }
  0xcb   : > { %1271 = vmatpush.msra.mxu3 %v2834_v60  ;;  %1426 = vmatpush.bf16.msrb.mxu0 %v1417_v21  ;;  %v1333_v21 = vpack.c.bf16 %v1301_v36, %v1301_v36  ;;  %v1387_v22 = vsub.f32 %v3054_v12, %v1355_v24  ;;  %v3181_v33 = vsub.f32 %v3079_v11, %v1366_v45  ;;  %v3412_v12 = vand.u32 4294901760, %v2837_v55  ;;  %v3415_v24 = vld [vmem:[#allocation22_spill] sm:$0xff] }
  0xcc   : > { %1548 = vmatpush.bf16.msrb.mxu2 %v3016_v0  ;;  %1766 = vmatmul.msk.f32.vlgmr.msra.gmra.mxu3 %vm2803_vm1, %v3383_v18  ;;  %v1386_v0 = vsub.f32 %v3048_v4, %v1354_v27  ;;  %v1492_v4 = vunpack.c.l.b16 %v3092_v32  ;;  %v1316_v32 = vpack.c.bf16 %v1284_v8, %v1284_v8  ;;  %v1317_v41 = vpack.c.bf16 %v1285_v44, %v1285_v44 }
  0xcd   : > { %1561 = vmatpush.bf16.msrb.mxu3 %v2874_v56  ;;  %1765 = vmatmul.msk.f32.vlgmr.msra.gmra.mxu2 %vm2803_vm1, %v3383_v18  ;;  %v3166_v56 = vpack.c.bf16 %v3130_v61, %v3130_v61  ;;  %v1502_v18 = vunpack.c.l.b16 %v1332_v28  ;;  %v1503_v13 = vunpack.c.l.b16 %v1333_v21  ;;  %v1283_v55 = vmul.f32 %v3415_v24, %v3415_v24 }
  0xce   : > { %1161 = vmatpush.msra.mxu1 %v2794_v3  ;;  %v3184_v3 = vsub.f32 %v3083_v20, %v1367_v1  ;;  %v1351_v20 = vunpack.c.l.bf16 %v3170_v7  ;;  %v1414_v29 = vpack.c.bf16 %v1387_v22, %v1386_v0  ;;  %v1364_v45 = vunpack.c.l.bf16 %v1332_v28 }
  0xcf   : > { %1427 = vmatpush.bf16.msrb.mxu0 %v1416_v53  ;;  %v1384_v53 = vsub.f32 %v3064_v37, %v1352_v19  ;;  %v1350_v11 = vunpack.c.l.bf16 %v3166_v56  ;;  %v1525_v27 = vpack.c.b16 %v1503_v13, %v1502_v18  ;;  %v3414_v37 = vld [vmem:[#allocation23_spill] sm:$0xff]  ;;  %v1365_v1 = vunpack.c.l.bf16 %v1333_v21 }
  0xd0   : > { %1549 = vmatpush.bf16.msrb.mxu2 %v3035_v15  ;;  %1163 = vmatpush.msra.mxu1 %v2834_v60  ;;  %v1420_v15 = vpack.c.bf16 %v3184_v3, %v3181_v33  ;;  %v3413_v60 = vpack.c.bf16 %v2909_v23, %v2899_v39  ;;  %v1520_v39 = vpack.c.b16 %v1493_v46, %v1492_v4  ;;  %v1490_v19 = vunpack.c.l.b16 %v3115_v6 }
  0xd1   : > { %1562 = vmatpush.bf16.msrb.mxu3 %v2906_v35  ;;  %v1385_v35 = vsub.f32 %v3068_v14, %v1353_v17  ;;  %1167 = vmatmul.f32.vlgmr.msra.gmra.mxu1 %v3412_v12  ;;  %v1282_v14 = vmul.f32 %v3414_v37, %v3414_v37  ;;  %v1491_v17 = vunpack.c.l.b16 %v3121_v48  ;;  %v1382_v31 = vsub.f32 %v3130_v61, %v1350_v11  ;;  %v3417_v48 = vld [vmem:[#allocation30_spill] sm:$0xff] }
  0xd2   : > { %1439 = vmatpush.bf16.msrb.mxu1 %v3413_v60  ;;  %v1383_v63 = vsub.f32 %v3134_v42, %v1351_v20  ;;  %v1396_v18 = vsub.f32 %v1300_v50, %v1364_v45  ;;  %v1397_v13 = vsub.f32 %v1301_v36, %v1365_v1  ;;  %v3416_v16 = vpack.c.bf16 %v2961_v9, %v2956_v59 }
  0xd3   : > { %1428 = vmatpush.bf16.msrb.mxu0 %v1415_v2  ;;  %v1413_v23 = vpack.c.bf16 %v1385_v35, %v1384_v53  ;;  %v1349_v5 = vunpack.c.l.bf16 %v1317_v41  ;;  %v1314_v2 = vpack.c.bf16 %v1282_v14, %v1282_v14  ;;  %v1298_v6 = vmul.f32 %v2825_v40, %v2825_v40 }
  0xd4   : > { %1550 = vmatpush.bf16.msrb.mxu2 %v1521_v57  ;;  %v1315_v57 = vpack.c.bf16 %v1283_v55, %v1283_v55  ;;  %v1299_v61 = vmul.f32 %v3417_v48, %v3417_v48  ;;  %v1419_v42 = vpack.c.bf16 %v1397_v13, %v1396_v18  ;;  %v1519_v50 = vpack.c.b16 %v1491_v17, %v1490_v19  ;;  %v594_v18 = vld [vmem:[#allocation2] sm:$0xff] }
  0xd5   : > { %1563 = vmatpush.bf16.msrb.mxu3 %v2981_v25  ;;  %v1348_v25 = vunpack.c.l.bf16 %v1316_v32  ;;  %v1488_v36 = vunpack.c.l.b16 %v3166_v56  ;;  %v1489_v59 = vunpack.c.l.b16 %v3170_v7  ;;  %v1412_v9 = vpack.c.bf16 %v1383_v63, %v1382_v31 }
  0xd6   : > { %1440 = vmatpush.bf16.msrb.mxu1 %v3416_v16  ;;  %v1346_v40 = vunpack.c.l.bf16 %v1314_v2  ;;  %v1347_v21 = vunpack.c.l.bf16 %v1315_v57  ;;  %v1330_v0 = vpack.c.bf16 %v1298_v6, %v1298_v6  ;;  %v1331_v22 = vpack.c.bf16 %v1299_v61, %v1299_v61 }
  0xd7   : > { %1429 = vmatpush.bf16.msrb.mxu0 %v1414_v29  ;;  %v1380_v28 = vsub.f32 %v1284_v8, %v1348_v25  ;;  %v1518_v4 = vpack.c.b16 %v1489_v59, %v1488_v36  ;;  %v1486_v46 = vunpack.c.l.b16 %v1316_v32  ;;  %v1487_v56 = vunpack.c.l.b16 %v1317_v41 }
  0xd8   : > { %1551 = vmatpush.bf16.msrb.mxu2 %v1520_v39  ;;  %v1378_v47 = vsub.f32 %v1282_v14, %v1346_v40  ;;  %v1500_v7 = vunpack.c.l.b16 %v1330_v0  ;;  %v1485_v53 = vunpack.c.l.b16 %v1315_v57  ;;  %v1363_v35 = vunpack.c.l.bf16 %v1331_v22 }
  0xd9   : > { %1564 = vmatpush.bf16.msrb.mxu3 %v3010_v52  ;;  %v1381_v52 = vsub.f32 %v1285_v44, %v1349_v5  ;;  %v1517_v8 = vpack.c.b16 %v1487_v56, %v1486_v46  ;;  %v1484_v44 = vunpack.c.l.b16 %v1314_v2 }
  0xda   : > { %1441 = vmatpush.bf16.msrb.mxu1 %v1423_v10  ;;  %v1379_v10 = vsub.f32 %v1283_v55, %v1347_v21  ;;  %v1395_v49 = vsub.f32 %v1299_v61, %v1363_v35 }
  0xdb   : > { %1430 = vmatpush.bf16.msrb.mxu0 %v1413_v23  ;;  %v1411_v30 = vpack.c.bf16 %v1381_v52, %v1380_v28 }
  0xdc   : > { %1552 = vmatpush.bf16.msrb.mxu2 %v1519_v50  ;;  %v1410_v62 = vpack.c.bf16 %v1379_v10, %v1378_v47 }
  0xdd   : > { %1565 = vmatpush.bf16.msrb.mxu3 %v3075_v58  ;;  %v1501_v58 = vunpack.c.l.b16 %v1331_v22 }
  0xde   : > { %1442 = vmatpush.bf16.msrb.mxu1 %v1422_v26  ;;  %v1362_v26 = vunpack.c.l.bf16 %v1330_v0 }
  0xdf   : > { %1431 = vmatpush.bf16.msrb.mxu0 %v1412_v9  ;;  %v1524_v38 = vpack.c.b16 %v1501_v58, %v1500_v7 }
  0xe0   : > { %1553 = vmatpush.bf16.msrb.mxu2 %v1518_v4  ;;  %v1394_v43 = vsub.f32 %v1298_v6, %v1362_v26 }
  0xe1   : > { %1566 = vmatpush.bf16.msrb.mxu3 %v3142_v51  ;;  %v1516_v51 = vpack.c.b16 %v1485_v53, %v1484_v44 }
  0xe2   : > { %1443 = vmatpush.bf16.msrb.mxu1 %v1421_v54  ;;  %v2025_v54 = vmov 1.0|1.0   ;;  %v1418_v33 = vpack.c.bf16 %v1395_v49, %v1394_v43 }
  0xe3   : > { %1432 = vmatpush.bf16.msrb.mxu0 %v1411_v30 }
  0xe4   : > { %1554 = vmatpush.bf16.msrb.mxu2 %v1517_v8 }
  0xe5   : > { %1567 = vmatpush.bf16.msrb.mxu3 %v1525_v27 }
  0xe6   : > { %1444 = vmatpush.bf16.msrb.mxu1 %v1420_v15 }
  0xe7   : > { %1433 = vmatpush.bf16.msrb.mxu0 %v1410_v62 }
  0xe8   : > { %1555 = vmatpush.bf16.msrb.mxu2 %v1516_v51 }
  0xe9   : > { %1568 = vmatpush.bf16.msrb.mxu3 %v1524_v38 }
  0xea   : > { %1768 = vmatmul.msk.bf16.vlgmr.msrb.gmra.mxu0 %vm1767_vm2, %v2025_v54  ;;  %1445 = vmatpush.bf16.msrb.mxu1 %v1419_v42  ;;  %v1279_v42 = vld [vmem:[#allocation3] sm:$0xff] }
  0xeb   : > { %1772 = vmatmul.msk.bf16.vlgmr.msrb.gmra.mxu2 %vm1767_vm2, %v2025_v54 }
  0xec   : > { %1774 = vmatmul.msk.bf16.vlgmr.msrb.gmra.mxu3 %vm1769_vm3, %v2025_v54 }
  0xee   : > { %1446 = vmatpush.bf16.msrb.mxu1 %v1418_v33 }
  0xf1   : > { %1770 = vmatmul.msk.bf16.vlgmr.msrb.gmra.mxu1 %vm1769_vm3, %v2025_v54 }
 0x122   : > { %v734_v3 = vpop.f32.mrf.mxu1 }
 0x127   : > { %v633_v11 = vpop.f32.mrf.mxu0  ;;  %v788_v27 = vpop.f32.mrf.mxu2 }
 0x128   : > { %v735_v20 = vadd.f32 %v734_v3, %v633_v11 }
 0x12a   : > { %v789_v15 = vadd.f32 %v788_v27, %v735_v20  ;;  %v827_v60 = vpop.f32.mrf.mxu3 }
 0x12c   : > { %v828_v34 = vadd.f32 %v827_v60, %v789_v15 }
 0x12f   : > { %v896_v32 = vpop.f32.mrf.mxu0  ;;  %v933_v37 = vpop.f32.mrf.mxu1 }
 0x130   : > { %v897_v41 = vadd.f32 %v896_v32, %v828_v34 }
 0x131   : > { %v974_v24 = vpop.f32.mrf.mxu2 }
 0x132   : > { %v934_v14 = vadd.f32 %v933_v37, %v897_v41 }
 0x133   : > { %v1075_v29 = vpop.f32.mrf.mxu3 }
 0x134   : > { %v975_v55 = vadd.f32 %v974_v24, %v934_v14 }
 0x136   : > { %v1076_v1 = vadd.f32 %v1075_v29, %v975_v55 }
 0x147   : > { %v1129_v45 = vpop.f32.mrf.mxu0 }
 0x148   : > { %v1130_v39 = vadd.f32 %v1129_v45, %v1076_v1 }
 0x14e   : > { %v1168_v23 = vpop.f32.mrf.mxu1 }
 0x14f   : > { %v1169_v19 = vadd.f32 %v1168_v23, %v1130_v39  ;;  %v1274_v31 = vpop.f32.mrf.mxu3 }
 0x150   : > { %v1237_v17 = vpop.f32.mrf.mxu2 }
 0x151   : > { %v1238_v63 = vadd.f32 %v1237_v17, %v1169_v19 }
 0x153   : > { %v1275_v13 = vadd.f32 %v1274_v31, %v1238_v63 }
 0x155   : > { %v1277_v16 = vadd.f32 %v1275_v13, %v594_v18 }
 0x157   : > { %1278 = vst [vmem:[#allocation2] sm:$0xff] %v1277_v16 }
 0x167   : > { %v1435_v25 = vpop.f32.mrf.mxu0 }
 0x16e   : > { %v1557_v2 = vpop.f32.mrf.mxu2  ;;  %v1448_v6 = vpop.f32.mrf.mxu1 }
 0x16f   : > { %v1570_v5 = vpop.f32.mrf.mxu3  ;;  %v1437_v57 = vpop.f32.mrf.mxu0  ;;  %v1449_v48 = vadd.f32 %v1448_v6, %v1435_v25 }
 0x171   : > { %v1558_v61 = vadd.f32 %v1557_v2, %v1449_v48 }
 0x173   : > { %v1571_v50 = vadd.f32 %v1570_v5, %v1558_v61  ;;  %1579 = sbr.rel (%p1775_p5) target bundleno = 524 (0x20c), region = 56 }
 0x175   : > { %v1574_v59 = vadd.f32 %v1571_v50, %v1279_v42 }
 0x176   : > { %v1559_v9 = vpop.f32.mrf.mxu2  ;;  %v1450_v28 = vpop.f32.mrf.mxu1 }
 0x177   : > { %v1572_v36 = vpop.f32.mrf.mxu3  ;;  %1575 = vst [vmem:[#allocation3] sm:$0xff] %v1574_v59 }
 0x178   : > { %v1581_v52 = vld [vmem:[#allocation6] sm:$0xff]  ;;  %v2026_v40 = vmov 0   ;;  %v1580_v21 = vld [vmem:[#allocation2] sm:$0xff]  ;;  %v1859_v62 = vld [vmem:[#allocation8] ss:$0 sm:$0xff] }
 0x179   : > { %1858 = vset.pattern.permute.xlu0 %v2026_v40 }
 0x17a   : > { %1584 = vperm.xlu0 %1858, %v1581_v52  }
 0x17e   : > { %v1588_v0 = vld [vmem:[#allocation3] sm:$0xff] }
 0x1ec   : > { %v1585_v22 = vpop.permute.xlu0 %1584 }
 0x1ed   : > { %v1587_v4 = vmul.f32 %v1585_v22, %v1580_v21  ;;  %v1589_v46 = vmul.f32 %v1588_v0, %v1585_v22 }
 0x1ef   : > { %v1590_v56 = vmul.f32 %v1587_v4, %v1587_v4  ;;  %1593 = vst [vmem:[%s3272_s4] sm:$0xff] %v1587_v4 }
 0x1f1   : > { %v1591_v30 = vsub.f32 %v1589_v46, %v1590_v56 }
 0x1f3   : > { %v1592_v47 = vmax.f32 %v1591_v30, 0.0 }
 0x1f5   : > { %v1595_v10 = vadd.f32 1e-06, %v1592_v47 }
 0x1f7   : > { %1860 = vrsqrt.f32 %v1595_v10  ;;  %vm1602_vm5 = vweird.f32 %v1595_v10 }
 0x1fd   : > { %v1861_v7 = vpop.eup %1860 }
 0x1fe   : > { %v1597_v58 = vmul.f32 %v1861_v7, %v1595_v10  ;;  %vm1603_vm4 = vweird.f32 %v1861_v7 }
 0x1ff   : > { %vm1604_vm6 = vmor %vm1602_vm5, %vm1603_vm4 }
 0x200   : > { %v1598_v8 = vmul.f32 %v1861_v7, %v1597_v58 }
 0x202   : > { %v1599_v44 = vmul.f32 0.5, %v1598_v8 }
 0x204   : > { %v1600_v53 = vsub.f32 1.5, %v1599_v44 }
 0x206   : > { %v1601_v38 = vmul.f32 %v1861_v7, %v1600_v53 }
 0x208   : > { %v1605_v26 = vsel %vm1604_vm6, %v1861_v7, %v1601_v38 }
 0x209   : > { %v1609_v35 = vmul.f32 %v1859_v62, %v1605_v26 }
 0x20b   : > { %1610 = vst [vmem:[%s3273_s5] sm:$0xff] %v1609_v35 }
 0x20c PF: > { %s20_s23 = sadd.s32 1, %s2015_s23   ;;  %s3419_s18 = smov %s1999_s19 }
 0x20d   : > { %p17_p8 = scmp.ge.s32.totalorder %s20_s23, 5   ;;  %s3420_s19 = smov %s2003_s20 }
 0x20e   : > { %s3421_s20 = smov %s2113_s6  ;;  %s3422_s21 = smov %s2011_s22 }
 0x20f   : > { %s3423_s22 = smov %s3425_s25  ;;  %19 = sbr.rel (!%p17_p8) target bundleno = 5 (0x5), region = 108 }
 0x214   :  { %1644 = vsyncpa [#allocation5], 1 }
 0x215   :  { %1646 = vsyncpa [#allocation5 + $0x1], 1 }
 0x216   :  { %1647 = vsyncpa [#allocation7], 1 }

// kernel: _graph_norm_impl.3
= control target key start
LH: loop header
LB: loop body
LE: loop exit
PB: predicated region body
PF: predicated region fallthrough
CT: control target
= control target key end

     0   :  { %10 = vsyncpa [#allocation3], 0  ;;  %s3491_s0 = inlined_call_operand.hbm [shape: s32[600,1], index: 0, kind: input, shape index: {}]   ;;  %s3492_s1 = inlined_call_operand.hbm [shape: f32[600,128], index: 1, kind: input, shape index: {}]   ;;  %s3493_s2 = inlined_call_operand.vmem [shape: f32[8,128], index: 2, kind: input, shape index: {}]   ;;  %s3494_s3 = inlined_call_operand.vmem [shape: f32[8,128], index: 3, kind: input, shape index: {}]   ;;  %s3495_s4 = inlined_call_operand.vmem [shape: f32[1,128], index: 4, kind: input, shape index: {}]   ;;  %s3496_s5 = inlined_call_operand.hbm [shape: f32[600,128], index: 5, kind: output, shape index: {}]  }
   0x1   :  { %12 = vsyncpa [#allocation3 + $0x1], 0 }
   0x2   :  { %13 = vsyncpa [#allocation6], 0 }
   0x3   :  { %15 = vsyncpa [#allocation6 + $0x1], 0 }
   0x4   :  { %16 = vsyncpa [#allocation4], 0 }
   0x5   :  { %18 = vsyncpa [#allocation4 + $0x1], 0  ;;  %s1983_s18 = smov 0   ;;  %s1985_s19 = smov 0  }
   0x6   :  { %s1987_s20 = smov 0   ;;  %s1989_s21 = smov 0  }
   0x7 LB: > { %s2004_s22 = sadd.s32 4294967295, %s1941_s21   ;;  %s1665_s23 = sadd.s32 4294967294, %s1941_s21   ;;  %s1941_s21 = sphi %s1989_s21, %s3575_s21   ;;  %s1937_s20 = sphi %s1987_s20, %s3574_s20   ;;  %s1933_s19 = sphi %s1985_s19, %s3573_s19   ;;  %s1929_s18 = sphi %s1983_s18, %s3572_s18  }
   0x8   : > { %s2008_s24 = sadd.s32 1, %s1941_s21   ;;  %s31_s25 = sadd.s32 1, %s1937_s20 }
   0x9   : > { %s28_s26 = ssub.s32 %s1941_s21, %s2008_s24  ;;  %p38_p0 = scmp.ne.s32.totalorder %s1937_s20, %s1933_s19 }
   0xa   : > { %p29_p1 = scmp.eq.s32.totalorder %s28_s26, 0  ;;  %p39_p2 = scmp.eq.s32.totalorder %s1941_s21, 0 }
   0xb   : > { %p44_p3 = scmp.ne.s32.totalorder %s1933_s19, %s1929_s18  ;;  %p45_p4 = scmp.eq.s32.totalorder %s2004_s22, 0 }
   0xc   : > { %s2020_s27 = scalar_select %p29_p1, %s1937_s20, %s31_s25  }
   0xd   : > { %p2022_p5 = por %p39_p2, %p38_p0  ;;  %p2026_p6 = por %p45_p4, %p44_p3 }
   0xe   : > { %3502 = sst [smem:[#allocation11_spill]] %s2020_s27  ;;  %p157_p7 = scmp.eq.s32.totalorder %s2004_s22, 2 }
   0xf   : > { %p163_p8 = scmp.eq.s32.totalorder %s1665_s23, 2  ;;  %p1667_p11 = scmp.ge.s32.totalorder %s1941_s21, 3 }
  0x10   : > { %p2031_p9 = por %p157_p7, %p38_p0 }
  0x11   : > { %p2035_p10 = por %p163_p8, %p44_p3  ;;  %188 = sbr.rel (%p1667_p11) target bundleno = 95 (0x5f), region = 28 }
  0x13   : > { %s3506_s6 = scalar_select %p2035_p10, 1, 0 }
  0x16   : > { %191 = sbr.rel (!%p2022_p5) target bundleno = 59 (0x3b), region = 32  ;;  %s192_s7 = sand.u32 (%p2022_p5), 1, %s1937_s20  }
  0x17   : > { %s1669_s8 = sshll.u32 (%p2022_p5), %s1941_s21, 5  ;;  %s1668_s9 = sshll.u32 (%p2022_p5), %s192_s7, 8 }
  0x18   : > { %s198_s10 = ssub.s32 (%p2022_p5), 75, %s1669_s8  ;;  %s2047_s14 = scalar_lea.sflag (%p2022_p5), [#allocation3], %s192_s7 }
  0x19   : > { %p199_p12 = scmp.lt.s32.totalorder (%p2022_p5), %s198_s10, 32  ;;  %s196_s15 = scalar_lea.vmem (%p2022_p5), [#allocation2], %s1668_s9 }
  0x1b   : > { %s3577_s10 = smov (!%p199_p12, %s198_s10), 32 }
  0x1c   : > { %s1670_s11 = sshll.u32 %s3577_s10, 3 }
  0x1d   : > { %s202_s12 = ssub.s32 256, %s1670_s11 }
  0x1e   : > { %s203_s13 = sshll.u32 %s202_s12, 4 }
  0x1f   : > { %204 = vsyncadd %s2047_s14, %s203_s13  ;;  %p2050_p13 = scmp.ne.s32.totalorder %s1670_s11, 0  ;;  %s1695_s17 = sshll.u32 %s1941_s21, 8 }
  0x20   : > { %s207_s26 = scalar_lea.hbm %s3491_s0, %s1695_s17  ;;  %s2058_s8 = sshll.u32 %s196_s15, 4  ;;  %s212_s8 = int_to_ptr.vmem [resolvable:$true] %s2058_s8 }
  0x21   : > { %s209_s7 = sshll.u32 %s207_s26, 4  ;;  %s3497_s9 = sshll.u32 %s3577_s10, 7  ;;  %s2061_s7 = int_to_ptr.hbm [resolvable:$true] %s209_s7 }
  0x22   : > { %s1782_s12 = sshra.s32 %s2061_s7, 4  ;;  %s1784_s11 = sshrl.u32 %s3497_s9, 4  ;;  %s1783_s12 = int_to_ptr.hbm [resolvable:$true] %s1782_s12 }
  0x23   : > { %s1789_s13 = scalar_lea.hbm %s1783_s12, %s1784_s11  ;;  %s1793_s15 = scalar_lea.hbm %s3491_s0, 600 }
  0x24   : > { %p1790_p0 = scmp.ne.s32.totalorder %s1783_s12, %s1789_s13  ;;  %p1794_p3 = scmp.lt.s32.totalorder %s1783_s12, %s3491_s0 }
  0x25   : > { %p1795_p4 = scmp.lt.s32.totalorder %s1793_s15, %s1789_s13 }
  0x26   : > { %p1791_p1 = pnand %p1790_p0, %p2050_p13 }
  0x27   : > { %p1796_p7 = por %p1795_p4, %p1794_p3 }
  0x28   : > { %p1792_p2 = pneg %p1791_p1 }
  0x2a   : > { %p1797_p8 = pnand %p1796_p7, %p1792_p2 }
  0x2c   : > { %1800 = shalt.err (!%p1797_p8)
}
  0x2d   : > { %s1801_s9 = sshra.s32 %s212_s8, 4  ;;  %s1943_s23 = smov [#allocation2]   ;;  %s1802_s9 = int_to_ptr.vmem [resolvable:$true] %s1801_s9 }
  0x2e   : > { %s1808_s27 = scalar_lea.vmem %s1802_s9, %s1784_s11  ;;  %s1812_s17 = scalar_lea.vmem %s1943_s23, 512 }
  0x2f   : > { %p1809_p11 = scmp.ne.s32.totalorder %s1802_s9, %s1808_s27  ;;  %p1814_p1 = scmp.lt.s32.totalorder %s1812_s17, %s1808_s27 }
  0x31   : > { %p1810_p12 = pnand %p1809_p11, %p2050_p13 }
  0x33   : > { %p1811_p0 = pneg %p1810_p12 }
  0x35   : > { %p1816_p10 = pnand %p1814_p1, %p1811_p0 }
  0x37   : > { %1819 = shalt.err (!%p1816_p10)
}
  0x38   : > { %s1944_s12 = smov 128   ;;  %s1945_s13 = smov 8  }
  0x39   : > { %s3508_s15 = sshll.u32 %s3577_s10, 7 }
  0x3a   : > { %217 = dma.hbm_to_vmem [thread:$0]  (%p2050_p13), %s2061_s7, %s3508_s15, %s212_s8, %s2047_s14, %s1944_s12, %s1944_s12, %s1945_s13  }
  0x3b PF: > { %220 = sbr.rel (!%p2022_p5) target bundleno = 95 (0x5f), region = 36  ;;  %s221_s27 = sand.u32 (%p2022_p5), 1, %s1937_s20  }
  0x3c   : > { %s1676_s9 = sshll.u32 (%p2022_p5), %s1941_s21, 5  ;;  %s1675_s11 = sshll.u32 (%p2022_p5), %s221_s27, 8 }
  0x3d   : > { %s227_s25 = ssub.s32 (%p2022_p5), 75, %s1676_s9  ;;  %s2094_s17 = scalar_lea.sflag (%p2022_p5), [#allocation6], %s221_s27 }
  0x3e   : > { %p228_p10 = scmp.lt.s32.totalorder (%p2022_p5), %s227_s25, 32  ;;  %s225_s10 = scalar_lea.vmem (%p2022_p5), [#allocation5], %s1675_s11 }
  0x40   : > { %s3579_s25 = smov (!%p228_p10, %s227_s25), 32 }
  0x41   : > { %s1677_s26 = sshll.u32 %s3579_s25, 3 }
  0x42   : > { %s231_s23 = ssub.s32 256, %s1677_s26 }
  0x43   : > { %s232_s16 = sshll.u32 %s231_s23, 4 }
  0x44   : > { %233 = vsyncadd %s2094_s17, %s232_s16  ;;  %p2097_p5 = scmp.ne.s32.totalorder %s1677_s26, 0  ;;  %s1696_s14 = sshll.u32 %s1941_s21, 8 }
  0x45   : > { %s236_s12 = scalar_lea.hbm %s3492_s1, %s1696_s14  ;;  %s2105_s13 = sshll.u32 %s225_s10, 4  ;;  %s241_s13 = int_to_ptr.vmem [resolvable:$true] %s2105_s13 }
  0x46   : > { %s238_s15 = sshll.u32 %s236_s12, 4  ;;  %s1681_s27 = sshll.u32 %s3579_s25, 7  ;;  %s2108_s15 = int_to_ptr.hbm [resolvable:$true] %s238_s15 }
  0x47   : > { %s1821_s9 = sshra.s32 %s2108_s15, 4  ;;  %s1823_s11 = sshrl.u32 %s1681_s27, 4  ;;  %s1822_s9 = int_to_ptr.hbm [resolvable:$true] %s1821_s9 }
  0x48   : > { %s1828_s26 = scalar_lea.hbm %s1822_s9, %s1823_s11  ;;  %s1832_s10 = scalar_lea.hbm %s3492_s1, 600 }
  0x49   : > { %p1829_p13 = scmp.ne.s32.totalorder %s1822_s9, %s1828_s26  ;;  %p1833_p4 = scmp.lt.s32.totalorder %s1822_s9, %s3492_s1 }
  0x4a   : > { %p1834_p7 = scmp.lt.s32.totalorder %s1832_s10, %s1828_s26 }
  0x4b   : > { %p1830_p2 = pnand %p1829_p13, %p2097_p5 }
  0x4c   : > { %p1835_p8 = por %p1834_p7, %p1833_p4 }
  0x4d   : > { %p1831_p3 = pneg %p1830_p2 }
  0x4f   : > { %p1836_p11 = pnand %p1835_p8, %p1831_p3 }
  0x51   : > { %1839 = shalt.err (!%p1836_p11)
}
  0x52   : > { %s1840_s7 = sshra.s32 %s241_s13, 4  ;;  %s1946_s23 = smov [#allocation5]   ;;  %s1841_s7 = int_to_ptr.vmem [resolvable:$true] %s1840_s7 }
  0x53   : > { %s1847_s12 = scalar_lea.vmem %s1841_s7, %s1823_s11  ;;  %s1851_s16 = scalar_lea.vmem %s1946_s23, 512 }
  0x54   : > { %p1848_p12 = scmp.ne.s32.totalorder %s1841_s7, %s1847_s12  ;;  %p1853_p10 = scmp.lt.s32.totalorder %s1851_s16, %s1847_s12 }
  0x56   : > { %p1849_p0 = pnand %p1848_p12, %p2097_p5 }
  0x58   : > { %p1850_p1 = pneg %p1849_p0 }
  0x5a   : > { %p1855_p13 = pnand %p1853_p10, %p1850_p1 }
  0x5c   : > { %1858 = shalt.err (!%p1855_p13)
}
  0x5d   : > { %s1947_s9 = smov 128   ;;  %s1948_s26 = smov 8  }
  0x5e   : > { %246 = dma.hbm_to_vmem [thread:$0]  (%p2097_p5), %s2108_s15, %s1681_s27, %s241_s13, %s2094_s17, %s1947_s9, %s1947_s9, %s1948_s26  }
  0x5f PF: > { %p1682_p2 = scmp.ge.s32.totalorder %s1941_s21, 1  ;;  %p248_p3 = scmp.lt.s32.totalorder %s1941_s21, 4 }
  0x61   : > { %p249_p4 = pnand %p1682_p2, %p248_p3 }
  0x63   : > { %252 = sbr.rel (%p249_p4) target bundleno = 605 (0x25d), region = 40 }
  0x68   : > { %s2137_s11 = sand.u32 1, %s1933_s19  }
  0x69   : > { %s2140_s10 = sshll.u32 %s2137_s11, 8  ;;  %s255_s28 = scalar_lea.sflag [#allocation3], %s2137_s11 }
  0x6a   : > { %s2144_s25 = scalar_lea.vmem [#allocation2], %s2140_s10 }
  0x6b   : > { %1916 = dma.done.wait (%p2026_p6), %s255_s28, 4096  }
  0x6c   : > { %1918 = vsyncadd (%p2026_p6), %s255_s28, 4294963200  ;;  %s265_s17 = scalar_lea.sflag [#allocation6], %s2137_s11  ;;  %s2152_s13 = scalar_lea.vmem [#allocation5], %s2140_s10 }
  0x6d   : > { %1920 = dma.done.wait (%p2026_p6), %s265_s17, 4096  }
  0x6e   : > { %1922 = vsyncadd (%p2026_p6), %s265_s17, 4294963200  ;;  %v3498_v0 = vmov 0   ;;  %v2162_v1 = vld [vmem:[%s2144_s25 + $0x20] sm:$0xff]  ;;  %v2165_v2 = vld [vmem:[%s2144_s25 + $0x10] sm:$0xff]  ;;  %s3142_s26 = scalar_lea.vmem [#allocation7], %s2140_s10  ;;  %s1547_s10 = scalar_lea.sflag [#allocation4], %s2137_s11 }
  0x6f   : > { %1747 = vset.pattern.permute.xlu2 %v3498_v0  ;;  %1746 = vset.pattern.permute.xlu1 %v3498_v0  ;;  %v2168_v3 = vld [vmem:[%s2144_s25] sm:$0xff]  ;;  %vm353_vm0 = vcmp.eq.s32.totalorder %v2162_v1, 0  ;;  %vm351_vm1 = vcmp.eq.s32.totalorder %v2165_v2, 0  ;;  %v2177_v7 = vld [vmem:[%s2144_s25 + $0x28] sm:$0xff]  ;;  %v2180_v8 = vld [vmem:[%s2144_s25 + $0x18] sm:$0xff]  ;;  %s1687_s28 = sshll.u32 (%p2031_p9), %s2004_s22, 5 }
  0x70   : > { %1745 = vset.pattern.permute.xlu0 %v3498_v0  ;;  %vm349_vm2 = vcmp.eq.s32.totalorder %v2168_v3, 0  ;;  %v385_v4 = vsel %vm353_vm0, 1, %v3498_v0  ;;  %v383_v5 = vsel %vm351_vm1, 1, %v3498_v0  ;;  %v2183_v9 = vld [vmem:[%s2144_s25 + $0x8] sm:$0xff]  ;;  %vm354_vm3 = vcmp.eq.s32.totalorder %v2177_v7, 0  ;;  %v2192_v13 = vld [vmem:[%s2144_s25 + $0x40] sm:$0xff] }
  0x71   : > { %v381_v6 = vsel %vm349_vm2, 1, %v3498_v0  ;;  %426 = vperm.xlu2 %1747, %v385_v4   ;;  %420 = vperm.xlu1 %1746, %v383_v5   ;;  %vm352_vm4 = vcmp.eq.s32.totalorder %v2180_v8, 0  ;;  %vm350_vm5 = vcmp.eq.s32.totalorder %v2183_v9, 0  ;;  %v386_v10 = vsel %vm354_vm3, 1, %v3498_v0  ;;  %v2195_v14 = vld [vmem:[%s2144_s25 + $0x38] sm:$0xff]  ;;  %v2198_v15 = vld [vmem:[%s2144_s25 + $0x30] sm:$0xff] }
  0x72   : > { %414 = vperm.xlu0 %1745, %v381_v6   ;;  %v384_v11 = vsel %vm352_vm4, 1, %v3498_v0  ;;  %v382_v12 = vsel %vm350_vm5, 1, %v3498_v0  ;;  %vm357_vm6 = vcmp.eq.s32.totalorder %v2192_v13, 0  ;;  %vm356_vm7 = vcmp.eq.s32.totalorder %v2195_v14, 0  ;;  %v2207_v19 = vld [vmem:[%s2144_s25 + $0x58] sm:$0xff]  ;;  %v2210_v20 = vld [vmem:[%s2144_s25 + $0x50] sm:$0xff] }
  0x73   : > { %vm355_vm8 = vcmp.eq.s32.totalorder %v2198_v15, 0  ;;  %v389_v16 = vsel %vm357_vm6, 1, %v3498_v0  ;;  %v388_v17 = vsel %vm356_vm7, 1, %v3498_v0  ;;  %v2213_v21 = vld [vmem:[%s2144_s25 + $0x48] sm:$0xff]  ;;  %vm360_vm9 = vcmp.eq.s32.totalorder %v2207_v19, 0  ;;  %v2222_v25 = vld [vmem:[%s2144_s25 + $0x70] sm:$0xff] }
  0x74   : > { %v387_v18 = vsel %vm355_vm8, 1, %v3498_v0  ;;  %vm359_vm10 = vcmp.eq.s32.totalorder %v2210_v20, 0  ;;  %vm358_vm11 = vcmp.eq.s32.totalorder %v2213_v21, 0  ;;  %v392_v22 = vsel %vm360_vm9, 1, %v3498_v0  ;;  %v2225_v26 = vld [vmem:[%s2144_s25 + $0x68] sm:$0xff]  ;;  %v2228_v27 = vld [vmem:[%s2144_s25 + $0x60] sm:$0xff] }
  0x75   : > { %v391_v23 = vsel %vm359_vm10, 1, %v3498_v0  ;;  %v390_v24 = vsel %vm358_vm11, 1, %v3498_v0  ;;  %vm363_vm12 = vcmp.eq.s32.totalorder %v2222_v25, 0  ;;  %vm362_vm13 = vcmp.eq.s32.totalorder %v2225_v26, 0  ;;  %v2237_v31 = vld [vmem:[%s2144_s25 + $0x88] sm:$0xff]  ;;  %v2240_v32 = vld [vmem:[%s2144_s25 + $0x80] sm:$0xff] }
  0x76   : > { %vm361_vm14 = vcmp.eq.s32.totalorder %v2228_v27, 0  ;;  %v395_v28 = vsel %vm363_vm12, 1, %v3498_v0  ;;  %v394_v29 = vsel %vm362_vm13, 1, %v3498_v0  ;;  %v2243_v33 = vld [vmem:[%s2144_s25 + $0x78] sm:$0xff]  ;;  %vm366_vm15 = vcmp.eq.s32.totalorder %v2237_v31, 0  ;;  %v2252_v37 = vld [vmem:[%s2144_s25 + $0xa0] sm:$0xff] }
  0x77   : > { %v393_v30 = vsel %vm361_vm14, 1, %v3498_v0  ;;  %vm365_vm0 = vcmp.eq.s32.totalorder %v2240_v32, 0  ;;  %vm364_vm1 = vcmp.eq.s32.totalorder %v2243_v33, 0  ;;  %v398_v34 = vsel %vm366_vm15, 1, %v3498_v0  ;;  %v2255_v38 = vld [vmem:[%s2144_s25 + $0x98] sm:$0xff]  ;;  %v2258_v39 = vld [vmem:[%s2144_s25 + $0x90] sm:$0xff] }
  0x78   : > { %v397_v35 = vsel %vm365_vm0, 1, %v3498_v0  ;;  %v396_v36 = vsel %vm364_vm1, 1, %v3498_v0  ;;  %vm369_vm2 = vcmp.eq.s32.totalorder %v2252_v37, 0  ;;  %vm368_vm3 = vcmp.eq.s32.totalorder %v2255_v38, 0  ;;  %v2267_v43 = vld [vmem:[%s2144_s25 + $0xb8] sm:$0xff]  ;;  %v2270_v44 = vld [vmem:[%s2144_s25 + $0xb0] sm:$0xff] }
  0x79   : > { %429 = vperm.xlu2 %1747, %v386_v10   ;;  %423 = vperm.xlu1 %1746, %v384_v11   ;;  %vm367_vm4 = vcmp.eq.s32.totalorder %v2258_v39, 0  ;;  %v401_v40 = vsel %vm369_vm2, 1, %v3498_v0  ;;  %v400_v41 = vsel %vm368_vm3, 1, %v3498_v0  ;;  %v2273_v45 = vld [vmem:[%s2144_s25 + $0xa8] sm:$0xff]  ;;  %vm372_vm5 = vcmp.eq.s32.totalorder %v2267_v43, 0  ;;  %v2282_v49 = vld [vmem:[%s2144_s25 + $0xd0] sm:$0xff] }
  0x7a   : > { %417 = vperm.xlu0 %1745, %v382_v12   ;;  %v399_v42 = vsel %vm367_vm4, 1, %v3498_v0  ;;  %vm371_vm6 = vcmp.eq.s32.totalorder %v2270_v44, 0  ;;  %vm370_vm7 = vcmp.eq.s32.totalorder %v2273_v45, 0  ;;  %v404_v46 = vsel %vm372_vm5, 1, %v3498_v0  ;;  %v2285_v50 = vld [vmem:[%s2144_s25 + $0xc8] sm:$0xff]  ;;  %v2288_v51 = vld [vmem:[%s2144_s25 + $0xc0] sm:$0xff] }
  0x7b   : > { %v403_v47 = vsel %vm371_vm6, 1, %v3498_v0  ;;  %v402_v48 = vsel %vm370_vm7, 1, %v3498_v0  ;;  %vm375_vm8 = vcmp.eq.s32.totalorder %v2282_v49, 0  ;;  %vm374_vm9 = vcmp.eq.s32.totalorder %v2285_v50, 0  ;;  %v2297_v55 = vld [vmem:[%s2144_s25 + $0xe8] sm:$0xff]  ;;  %v2300_v56 = vld [vmem:[%s2144_s25 + $0xe0] sm:$0xff] }
  0x7c   : > { %vm373_vm10 = vcmp.eq.s32.totalorder %v2288_v51, 0  ;;  %v407_v52 = vsel %vm375_vm8, 1, %v3498_v0  ;;  %v406_v53 = vsel %vm374_vm9, 1, %v3498_v0  ;;  %v2303_v57 = vld [vmem:[%s2144_s25 + $0xd8] sm:$0xff]  ;;  %vm378_vm11 = vcmp.eq.s32.totalorder %v2297_v55, 0  ;;  %v2315_v62 = vld [vmem:[%s2144_s25 + $0xf0] sm:$0xff] }
  0x7d   : > { %v405_v54 = vsel %vm373_vm10, 1, %v3498_v0  ;;  %vm377_vm12 = vcmp.eq.s32.totalorder %v2300_v56, 0  ;;  %vm376_vm13 = vcmp.eq.s32.totalorder %v2303_v57, 0  ;;  %v410_v58 = vsel %vm378_vm11, 1, %v3498_v0  ;;  %v2312_v61 = vld [vmem:[%s2144_s25 + $0xf8] sm:$0xff] }
  0x7e   : > { %v409_v59 = vsel %vm377_vm12, 1, %v3498_v0  ;;  %v408_v60 = vsel %vm376_vm13, 1, %v3498_v0  ;;  %vm380_vm14 = vcmp.eq.s32.totalorder %v2312_v61, 0  ;;  %vm574_vm15 = vcmp.eq.s32.totalorder %v2168_v3, 1 }
  0x7f   : > { %vm379_vm0 = vcmp.eq.s32.totalorder %v2315_v62, 0  ;;  %v412_v63 = vsel %vm380_vm14, 1, %v3498_v0  ;;  %v606_v4 = vsel %vm574_vm15, 1, %v3498_v0  ;;  %vm576_vm1 = vcmp.eq.s32.totalorder %v2165_v2, 1 }
  0x80   : > { %v411_v5 = vsel %vm379_vm0, 1, %v3498_v0  ;;  %vm577_vm2 = vcmp.eq.s32.totalorder %v2180_v8, 1  ;;  %vm575_vm3 = vcmp.eq.s32.totalorder %v2183_v9, 1  ;;  %v608_v6 = vsel %vm576_vm1, 1, %v3498_v0 }
  0x81   : > { %438 = vperm.xlu2 %1747, %v389_v16   ;;  %435 = vperm.xlu1 %1746, %v388_v17   ;;  %v609_v10 = vsel %vm577_vm2, 1, %v3498_v0  ;;  %v607_v11 = vsel %vm575_vm3, 1, %v3498_v0  ;;  %vm579_vm4 = vcmp.eq.s32.totalorder %v2177_v7, 1  ;;  %vm580_vm5 = vcmp.eq.s32.totalorder %v2198_v15, 1 }
  0x82   : > { %432 = vperm.xlu0 %1745, %v387_v18   ;;  %vm578_vm6 = vcmp.eq.s32.totalorder %v2162_v1, 1  ;;  %v611_v16 = vsel %vm579_vm4, 1, %v3498_v0  ;;  %v612_v17 = vsel %vm580_vm5, 1, %v3498_v0  ;;  %vm582_vm7 = vcmp.eq.s32.totalorder %v2192_v13, 1 }
  0x83   : > { %v610_v18 = vsel %vm578_vm6, 1, %v3498_v0  ;;  %vm583_vm8 = vcmp.eq.s32.totalorder %v2213_v21, 1  ;;  %vm581_vm9 = vcmp.eq.s32.totalorder %v2195_v14, 1  ;;  %vm585_vm10 = vcmp.eq.s32.totalorder %v2207_v19, 1 }
  0x84   : > { %vm586_vm11 = vcmp.eq.s32.totalorder %v2228_v27, 1  ;;  %vm584_vm12 = vcmp.eq.s32.totalorder %v2210_v20, 1  ;;  %vm588_vm13 = vcmp.eq.s32.totalorder %v2222_v25, 1  ;;  %vm589_vm14 = vcmp.eq.s32.totalorder %v2243_v33, 1 }
  0x85   : > { %vm587_vm15 = vcmp.eq.s32.totalorder %v2225_v26, 1  ;;  %vm591_vm0 = vcmp.eq.s32.totalorder %v2237_v31, 1  ;;  %vm592_vm1 = vcmp.eq.s32.totalorder %v2258_v39, 1  ;;  %vm590_vm2 = vcmp.eq.s32.totalorder %v2240_v32, 1 }
  0x86   : > { %vm594_vm3 = vcmp.eq.s32.totalorder %v2252_v37, 1  ;;  %vm595_vm4 = vcmp.eq.s32.totalorder %v2273_v45, 1  ;;  %vm593_vm5 = vcmp.eq.s32.totalorder %v2255_v38, 1  ;;  %vm597_vm6 = vcmp.eq.s32.totalorder %v2267_v43, 1 }
  0x89   : > { %447 = vperm.xlu2 %1747, %v392_v22   ;;  %444 = vperm.xlu1 %1746, %v391_v23   ;;  %v614_v23 = vsel %vm582_vm7, 1, %v3498_v0  ;;  %vm598_vm7 = vcmp.eq.s32.totalorder %v2288_v51, 1 }
  0x8a   : > { %441 = vperm.xlu0 %1745, %v390_v24   ;;  %v615_v24 = vsel %vm583_vm8, 1, %v3498_v0  ;;  %vm596_vm8 = vcmp.eq.s32.totalorder %v2270_v44, 1 }
  0x91   : > { %456 = vperm.xlu2 %1747, %v395_v28   ;;  %453 = vperm.xlu1 %1746, %v394_v29   ;;  %v613_v28 = vsel %vm581_vm9, 1, %v3498_v0  ;;  %vm600_vm9 = vcmp.eq.s32.totalorder %v2282_v49, 1 }
  0x92   : > { %450 = vperm.xlu0 %1745, %v393_v30   ;;  %v617_v30 = vsel %vm585_vm10, 1, %v3498_v0  ;;  %vm601_vm10 = vcmp.eq.s32.totalorder %v2303_v57, 1 }
  0x99   : > { %465 = vperm.xlu2 %1747, %v398_v34   ;;  %462 = vperm.xlu1 %1746, %v397_v35   ;;  %v618_v34 = vsel %vm586_vm11, 1, %v3498_v0  ;;  %v616_v35 = vsel %vm584_vm12, 1, %v3498_v0  ;;  %vm599_vm11 = vcmp.eq.s32.totalorder %v2285_v50, 1  ;;  %vm603_vm12 = vcmp.eq.s32.totalorder %v2297_v55, 1 }
  0x9a   : > { %459 = vperm.xlu0 %1745, %v396_v36  }
  0xa1   : > { %474 = vperm.xlu2 %1747, %v401_v40   ;;  %471 = vperm.xlu1 %1746, %v400_v41  }
  0xa2   : > { %468 = vperm.xlu0 %1745, %v399_v42   ;;  %v620_v42 = vsel %vm588_vm13, 1, %v3498_v0  ;;  %vm604_vm13 = vcmp.eq.s32.totalorder %v2315_v62, 1 }
  0xa9   : > { %483 = vperm.xlu2 %1747, %v404_v46   ;;  %480 = vperm.xlu1 %1746, %v403_v47   ;;  %v621_v46 = vsel %vm589_vm14, 1, %v3498_v0  ;;  %v619_v47 = vsel %vm587_vm15, 1, %v3498_v0  ;;  %vm602_vm14 = vcmp.eq.s32.totalorder %v2300_v56, 1  ;;  %vm799_vm15 = vcmp.eq.s32.totalorder %v2168_v3, 2 }
  0xaa   : > { %477 = vperm.xlu0 %1745, %v402_v48  }
  0xb1   : > { %492 = vperm.xlu2 %1747, %v407_v52   ;;  %489 = vperm.xlu1 %1746, %v406_v53  }
  0xb2   : > { %486 = vperm.xlu0 %1745, %v405_v54   ;;  %v623_v54 = vsel %vm591_vm0, 1, %v3498_v0  ;;  %vm800_vm0 = vcmp.eq.s32.totalorder %v2183_v9, 2 }
  0xb3   : > { %v832_v3 = vsel %vm800_vm0, 1, %v3498_v0  ;;  %vm807_vm0 = vcmp.eq.s32.totalorder %v2192_v13, 2 }
  0xb9   : > { %501 = vperm.xlu2 %1747, %v410_v58   ;;  %498 = vperm.xlu1 %1746, %v409_v59   ;;  %v624_v58 = vsel %vm592_vm1, 1, %v3498_v0  ;;  %v622_v59 = vsel %vm590_vm2, 1, %v3498_v0  ;;  %vm605_vm1 = vcmp.eq.s32.totalorder %v2312_v61, 1 }
  0xba   : > { %495 = vperm.xlu0 %1745, %v408_v60  }
  0xc1   : > { %507 = vperm.xlu1 %1746, %v412_v63   ;;  %639 = vperm.xlu2 %1747, %v606_v4  }
  0xc2   : > { %504 = vperm.xlu0 %1745, %v411_v5   ;;  %v626_v5 = vsel %vm594_vm3, 1, %v3498_v0  ;;  %vm802_vm3 = vcmp.eq.s32.totalorder %v2180_v8, 2 }
  0xc9   : > { %645 = vperm.xlu1 %1746, %v608_v6   ;;  %648 = vperm.xlu2 %1747, %v609_v10   ;;  %v627_v6 = vsel %vm595_vm4, 1, %v3498_v0  ;;  %v625_v10 = vsel %vm593_vm5, 1, %v3498_v0  ;;  %vm803_vm4 = vcmp.eq.s32.totalorder %v2162_v1, 2 }
  0xca   : > { %642 = vperm.xlu0 %1745, %v607_v11  }
  0xcb   : > { %v2329_v12 = vpop.permute.xlu2 %426 }
  0xd1   : > { %654 = vperm.xlu1 %1746, %v611_v16   ;;  %657 = vperm.xlu2 %1747, %v612_v17  }
  0xd2   : > { %651 = vperm.xlu0 %1745, %v610_v18   ;;  %v629_v18 = vsel %vm597_vm6, 1, %v3498_v0  ;;  %vm801_vm6 = vcmp.eq.s32.totalorder %v2165_v2, 2 }
  0xd3   : > { %v2337_v22 = vpop.permute.xlu2 %429 }
  0xd9   : > { %663 = vperm.xlu1 %1746, %v614_v23   ;;  %666 = vperm.xlu2 %1747, %v615_v24   ;;  %v630_v23 = vsel %vm598_vm7, 1, %v3498_v0  ;;  %v628_v24 = vsel %vm596_vm8, 1, %v3498_v0  ;;  %vm805_vm8 = vcmp.eq.s32.totalorder %v2198_v15, 2 }
  0xda   : > { %660 = vperm.xlu0 %1745, %v613_v28  }
  0xdb   : > { %v2345_v29 = vpop.permute.xlu2 %438 }
  0xe1   : > { %672 = vperm.xlu1 %1746, %v617_v30   ;;  %675 = vperm.xlu2 %1747, %v618_v34  }
  0xe2   : > { %669 = vperm.xlu0 %1745, %v616_v35   ;;  %v632_v35 = vsel %vm600_vm9, 1, %v3498_v0  ;;  %vm806_vm9 = vcmp.eq.s32.totalorder %v2195_v14, 2 }
  0xe3   : > { %v2353_v36 = vpop.permute.xlu2 %447  ;;  %v2355_v40 = vpop.permute.xlu1 %420 }
  0xe4   : > { %v2359_v41 = vpop.permute.xlu0 %414 }
  0xe5   : > { %vm509_vm2 = vcmp.eq.s32.totalorder %v2359_v41, 1 }
  0xe9   : > { %681 = vperm.xlu1 %1746, %v620_v42   ;;  %684 = vperm.xlu2 %1747, %v621_v46   ;;  %v633_v42 = vsel %vm601_vm10, 1, %v3498_v0  ;;  %v631_v46 = vsel %vm599_vm11, 1, %v3498_v0  ;;  %vm804_vm11 = vcmp.eq.s32.totalorder %v2177_v7, 2 }
  0xea   : > { %678 = vperm.xlu0 %1745, %v619_v47  }
  0xeb   : > { %v2365_v48 = vpop.permute.xlu2 %456  ;;  %v2367_v52 = vpop.permute.xlu1 %423 }
  0xec   : > { %v2371_v53 = vpop.permute.xlu0 %417  ;;  %vm512_vm7 = vcmp.eq.s32.totalorder %v2367_v52, 1 }
  0xf1   : > { %690 = vperm.xlu1 %1746, %v623_v54   ;;  %693 = vperm.xlu2 %1747, %v624_v58  }
  0xf2   : > { %687 = vperm.xlu0 %1745, %v622_v59   ;;  %v635_v59 = vsel %vm603_vm12, 1, %v3498_v0 }
  0xf3   : > { %v2377_v60 = vpop.permute.xlu2 %465  ;;  %v2379_v63 = vpop.permute.xlu1 %435 }
  0xf4   : > { %v2383_v4 = vpop.permute.xlu0 %432 }
  0xf5   : > { %vm515_vm12 = vcmp.eq.s32.totalorder %v2383_v4, 1 }
  0xf9   : > { %699 = vperm.xlu1 %1746, %v626_v5   ;;  %702 = vperm.xlu2 %1747, %v627_v6   ;;  %v636_v5 = vsel %vm604_vm13, 1, %v3498_v0  ;;  %v634_v6 = vsel %vm602_vm14, 1, %v3498_v0  ;;  %vm808_vm13 = vcmp.eq.s32.totalorder %v2213_v21, 2  ;;  %vm809_vm14 = vcmp.eq.s32.totalorder %v2210_v20, 2 }
  0xfa   : > { %696 = vperm.xlu0 %1745, %v625_v10  }
  0xfb   : > { %v2389_v11 = vpop.permute.xlu2 %474  ;;  %v2391_v16 = vpop.permute.xlu1 %444 }
  0xfc   : > { %v2395_v17 = vpop.permute.xlu0 %441 }
 0x101   : > { %708 = vperm.xlu1 %1746, %v629_v18   ;;  %711 = vperm.xlu2 %1747, %v630_v23  }
 0x102   : > { %705 = vperm.xlu0 %1745, %v628_v24   ;;  %v2437_v24 = vld [vmem:[%s3493_s2] sm:$0xff] }
 0x103   : > { %v2401_v28 = vpop.permute.xlu2 %483  ;;  %v2403_v30 = vpop.permute.xlu1 %453  ;;  %3513 = vst [vmem:[#allocation15_spill] sm:$0xff] %v2437_v24 }
 0x104   : > { %3510 = vst [vmem:[#allocation12_spill] sm:$0xff] %v2401_v28  ;;  %v2407_v34 = vpop.permute.xlu0 %450 }
 0x109   : > { %717 = vperm.xlu1 %1746, %v632_v35   ;;  %720 = vperm.xlu2 %1747, %v633_v42   ;;  %v2442_v35 = vld [vmem:[%s3494_s3] sm:$0xff]  ;;  %v831_v42 = vsel %vm799_vm15, 1, %v3498_v0 }
 0x10a   : > { %714 = vperm.xlu0 %1745, %v631_v46   ;;  %3514 = vst [vmem:[#allocation16_spill] sm:$0xff] %v2442_v35  ;;  %v637_v46 = vsel %vm605_vm1, 1, %v3498_v0  ;;  %vm518_vm1 = vcmp.eq.s32.totalorder %v2395_v17, 1 }
 0x10b   : > { %v2413_v47 = vpop.permute.xlu2 %492  ;;  %v2415_v54 = vpop.permute.xlu1 %462 }
 0x10c   : > { %3511 = vst [vmem:[#allocation13_spill] sm:$0xff] %v2413_v47  ;;  %v2419_v58 = vpop.permute.xlu0 %459 }
 0x111   : > { %726 = vperm.xlu1 %1746, %v635_v59   ;;  %729 = vperm.xlu2 %1747, %v636_v5   ;;  %v2448_v59 = vperm.slane %v2437_v24, 0  ;;  %v2451_v5 = vperm.slane %v2442_v35, 0 }
 0x112   : > { %723 = vperm.xlu0 %1745, %v634_v6   ;;  %v2455_v6 = vperm.slane %v2437_v24, 1 }
 0x113   : > { %v2425_v10 = vpop.permute.xlu2 %501  ;;  %v2427_v18 = vpop.permute.xlu1 %471  ;;  %v542_v28 = vsel %vm509_vm2, %v2448_v59, 0.0  ;;  %v1251_v41 = vsel %vm509_vm2, %v2451_v5, 0.0  ;;  %vm811_vm2 = vcmp.eq.s32.totalorder %v2228_v27, 2 }
 0x114   : > { %3512 = vst [vmem:[#allocation14_spill] sm:$0xff] %v2425_v10  ;;  %v2431_v23 = vpop.permute.xlu0 %468  ;;  %v2458_v10 = vperm.slane %v2442_v35, 1  ;;  %v3516_v35 = vmov 0  }
 0x115   : > { %v834_v24 = vsel %vm802_vm3, 1, %v3516_v35  ;;  %v835_v8 = vsel %vm803_vm4, 1, %v3516_v35  ;;  %v833_v1 = vsel %vm801_vm6, 1, %v3516_v35  ;;  %v838_v15 = vsel %vm806_vm9, 1, %v3516_v35 }
 0x116   : > { %v836_v14 = vsel %vm804_vm11, 1, %v3516_v35  ;;  %v841_v21 = vsel %vm809_vm14, 1, %v3516_v35  ;;  %v839_v20 = vsel %vm807_vm0, 1, %v3516_v35  ;;  %vm812_vm3 = vcmp.eq.s32.totalorder %v2225_v26, 2 }
 0x117   : > { %v844_v27 = vsel %vm812_vm3, 1, %v3516_v35  ;;  %vm511_vm6 = vcmp.eq.s32.totalorder %v2355_v40, 1  ;;  %vm513_vm9 = vcmp.eq.s32.totalorder %v2329_v12, 1  ;;  %vm815_vm11 = vcmp.eq.s32.totalorder %v2240_v32, 2 }
 0x118   : > { %vm813_vm14 = vcmp.eq.s32.totalorder %v2222_v25, 2  ;;  %v847_v25 = vsel %vm815_vm11, 1, %v3516_v35  ;;  %vm514_vm0 = vcmp.eq.s32.totalorder %v2337_v22, 1  ;;  %vm818_vm3 = vcmp.eq.s32.totalorder %v2255_v38, 2 }
 0x119   : > { %864 = vperm.xlu1 %1746, %v831_v42   ;;  %867 = vperm.xlu2 %1747, %v832_v3   ;;  %v1256_v22 = vsel %vm514_vm0, %v2451_v5, 0.0  ;;  %v1255_v38 = vsel %vm513_vm9, %v2451_v5, 0.0  ;;  %vm527_vm11 = vcmp.eq.s32.totalorder %v2431_v23, 1 }
 0x11a   : > { %732 = vperm.xlu0 %1745, %v637_v46   ;;  %v1269_v23 = vsel %vm527_vm11, %v2451_v5, 0.0 }
 0x11b   : > { %v2460_v47 = vpop.permute.xlu1 %480  ;;  %v640_v0 = vpop.permute.xlu2 %639 }
 0x11c   : > { %vm734_vm5 = vcmp.eq.s32.totalorder %v640_v0, 1  ;;  %v2466_v42 = vpop.permute.xlu0 %477 }
 0x11d   : > { %v2470_v3 = vsel %vm734_vm5, %v2455_v6, %v542_v28  ;;  %v2473_v46 = vsel %vm734_vm5, %v2458_v10, %v1251_v41  ;;  %v545_v28 = vsel %vm512_vm7, %v2448_v59, 0.0  ;;  %v1254_v41 = vsel %vm512_vm7, %v2451_v5, 0.0 }
 0x11e   : > { %3515 = vst [vmem:[#allocation17_spill] sm:$0xff] %v2473_v46  ;;  %vm810_vm5 = vcmp.eq.s32.totalorder %v2207_v19, 2  ;;  %vm510_vm7 = vcmp.eq.s32.totalorder %v2371_v53, 1  ;;  %v544_v19 = vsel %vm511_vm6, %v2448_v59, 0.0  ;;  %v546_v53 = vsel %vm513_vm9, %v2448_v59, 0.0 }
 0x11f   : > { %v842_v26 = vsel %vm810_vm5, 1, %v3516_v35  ;;  %v1252_v32 = vsel %vm510_vm7, %v2451_v5, 0.0  ;;  %vm820_vm9 = vcmp.eq.s32.totalorder %v2273_v45, 2 }
 0x121   : > { %873 = vperm.xlu1 %1746, %v834_v24   ;;  %876 = vperm.xlu2 %1747, %v835_v8   ;;  %v837_v8 = vsel %vm805_vm8, 1, %v3516_v35  ;;  %vm521_vm8 = vcmp.eq.s32.totalorder %v2407_v34, 1 }
 0x122   : > { %870 = vperm.xlu0 %1745, %v833_v1   ;;  %v554_v40 = vsel %vm521_vm8, %v2448_v59, 0.0  ;;  %v1263_v34 = vsel %vm521_vm8, %v2451_v5, 0.0  ;;  %vm517_vm8 = vcmp.eq.s32.totalorder %v2345_v29, 1 }
 0x123   : > { %v2479_v0 = vpop.permute.xlu1 %489  ;;  %v649_v2 = vpop.permute.xlu2 %648  ;;  %v550_v12 = vsel %vm517_vm8, %v2448_v59, 0.0 }
 0x124   : > { %vm737_vm10 = vcmp.eq.s32.totalorder %v649_v2, 1  ;;  %v2485_v46 = vpop.permute.xlu0 %486  ;;  %v548_v2 = vsel %vm515_vm12, %v2448_v59, 0.0 }
 0x125   : > { %v2489_v52 = vsel %vm737_vm10, %v2455_v6, %v545_v28  ;;  %v2492_v24 = vsel %vm737_vm10, %v2458_v10, %v1254_v41  ;;  %v1257_v28 = vsel %vm515_vm12, %v2451_v5, 0.0  ;;  %vm814_vm10 = vcmp.eq.s32.totalorder %v2243_v33, 2 }
 0x129   : > { %882 = vperm.xlu1 %1746, %v837_v8   ;;  %885 = vperm.xlu2 %1747, %v838_v15   ;;  %v840_v15 = vsel %vm808_vm13, 1, %v3516_v35 }
 0x12a   : > { %879 = vperm.xlu0 %1745, %v836_v14  }
 0x12b   : > { %v2498_v1 = vpop.permute.xlu1 %498  ;;  %v658_v7 = vpop.permute.xlu2 %657 }
 0x12c   : > { %vm740_vm15 = vcmp.eq.s32.totalorder %v658_v7, 1  ;;  %v2504_v41 = vpop.permute.xlu0 %495  ;;  %v551_v7 = vsel %vm518_vm1, %v2448_v59, 0.0 }
 0x12d   : > { %v2508_v4 = vsel %vm740_vm15, %v2455_v6, %v548_v2  ;;  %v2511_v8 = vsel %vm740_vm15, %v2458_v10, %v1257_v28  ;;  %v1260_v2 = vsel %vm518_vm1, %v2451_v5, 0.0  ;;  %vm524_vm1 = vcmp.eq.s32.totalorder %v2419_v58, 1 }
 0x12e   : > { %v1266_v58 = vsel %vm524_vm1, %v2451_v5, 0.0 }
 0x131   : > { %891 = vperm.xlu1 %1746, %v840_v15   ;;  %894 = vperm.xlu2 %1747, %v841_v21   ;;  %v843_v21 = vsel %vm811_vm2, 1, %v3516_v35  ;;  %vm817_vm2 = vcmp.eq.s32.totalorder %v2258_v39, 2 }
 0x132   : > { %888 = vperm.xlu0 %1745, %v839_v20   ;;  %v1253_v20 = vsel %vm511_vm6, %v2451_v5, 0.0  ;;  %vm816_vm6 = vcmp.eq.s32.totalorder %v2237_v31, 2  ;;  %v850_v31 = vsel %vm818_vm3, 1, %v3516_v35  ;;  %vm530_vm3 = vcmp.eq.s32.totalorder %v2466_v42, 1 }
 0x133   : > { %v2517_v14 = vpop.permute.xlu1 %507  ;;  %v667_v13 = vpop.permute.xlu2 %666  ;;  %v1272_v42 = vsel %vm530_vm3, %v2451_v5, 0.0 }
 0x134   : > { %vm743_vm4 = vcmp.eq.s32.totalorder %v667_v13, 1  ;;  %v2523_v28 = vpop.permute.xlu0 %504  ;;  %v543_v13 = vsel %vm510_vm7, %v2448_v59, 0.0 }
 0x135   : > { %v2527_v17 = vsel %vm743_vm4, %v2455_v6, %v551_v7  ;;  %v2530_v15 = vsel %vm743_vm4, %v2458_v10, %v1260_v2 }
 0x136   : > { %3517 = vst [vmem:[#allocation18_spill] sm:$0xff] %v2530_v15 }
 0x139   : > { %900 = vperm.xlu1 %1746, %v843_v21   ;;  %903 = vperm.xlu2 %1747, %v844_v27  }
 0x13a   : > { %897 = vperm.xlu0 %1745, %v842_v26  }
 0x13b   : > { %v646_v7 = vpop.permute.xlu1 %645  ;;  %v676_v2 = vpop.permute.xlu2 %675 }
 0x13c   : > { %vm736_vm12 = vcmp.eq.s32.totalorder %v646_v7, 1  ;;  %vm746_vm13 = vcmp.eq.s32.totalorder %v676_v2, 1  ;;  %v643_v21 = vpop.permute.xlu0 %642  ;;  %v846_v7 = vsel %vm814_vm10, 1, %v3516_v35  ;;  %v547_v2 = vsel %vm514_vm0, %v2448_v59, 0.0 }
 0x13d   : > { %v2550_v27 = vsel %vm736_vm12, %v2455_v6, %v544_v19  ;;  %v2553_v26 = vsel %vm736_vm12, %v2458_v10, %v1253_v20  ;;  %v2556_v15 = vsel %vm746_vm13, %v2455_v6, %v554_v40  ;;  %v2559_v33 = vsel %vm746_vm13, %v2458_v10, %v1263_v34 }
 0x13e   : > { %vm735_vm15 = vcmp.eq.s32.totalorder %v643_v21, 1  ;;  %v845_v40 = vsel %vm813_vm14, 1, %v3516_v35  ;;  %vm516_vm10 = vcmp.eq.s32.totalorder %v2379_v63, 1  ;;  %vm821_vm12 = vcmp.eq.s32.totalorder %v2270_v44, 2 }
 0x13f   : > { %v2568_v19 = vsel %vm735_vm15, %v2455_v6, %v543_v13  ;;  %v2571_v20 = vsel %vm735_vm15, %v2458_v10, %v1252_v32  ;;  %v557_v13 = vsel %vm524_vm1, %v2448_v59, 0.0  ;;  %v549_v29 = vsel %vm516_vm10, %v2448_v59, 0.0 }
 0x140   : > { %vm819_vm15 = vcmp.eq.s32.totalorder %v2252_v37, 2  ;;  %v1258_v44 = vsel %vm516_vm10, %v2451_v5, 0.0  ;;  %v853_v37 = vsel %vm821_vm12, 1, %v3516_v35  ;;  %vm520_vm1 = vcmp.eq.s32.totalorder %v2353_v36, 1 }
 0x141   : > { %909 = vperm.xlu1 %1746, %v846_v7   ;;  %912 = vperm.xlu2 %1747, %v847_v25   ;;  %v553_v63 = vsel %vm520_vm1, %v2448_v59, 0.0  ;;  %vm533_vm12 = vcmp.eq.s32.totalorder %v2485_v46, 1 }
 0x142   : > { %906 = vperm.xlu0 %1745, %v845_v40   ;;  %v1275_v46 = vsel %vm533_vm12, %v2451_v5, 0.0 }
 0x143   : > { %v655_v34 = vpop.permute.xlu1 %654  ;;  %v685_v21 = vpop.permute.xlu2 %684 }
 0x144   : > { %vm739_vm4 = vcmp.eq.s32.totalorder %v655_v34, 1  ;;  %vm749_vm5 = vcmp.eq.s32.totalorder %v685_v21, 1  ;;  %v652_v32 = vpop.permute.xlu0 %651  ;;  %v849_v34 = vsel %vm817_vm2, 1, %v3516_v35  ;;  %v1259_v21 = vsel %vm517_vm8, %v2451_v5, 0.0 }
 0x145   : > { %v2586_v7 = vsel %vm739_vm4, %v2455_v6, %v547_v2  ;;  %v2589_v25 = vsel %vm739_vm4, %v2458_v10, %v1256_v22  ;;  %v2592_v40 = vsel %vm749_vm5, %v2455_v6, %v557_v13  ;;  %v2595_v39 = vsel %vm749_vm5, %v2458_v10, %v1266_v58 }
 0x146   : > { %vm738_vm7 = vcmp.eq.s32.totalorder %v652_v32, 1  ;;  %v848_v13 = vsel %vm816_vm6, 1, %v3516_v35  ;;  %vm519_vm2 = vcmp.eq.s32.totalorder %v2391_v16, 1  ;;  %vm823_vm4 = vcmp.eq.s32.totalorder %v2288_v51, 2 }
 0x147   : > { %v2604_v2 = vsel %vm738_vm7, %v2455_v6, %v546_v53  ;;  %v2607_v22 = vsel %vm738_vm7, %v2458_v10, %v1255_v38  ;;  %v560_v53 = vsel %vm527_vm11, %v2448_v59, 0.0  ;;  %v552_v36 = vsel %vm519_vm2, %v2448_v59, 0.0 }
 0x148   : > { %vm824_vm5 = vcmp.eq.s32.totalorder %v2285_v50, 2  ;;  %vm822_vm8 = vcmp.eq.s32.totalorder %v2267_v43, 2  ;;  %v1261_v50 = vsel %vm519_vm2, %v2451_v5, 0.0  ;;  %vm523_vm11 = vcmp.eq.s32.totalorder %v2365_v48, 1 }
 0x149   : > { %918 = vperm.xlu1 %1746, %v849_v34   ;;  %921 = vperm.xlu2 %1747, %v850_v31   ;;  %v856_v43 = vsel %vm824_vm5, 1, %v3516_v35  ;;  %v556_v16 = vsel %vm523_vm11, %v2448_v59, 0.0  ;;  %vm536_vm5 = vcmp.eq.s32.totalorder %v2504_v41, 1 }
 0x14a   : > { %915 = vperm.xlu0 %1745, %v848_v13   ;;  %v1278_v41 = vsel %vm536_vm5, %v2451_v5, 0.0 }
 0x14b   : > { %v664_v58 = vpop.permute.xlu1 %663  ;;  %v694_v32 = vpop.permute.xlu2 %693 }
 0x14c   : > { %vm742_vm13 = vcmp.eq.s32.totalorder %v664_v58, 1  ;;  %vm752_vm14 = vcmp.eq.s32.totalorder %v694_v32, 1  ;;  %v661_v38 = vpop.permute.xlu0 %660  ;;  %v852_v58 = vsel %vm820_vm9, 1, %v3516_v35  ;;  %v1262_v32 = vsel %vm520_vm1, %v2451_v5, 0.0 }
 0x14d   : > { %v2623_v34 = vsel %vm742_vm13, %v2455_v6, %v550_v12  ;;  %v2626_v31 = vsel %vm742_vm13, %v2458_v10, %v1259_v21  ;;  %v2629_v13 = vsel %vm752_vm14, %v2455_v6, %v560_v53  ;;  %v2632_v45 = vsel %vm752_vm14, %v2458_v10, %v1269_v23 }
 0x14e   : > { %vm741_vm0 = vcmp.eq.s32.totalorder %v661_v38, 1  ;;  %v851_v53 = vsel %vm819_vm15, 1, %v3516_v35  ;;  %vm522_vm9 = vcmp.eq.s32.totalorder %v2403_v30, 1  ;;  %vm826_vm13 = vcmp.eq.s32.totalorder %v2303_v57, 2 }
 0x14f   : > { %v2641_v12 = vsel %vm741_vm0, %v2455_v6, %v549_v29  ;;  %v2644_v21 = vsel %vm741_vm0, %v2458_v10, %v1258_v44  ;;  %v563_v29 = vsel %vm530_vm3, %v2448_v59, 0.0  ;;  %v555_v48 = vsel %vm522_vm9, %v2448_v59, 0.0 }
 0x150   : > { %vm827_vm14 = vcmp.eq.s32.totalorder %v2300_v56, 2  ;;  %vm825_vm1 = vcmp.eq.s32.totalorder %v2282_v49, 2  ;;  %v1264_v56 = vsel %vm522_vm9, %v2451_v5, 0.0  ;;  %vm526_vm3 = vcmp.eq.s32.totalorder %v2377_v60, 1 }
 0x151   : > { %927 = vperm.xlu1 %1746, %v852_v58   ;;  %930 = vperm.xlu2 %1747, %v853_v37   ;;  %v859_v49 = vsel %vm827_vm14, 1, %v3516_v35  ;;  %v559_v30 = vsel %vm526_vm3, %v2448_v59, 0.0  ;;  %vm539_vm14 = vcmp.eq.s32.totalorder %v2523_v28, 1 }
 0x152   : > { %924 = vperm.xlu0 %1745, %v851_v53   ;;  %v1281_v28 = vsel %vm539_vm14, %v2451_v5, 0.0 }
 0x153   : > { %v673_v23 = vpop.permute.xlu1 %672  ;;  %v703_v38 = vpop.permute.xlu2 %702 }
 0x154   : > { %vm745_vm6 = vcmp.eq.s32.totalorder %v673_v23, 1  ;;  %vm755_vm7 = vcmp.eq.s32.totalorder %v703_v38, 1  ;;  %v670_v44 = vpop.permute.xlu0 %669  ;;  %v855_v23 = vsel %vm823_vm4, 1, %v3516_v35  ;;  %v1265_v38 = vsel %vm523_vm11, %v2451_v5, 0.0 }
 0x155   : > { %v2660_v58 = vsel %vm745_vm6, %v2455_v6, %v553_v63  ;;  %v2663_v37 = vsel %vm745_vm6, %v2458_v10, %v1262_v32  ;;  %v2666_v53 = vsel %vm755_vm7, %v2455_v6, %v563_v29  ;;  %v2669_v51 = vsel %vm755_vm7, %v2458_v10, %v1272_v42 }
 0x156   : > { %vm744_vm10 = vcmp.eq.s32.totalorder %v670_v44, 1  ;;  %v854_v29 = vsel %vm822_vm8, 1, %v3516_v35  ;;  %vm525_vm4 = vcmp.eq.s32.totalorder %v2415_v54, 1  ;;  %vm829_vm6 = vcmp.eq.s32.totalorder %v2315_v62, 2 }
 0x157   : > { %v2678_v63 = vsel %vm744_vm10, %v2455_v6, %v552_v36  ;;  %v2681_v32 = vsel %vm744_vm10, %v2458_v10, %v1261_v50  ;;  %v566_v36 = vsel %vm533_vm12, %v2448_v59, 0.0  ;;  %v558_v60 = vsel %vm525_vm4, %v2448_v59, 0.0 }
 0x158   : > { %vm830_vm7 = vcmp.eq.s32.totalorder %v2312_v61, 2  ;;  %vm828_vm11 = vcmp.eq.s32.totalorder %v2297_v55, 2  ;;  %v1267_v61 = vsel %vm525_vm4, %v2451_v5, 0.0  ;;  %vm529_vm12 = vcmp.eq.s32.totalorder %v2389_v11, 1 }
 0x159   : > { %936 = vperm.xlu1 %1746, %v855_v23   ;;  %939 = vperm.xlu2 %1747, %v856_v43   ;;  %v862_v55 = vsel %vm830_vm7, 1, %v3516_v35  ;;  %v562_v54 = vsel %vm529_vm12, %v2448_v59, 0.0  ;;  %v1271_v11 = vsel %vm529_vm12, %v2451_v5, 0.0 }
 0x15a   : > { %933 = vperm.xlu0 %1745, %v854_v29  }
 0x15b   : > { %v682_v42 = vpop.permute.xlu1 %681  ;;  %v712_v44 = vpop.permute.xlu2 %711 }
 0x15c   : > { %vm748_vm15 = vcmp.eq.s32.totalorder %v682_v42, 1  ;;  %vm758_vm0 = vcmp.eq.s32.totalorder %v712_v44, 1  ;;  %v679_v50 = vpop.permute.xlu0 %678  ;;  %v858_v42 = vsel %vm826_vm13, 1, %v3516_v35  ;;  %v1268_v44 = vsel %vm526_vm3, %v2451_v5, 0.0 }
 0x15d   : > { %v2697_v23 = vsel %vm748_vm15, %v2455_v6, %v556_v16  ;;  %v2700_v43 = vsel %vm748_vm15, %v2458_v10, %v1265_v38  ;;  %v2703_v29 = vsel %vm758_vm0, %v2455_v6, %v566_v36  ;;  %v2706_v57 = vsel %vm758_vm0, %v2458_v10, %v1275_v46 }
 0x15e   : > { %3518 = vst [vmem:[#allocation19_spill] sm:$0xff] %v2697_v23  ;;  %vm747_vm2 = vcmp.eq.s32.totalorder %v679_v50, 1  ;;  %v857_v36 = vsel %vm825_vm1, 1, %v3516_v35  ;;  %vm528_vm13 = vcmp.eq.s32.totalorder %v2427_v18, 1  ;;  %vm1025_vm15 = vcmp.eq.s32.totalorder %v2183_v9, 3  ;;  %v3525_v18 = vld [vmem:[#allocation15_spill] sm:$0xff] }
 0x15f   : > { %3519 = vst [vmem:[#allocation20_spill] sm:$0xff] %v2700_v43  ;;  %v2715_v16 = vsel %vm747_vm2, %v2455_v6, %v555_v48  ;;  %v2718_v38 = vsel %vm747_vm2, %v2458_v10, %v1264_v56  ;;  %v569_v48 = vsel %vm536_vm5, %v2448_v59, 0.0  ;;  %v1751_v23 = vld [vmem:[%s2144_s25 + $0x20] sm:$0xff] }
 0x160   : > { %vm1028_vm7 = vcmp.eq.s32.totalorder %v1751_v23, 3 }
 0x161   : > { %945 = vperm.xlu1 %1746, %v858_v42   ;;  %948 = vperm.xlu2 %1747, %v859_v49  }
 0x162   : > { %942 = vperm.xlu0 %1745, %v857_v36  }
 0x163   : > { %v691_v46 = vpop.permute.xlu1 %690  ;;  %v721_v50 = vpop.permute.xlu2 %720 }
 0x164   : > { %vm751_vm8 = vcmp.eq.s32.totalorder %v691_v46, 1  ;;  %vm761_vm10 = vcmp.eq.s32.totalorder %v721_v50, 1  ;;  %v688_v56 = vpop.permute.xlu0 %687  ;;  %v861_v46 = vsel %vm829_vm6, 1, %v3516_v35  ;;  %v572_v50 = vsel %vm539_vm14, %v2448_v59, 0.0 }
 0x165   : > { %v2734_v42 = vsel %vm751_vm8, %v2455_v6, %v559_v30  ;;  %v2737_v49 = vsel %vm751_vm8, %v2458_v10, %v1268_v44  ;;  %v2740_v36 = vsel %vm761_vm10, %v2455_v6, %v569_v48  ;;  %v2743_v62 = vsel %vm761_vm10, %v2458_v10, %v1278_v41 }
 0x166   : > { %3520 = vst [vmem:[#allocation21_spill] sm:$0xff] %v2734_v42  ;;  %vm750_vm9 = vcmp.eq.s32.totalorder %v688_v56, 1  ;;  %v860_v48 = vsel %vm828_vm11, 1, %v3516_v35  ;;  %vm531_vm6 = vcmp.eq.s32.totalorder %v2460_v47, 1  ;;  %vm534_vm14 = vcmp.eq.s32.totalorder %v2479_v0, 1 }
 0x167   : > { %3521 = vst [vmem:[#allocation22_spill] sm:$0xff] %v2737_v49  ;;  %v2752_v30 = vsel %vm750_vm9, %v2455_v6, %v558_v60  ;;  %v2755_v44 = vsel %vm750_vm9, %v2458_v10, %v1267_v61  ;;  %v561_v60 = vsel %vm528_vm13, %v2448_v59, 0.0  ;;  %v1749_v61 = vld [vmem:[%s2144_s25 + $0x10] sm:$0xff] }
 0x168   : > { %vm1026_vm0 = vcmp.eq.s32.totalorder %v1749_v61, 3 }
 0x169   : > { %954 = vperm.xlu1 %1746, %v861_v46   ;;  %957 = vperm.xlu2 %1747, %v862_v55   ;;  %v1750_v55 = vld [vmem:[%s2144_s25] sm:$0xff] }
 0x16a   : > { %951 = vperm.xlu0 %1745, %v860_v48   ;;  %vm1024_vm3 = vcmp.eq.s32.totalorder %v1750_v55, 3  ;;  %v3526_v55 = vld [vmem:[#allocation16_spill] sm:$0xff] }
 0x16b   : > { %v700_v41 = vpop.permute.xlu1 %699  ;;  %v730_v56 = vpop.permute.xlu2 %729 }
 0x16c   : > { %vm754_vm1 = vcmp.eq.s32.totalorder %v700_v41, 1  ;;  %vm764_vm2 = vcmp.eq.s32.totalorder %v730_v56, 1  ;;  %v697_v46 = vpop.permute.xlu0 %696  ;;  %v1270_v41 = vsel %vm528_vm13, %v2451_v5, 0.0  ;;  %v1057_v56 = vsel %vm1025_vm15, 1, %v3516_v35 }
 0x16d   : > { %v2771_v48 = vsel %vm754_vm1, %v2455_v6, %v562_v54  ;;  %v2774_v49 = vsel %vm754_vm1, %v2458_v10, %v1271_v11  ;;  %v2777_v42 = vsel %vm764_vm2, %v2455_v6, %v572_v50  ;;  %v2780_v9 = vsel %vm764_vm2, %v2458_v10, %v1281_v28  ;;  %v3524_v28 = vld [vmem:[#allocation12_spill] sm:$0xff] }
 0x16e   : > { %3522 = vst [vmem:[#allocation23_spill] sm:$0xff] %v2771_v48  ;;  %vm753_vm4 = vcmp.eq.s32.totalorder %v697_v46, 1  ;;  %v1058_v54 = vsel %vm1026_vm0, 1, %v3516_v35  ;;  %v1056_v50 = vsel %vm1024_vm3, 1, %v3516_v35  ;;  %vm532_vm5 = vcmp.eq.s32.totalorder %v3524_v28, 1  ;;  %v1752_v28 = vld [vmem:[%s2144_s25 + $0x28] sm:$0xff] }
 0x16f   : > { %3523 = vst [vmem:[#allocation24_spill] sm:$0xff] %v2774_v49  ;;  %v2788_v61 = vsel %vm753_vm4, %v2455_v6, %v561_v60  ;;  %v2791_v11 = vsel %vm753_vm4, %v2458_v10, %v1270_v41  ;;  %v2797_v46 = vperm.slane %v3525_v18, 2  ;;  %v2800_v49 = vperm.slane %v3526_v55, 2  ;;  %v1753_v18 = vld [vmem:[%s2144_s25 + $0x18] sm:$0xff] }
 0x170   : > { %v565_v60 = vsel %vm532_vm5, %v2448_v59, 0.0  ;;  %v1274_v41 = vsel %vm532_vm5, %v2451_v5, 0.0  ;;  %vm1029_vm8 = vcmp.eq.s32.totalorder %v1752_v28, 3  ;;  %vm1027_vm9 = vcmp.eq.s32.totalorder %v1753_v18, 3  ;;  %v3530_v18 = vld [vmem:[#allocation13_spill] sm:$0xff] }
 0x171   : > { %1092 = vperm.xlu1 %1746, %v1057_v56   ;;  %1095 = vperm.xlu2 %1747, %v1058_v54   ;;  %v564_v56 = vsel %vm531_vm6, %v2448_v59, 0.0  ;;  %vm535_vm13 = vcmp.eq.s32.totalorder %v3530_v18, 1  ;;  %v567_v18 = vsel %vm534_vm14, %v2448_v59, 0.0 }
 0x172   : > { %1089 = vperm.xlu0 %1745, %v1056_v50   ;;  %v568_v47 = vsel %vm535_vm13, %v2448_v59, 0.0 }
 0x173   : > { %v709_v48 = vpop.permute.xlu1 %708  ;;  %v868_v43 = vpop.permute.xlu2 %867 }
 0x174   : > { %vm757_vm10 = vcmp.eq.s32.totalorder %v709_v48, 1  ;;  %vm960_vm11 = vcmp.eq.s32.totalorder %v868_v43, 1  ;;  %v706_v54 = vpop.permute.xlu0 %705  ;;  %v1273_v43 = vsel %vm531_vm6, %v2451_v5, 0.0  ;;  %v1060_v48 = vsel %vm1028_vm7, 1, %v3516_v35 }
 0x175   : > { %v2811_v50 = vsel %vm757_vm10, %v2455_v6, %v565_v60  ;;  %v2814_v55 = vsel %vm757_vm10, %v2458_v10, %v1274_v41  ;;  %v2818_v23 = vsel %vm960_vm11, %v2797_v46, %v2568_v19  ;;  %v2822_v28 = vsel %vm960_vm11, %v2800_v49, %v2571_v20 }
 0x176   : > { %3527 = vst [vmem:[#allocation12_spill] sm:$0xff] %v2811_v50  ;;  %vm756_vm12 = vcmp.eq.s32.totalorder %v706_v54, 1  ;;  %v1061_v60 = vsel %vm1029_vm8, 1, %v3516_v35  ;;  %v1059_v20 = vsel %vm1027_vm9, 1, %v3516_v35  ;;  %v1277_v54 = vsel %vm535_vm13, %v2451_v5, 0.0  ;;  %v1754_v50 = vld [vmem:[%s2144_s25 + $0x38] sm:$0xff] }
 0x177   : > { %3528 = vst [vmem:[#allocation15_spill] sm:$0xff] %v2814_v55  ;;  %v2830_v41 = vsel %vm756_vm12, %v2455_v6, %v564_v56  ;;  %v2833_v19 = vsel %vm756_vm12, %v2458_v10, %v1273_v43  ;;  %vm1031_vm15 = vcmp.eq.s32.totalorder %v1754_v50, 3  ;;  %v1755_v43 = vld [vmem:[%s2144_s25 + $0x40] sm:$0xff]  ;;  %vm537_vm6 = vcmp.eq.s32.totalorder %v2498_v1, 1 }
 0x178   : > { %3529 = vst [vmem:[#allocation16_spill] sm:$0xff] %v2822_v28  ;;  %vm1032_vm0 = vcmp.eq.s32.totalorder %v1755_v43, 3  ;;  %vm540_vm13 = vcmp.eq.s32.totalorder %v2517_v14, 1 }
 0x179   : > { %1101 = vperm.xlu1 %1746, %v1060_v48   ;;  %1104 = vperm.xlu2 %1747, %v1061_v60   ;;  %v1756_v48 = vld [vmem:[%s2144_s25 + $0x30] sm:$0xff] }
 0x17a   : > { %1098 = vperm.xlu0 %1745, %v1059_v20   ;;  %vm1030_vm3 = vcmp.eq.s32.totalorder %v1756_v48, 3  ;;  %v3534_v48 = vld [vmem:[#allocation14_spill] sm:$0xff] }
 0x17b   : > { %v718_v55 = vpop.permute.xlu1 %717  ;;  %v877_v56 = vpop.permute.xlu2 %876  ;;  %vm538_vm5 = vcmp.eq.s32.totalorder %v3534_v48, 1  ;;  %v570_v48 = vsel %vm537_vm6, %v2448_v59, 0.0 }
 0x17c   : > { %vm760_vm1 = vcmp.eq.s32.totalorder %v718_v55, 1  ;;  %vm963_vm2 = vcmp.eq.s32.totalorder %v877_v56, 1  ;;  %v715_v28 = vpop.permute.xlu0 %714  ;;  %v1276_v55 = vsel %vm534_vm14, %v2451_v5, 0.0  ;;  %v571_v0 = vsel %vm538_vm5, %v2448_v59, 0.0 }
 0x17d   : > { %v2847_v60 = vsel %vm760_vm1, %v2455_v6, %v568_v47  ;;  %v2850_v20 = vsel %vm760_vm1, %v2458_v10, %v1277_v54  ;;  %v2854_v50 = vsel %vm963_vm2, %v2797_v46, %v2604_v2  ;;  %v2858_v43 = vsel %vm963_vm2, %v2800_v49, %v2607_v22 }
 0x17e   : > { %3531 = vst [vmem:[#allocation13_spill] sm:$0xff] %v2847_v60  ;;  %vm759_vm4 = vcmp.eq.s32.totalorder %v715_v28, 1  ;;  %v1063_v47 = vsel %vm1031_vm15, 1, %v3516_v35  ;;  %v1064_v54 = vsel %vm1032_vm0, 1, %v3516_v35  ;;  %v1062_v22 = vsel %vm1030_vm3, 1, %v3516_v35  ;;  %v1757_v60 = vld [vmem:[%s2144_s25 + $0x50] sm:$0xff] }
 0x17f   : > { %3532 = vst [vmem:[#allocation25_spill] sm:$0xff] %v2850_v20  ;;  %v2866_v56 = vsel %vm759_vm4, %v2455_v6, %v567_v18  ;;  %v2869_v2 = vsel %vm759_vm4, %v2458_v10, %v1276_v55  ;;  %v1280_v28 = vsel %vm538_vm5, %v2451_v5, 0.0  ;;  %vm1034_vm7 = vcmp.eq.s32.totalorder %v1757_v60, 3  ;;  %v1758_v55 = vld [vmem:[%s2144_s25 + $0x58] sm:$0xff] }
 0x180   : > { %3533 = vst [vmem:[#allocation26_spill] sm:$0xff] %v2858_v43  ;;  %vm1035_vm8 = vcmp.eq.s32.totalorder %v1758_v55, 3 }
 0x181   : > { %1110 = vperm.xlu1 %1746, %v1063_v47   ;;  %1113 = vperm.xlu2 %1747, %v1064_v54   ;;  %v1759_v47 = vld [vmem:[%s2144_s25 + $0x48] sm:$0xff] }
 0x182   : > { %1107 = vperm.xlu0 %1745, %v1062_v22   ;;  %vm1033_vm9 = vcmp.eq.s32.totalorder %v1759_v47, 3  ;;  %v1760_v47 = vld [vmem:[%s2144_s25 + $0x68] sm:$0xff] }
 0x183   : > { %v727_v20 = vpop.permute.xlu1 %726  ;;  %v886_v18 = vpop.permute.xlu2 %885  ;;  %vm1037_vm14 = vcmp.eq.s32.totalorder %v1760_v47, 3 }
 0x184   : > { %vm763_vm10 = vcmp.eq.s32.totalorder %v727_v20, 1  ;;  %vm966_vm11 = vcmp.eq.s32.totalorder %v886_v18, 1  ;;  %v724_v43 = vpop.permute.xlu0 %723  ;;  %v1279_v20 = vsel %vm537_vm6, %v2451_v5, 0.0 }
 0x185   : > { %v2883_v54 = vsel %vm763_vm10, %v2455_v6, %v571_v0  ;;  %v2886_v22 = vsel %vm763_vm10, %v2458_v10, %v1280_v28  ;;  %v2890_v60 = vsel %vm966_vm11, %v2797_v46, %v2641_v12  ;;  %v2894_v55 = vsel %vm966_vm11, %v2800_v49, %v2644_v21 }
 0x186   : > { %3535 = vst [vmem:[#allocation14_spill] sm:$0xff] %v2883_v54  ;;  %vm762_vm12 = vcmp.eq.s32.totalorder %v724_v43, 1  ;;  %v1066_v0 = vsel %vm1034_vm7, 1, %v3516_v35  ;;  %v1067_v28 = vsel %vm1035_vm8, 1, %v3516_v35  ;;  %v1065_v21 = vsel %vm1033_vm9, 1, %v3516_v35  ;;  %v1762_v54 = vld [vmem:[%s2144_s25 + $0x60] sm:$0xff] }
 0x187   : > { %3536 = vst [vmem:[#allocation27_spill] sm:$0xff] %v2886_v22  ;;  %v2902_v18 = vsel %vm762_vm12, %v2455_v6, %v570_v48  ;;  %v2905_v12 = vsel %vm762_vm12, %v2458_v10, %v1279_v20  ;;  %v1761_v22 = vld [vmem:[%s2144_s25 + $0x70] sm:$0xff]  ;;  %v573_v48 = vsel %vm540_vm13, %v2448_v59, 0.0  ;;  %vm1036_vm2 = vcmp.eq.s32.totalorder %v1762_v54, 3 }
 0x188   : > { %vm1038_vm15 = vcmp.eq.s32.totalorder %v1761_v22, 3  ;;  %v1282_v54 = vsel %vm540_vm13, %v2451_v5, 0.0  ;;  %v1068_v47 = vsel %vm1036_vm2, 1, %v3516_v35  ;;  %v1763_v5 = vld [vmem:[%s2144_s25 + $0x80] sm:$0xff] }
 0x189   : > { %1119 = vperm.xlu1 %1746, %v1066_v0   ;;  %1122 = vperm.xlu2 %1747, %v1067_v28   ;;  %v3537_v28 = vld [vmem:[#allocation17_spill] sm:$0xff]  ;;  %vm1040_vm4 = vcmp.eq.s32.totalorder %v1763_v5, 3  ;;  %v1768_v5 = vld [vmem:[%s2144_s25 + $0x90] sm:$0xff] }
 0x18a   : > { %1116 = vperm.xlu0 %1745, %v1065_v21   ;;  %vm1042_vm13 = vcmp.eq.s32.totalorder %v1768_v5, 3 }
 0x18b   : > { %v865_v1 = vpop.permute.xlu1 %864  ;;  %v895_v43 = vpop.permute.xlu2 %894 }
 0x18c   : > { %vm959_vm0 = vcmp.eq.s32.totalorder %v865_v1, 1  ;;  %vm969_vm1 = vcmp.eq.s32.totalorder %v895_v43, 1  ;;  %v733_v20 = vpop.permute.xlu0 %732  ;;  %v1070_v1 = vsel %vm1038_vm15, 1, %v3516_v35 }
 0x18d   : > { %v2917_v0 = vsel %vm959_vm0, %v2797_v46, %v2470_v3  ;;  %v2921_v21 = vsel %vm959_vm0, %v2800_v49, %v3537_v28  ;;  %v2925_v22 = vsel %vm969_vm1, %v2797_v46, %v2678_v63  ;;  %v2929_v59 = vsel %vm969_vm1, %v2800_v49, %v2681_v32 }
 0x18e   : > { %vm765_vm3 = vcmp.eq.s32.totalorder %v733_v20, 1  ;;  %v1069_v3 = vsel %vm1037_vm14, 1, %v3516_v35  ;;  %v1764_v20 = vld [vmem:[%s2144_s25 + $0x88] sm:$0xff] }
 0x18f   : > { %v2937_v43 = vsel %vm765_vm3, %v2455_v6, %v573_v48  ;;  %v2940_v63 = vsel %vm765_vm3, %v2458_v10, %v1282_v54  ;;  %vm1041_vm5 = vcmp.eq.s32.totalorder %v1764_v20, 3  ;;  %v1765_v6 = vld [vmem:[%s2144_s25 + $0x78] sm:$0xff] }
 0x190   : > { %vm1039_vm8 = vcmp.eq.s32.totalorder %v1765_v6, 3 }
 0x191   : > { %1128 = vperm.xlu1 %1746, %v1069_v3   ;;  %1131 = vperm.xlu2 %1747, %v1070_v1   ;;  %v1072_v1 = vsel %vm1040_vm4, 1, %v3516_v35 }
 0x192   : > { %1125 = vperm.xlu0 %1745, %v1068_v47   ;;  %v1073_v47 = vsel %vm1041_vm5, 1, %v3516_v35 }
 0x193   : > { %v874_v32 = vpop.permute.xlu1 %873  ;;  %v904_v14 = vpop.permute.xlu2 %903 }
 0x194   : > { %vm962_vm6 = vcmp.eq.s32.totalorder %v874_v32, 1  ;;  %vm972_vm7 = vcmp.eq.s32.totalorder %v904_v14, 1  ;;  %v2945_v28 = vpop.permute.xlu0 %870  ;;  %v1766_v14 = vld [vmem:[%s2144_s25 + $0x98] sm:$0xff] }
 0x195   : > { %v2950_v10 = vsel %vm962_vm6, %v2797_v46, %v2489_v52  ;;  %v2954_v48 = vsel %vm962_vm6, %v2800_v49, %v2492_v24  ;;  %v2958_v54 = vsel %vm972_vm7, %v2797_v46, %v2715_v16  ;;  %v2962_v3 = vsel %vm972_vm7, %v2800_v49, %v2718_v38  ;;  %v1767_v16 = vld [vmem:[%s2144_s25 + $0xa0] sm:$0xff] }
 0x196   : > { %v1071_v52 = vsel %vm1039_vm8, 1, %v3516_v35  ;;  %vm1043_vm10 = vcmp.eq.s32.totalorder %v1766_v14, 3  ;;  %vm1044_vm11 = vcmp.eq.s32.totalorder %v1767_v16, 3  ;;  %v1769_v14 = vld [vmem:[%s2144_s25 + $0xb0] sm:$0xff]  ;;  %v1771_v16 = vld [vmem:[%s2144_s25 + $0xa8] sm:$0xff] }
 0x197   : > { %vm1046_vm14 = vcmp.eq.s32.totalorder %v1769_v14, 3  ;;  %vm1045_vm2 = vcmp.eq.s32.totalorder %v1771_v16, 3 }
 0x199   : > { %1137 = vperm.xlu1 %1746, %v1072_v1   ;;  %1140 = vperm.xlu2 %1747, %v1073_v47  }
 0x19a   : > { %1134 = vperm.xlu0 %1745, %v1071_v52   ;;  %v1075_v52 = vsel %vm1043_vm10, 1, %v3516_v35 }
 0x19b   : > { %v883_v24 = vpop.permute.xlu1 %882  ;;  %v913_v32 = vpop.permute.xlu2 %912 }
 0x19c   : > { %vm965_vm9 = vcmp.eq.s32.totalorder %v883_v24, 1  ;;  %vm975_vm12 = vcmp.eq.s32.totalorder %v913_v32, 1  ;;  %v2969_v38 = vpop.permute.xlu0 %879  ;;  %v1076_v24 = vsel %vm1044_vm11, 1, %v3516_v35 }
 0x19d   : > { %v2974_v20 = vsel %vm965_vm9, %v2797_v46, %v2508_v4  ;;  %v2978_v6 = vsel %vm965_vm9, %v2800_v49, %v2511_v8  ;;  %v2982_v1 = vsel %vm975_vm12, %v2797_v46, %v2752_v30  ;;  %v2986_v47 = vsel %vm975_vm12, %v2800_v49, %v2755_v44  ;;  %v1770_v30 = vld [vmem:[%s2144_s25 + $0xb8] sm:$0xff] }
 0x19e   : > { %v1074_v4 = vsel %vm1042_vm13, 1, %v3516_v35  ;;  %vm1047_vm15 = vcmp.eq.s32.totalorder %v1770_v30, 3 }
 0x19f   : > { %v1079_v14 = vsel %vm1047_vm15, 1, %v3516_v35 }
 0x1a1   : > { %1146 = vperm.xlu1 %1746, %v1075_v52   ;;  %1149 = vperm.xlu2 %1747, %v1076_v24   ;;  %v3538_v52 = vld [vmem:[#allocation18_spill] sm:$0xff] }
 0x1a2   : > { %1143 = vperm.xlu0 %1745, %v1074_v4  }
 0x1a3   : > { %v892_v8 = vpop.permute.xlu1 %891  ;;  %v922_v32 = vpop.permute.xlu2 %921 }
 0x1a4   : > { %vm968_vm0 = vcmp.eq.s32.totalorder %v892_v8, 1  ;;  %vm978_vm1 = vcmp.eq.s32.totalorder %v922_v32, 1  ;;  %v2993_v44 = vpop.permute.xlu0 %888  ;;  %v1078_v32 = vsel %vm1046_vm14, 1, %v3516_v35 }
 0x1a5   : > { %v2998_v5 = vsel %vm968_vm0, %v2797_v46, %v2527_v17  ;;  %v3002_v24 = vsel %vm968_vm0, %v2800_v49, %v3538_v52  ;;  %v3006_v4 = vsel %vm978_vm1, %v2797_v46, %v2788_v61  ;;  %v3010_v8 = vsel %vm978_vm1, %v2800_v49, %v2791_v11  ;;  %v1772_v52 = vld [vmem:[%s2144_s25 + $0xc8] sm:$0xff]  ;;  %v1773_v61 = vld [vmem:[%s2144_s25 + $0xd0] sm:$0xff] }
 0x1a6   : > { %3539 = vst [vmem:[#allocation17_spill] sm:$0xff] %v3006_v4  ;;  %v1077_v17 = vsel %vm1045_vm2, 1, %v3516_v35  ;;  %vm1049_vm3 = vcmp.eq.s32.totalorder %v1772_v52, 3  ;;  %vm1050_vm4 = vcmp.eq.s32.totalorder %v1773_v61, 3  ;;  %v1775_v52 = vld [vmem:[%s2144_s25 + $0xe0] sm:$0xff]  ;;  %v1777_v61 = vld [vmem:[%s2144_s25 + $0xd8] sm:$0xff] }
 0x1a7   : > { %3540 = vst [vmem:[#allocation18_spill] sm:$0xff] %v3010_v8  ;;  %v1774_v8 = vld [vmem:[%s2144_s25 + $0xc0] sm:$0xff]  ;;  %vm1052_vm8 = vcmp.eq.s32.totalorder %v1775_v52, 3  ;;  %vm1051_vm12 = vcmp.eq.s32.totalorder %v1777_v61, 3  ;;  %v1779_v61 = vld [vmem:[%s2144_s25 + $0xf0] sm:$0xff] }
 0x1a8   : > { %vm1048_vm7 = vcmp.eq.s32.totalorder %v1774_v8, 3  ;;  %v1082_v8 = vsel %vm1050_vm4, 1, %v3516_v35  ;;  %vm1054_vm0 = vcmp.eq.s32.totalorder %v1779_v61, 3  ;;  %v1780_v61 = vld [vmem:[%s3493_s2] sm:$0xff] }
 0x1a9   : > { %1155 = vperm.xlu1 %1746, %v1078_v32   ;;  %1158 = vperm.xlu2 %1747, %v1079_v14  }
 0x1aa   : > { %1152 = vperm.xlu0 %1745, %v1077_v17  }
 0x1ab   : > { %v901_v30 = vpop.permute.xlu1 %900  ;;  %v931_v16 = vpop.permute.xlu2 %930 }
 0x1ac   : > { %vm971_vm5 = vcmp.eq.s32.totalorder %v901_v30, 1  ;;  %vm981_vm6 = vcmp.eq.s32.totalorder %v931_v16, 1  ;;  %v3017_v11 = vpop.permute.xlu0 %897  ;;  %v1081_v30 = vsel %vm1049_vm3, 1, %v3516_v35  ;;  %vm961_vm3 = vcmp.eq.s32.totalorder %v2945_v28, 1 }
 0x1ad   : > { %v3022_v4 = vsel %vm971_vm5, %v2797_v46, %v2556_v15  ;;  %v3026_v32 = vsel %vm971_vm5, %v2800_v49, %v2559_v33  ;;  %v3030_v14 = vsel %vm981_vm6, %v2797_v46, %v2830_v41  ;;  %v3034_v17 = vsel %vm981_vm6, %v2800_v49, %v2833_v19  ;;  %v1776_v41 = vld [vmem:[%s2144_s25 + $0xe8] sm:$0xff] }
 0x1ae   : > { %3541 = vst [vmem:[#allocation28_spill] sm:$0xff] %v3034_v17  ;;  %v1080_v15 = vsel %vm1048_vm7, 1, %v3516_v35  ;;  %vm1053_vm10 = vcmp.eq.s32.totalorder %v1776_v41, 3  ;;  %v1778_v41 = vld [vmem:[%s2144_s25 + $0xf8] sm:$0xff]  ;;  %vm964_vm6 = vcmp.eq.s32.totalorder %v2969_v38, 1  ;;  %s1555_s25 = ssub.s32 (%p2031_p9), 75, %s1687_s28 }
 0x1af   : > { %vm1055_vm13 = vcmp.eq.s32.totalorder %v1778_v41, 3  ;;  %p1556_p6 = scmp.lt.s32.totalorder (%p2031_p9), %s1555_s25, 32 }
 0x1b1   : > { %1164 = vperm.xlu1 %1746, %v1081_v30   ;;  %1167 = vperm.xlu2 %1747, %v1082_v8  }
 0x1b2   : > { %1161 = vperm.xlu0 %1745, %v1080_v15  }
 0x1b3   : > { %v910_v33 = vpop.permute.xlu1 %909  ;;  %v940_v16 = vpop.permute.xlu2 %939 }
 0x1b4   : > { %vm974_vm11 = vcmp.eq.s32.totalorder %v910_v33, 1  ;;  %vm984_vm9 = vcmp.eq.s32.totalorder %v940_v16, 1  ;;  %v3041_v19 = vpop.permute.xlu0 %906  ;;  %v1084_v33 = vsel %vm1052_vm8, 1, %v3516_v35  ;;  %v1085_v16 = vsel %vm1053_vm10, 1, %v3516_v35 }
 0x1b5   : > { %v3046_v17 = vsel %vm974_vm11, %v2797_v46, %v2592_v40  ;;  %v3050_v30 = vsel %vm974_vm11, %v2800_v49, %v2595_v39  ;;  %v3054_v8 = vsel %vm984_vm9, %v2797_v46, %v2866_v56  ;;  %v3058_v15 = vsel %vm984_vm9, %v2800_v49, %v2869_v2 }
 0x1b6   : > { %3542 = vst [vmem:[#allocation29_spill] sm:$0xff] %v3058_v15  ;;  %v1083_v40 = vsel %vm1051_vm12, 1, %v3516_v35  ;;  %vm967_vm10 = vcmp.eq.s32.totalorder %v2993_v44, 1  ;;  %vm970_vm12 = vcmp.eq.s32.totalorder %v3017_v11, 1 }
 0x1b7   : > { %v1328_v11 = vsel %vm970_vm12, %v2800_v49, %v2663_v37 }
 0x1b9   : > { %1173 = vperm.xlu1 %1746, %v1084_v33   ;;  %1176 = vperm.xlu2 %1747, %v1085_v16  }
 0x1ba   : > { %1170 = vperm.xlu0 %1745, %v1083_v40   ;;  %v1087_v40 = vsel %vm1055_vm13, 1, %v3516_v35 }
 0x1bb   : > { %v919_v39 = vpop.permute.xlu1 %918  ;;  %v949_v52 = vpop.permute.xlu2 %948 }
 0x1bc   : > { %vm977_vm14 = vcmp.eq.s32.totalorder %v919_v39, 1  ;;  %vm987_vm15 = vcmp.eq.s32.totalorder %v949_v52, 1  ;;  %v3064_v56 = vpop.permute.xlu0 %915  ;;  %v1086_v39 = vsel %vm1054_vm0, 1, %v3516_v35  ;;  %vm973_vm0 = vcmp.eq.s32.totalorder %v3041_v19, 1 }
 0x1bd   : > { %v3069_v2 = vsel %vm977_vm14, %v2797_v46, %v2629_v13  ;;  %v3073_v15 = vsel %vm977_vm14, %v2800_v49, %v2632_v45  ;;  %v3077_v33 = vsel %vm987_vm15, %v2797_v46, %v2902_v18  ;;  %v3081_v16 = vsel %vm987_vm15, %v2800_v49, %v2905_v12 }
 0x1be   : > { %3543 = vst [vmem:[#allocation30_spill] sm:$0xff] %v3077_v33 }
 0x1bf   : > { %3544 = vst [vmem:[#allocation31_spill] sm:$0xff] %v3081_v16  ;;  %v1387_v16 = vld [vmem:[%s2152_s13 + $0x28] sm:$0xff] }
 0x1c1   : > { %1182 = vperm.xlu1 %1746, %v1087_v40  }
 0x1c2   : > { %1179 = vperm.xlu0 %1745, %v1086_v39  }
 0x1c3   : > { %v928_v13 = vpop.permute.xlu1 %927  ;;  %v958_v52 = vpop.permute.xlu2 %957 }
 0x1c4   : > { %vm980_vm1 = vcmp.eq.s32.totalorder %v928_v13, 1  ;;  %vm990_vm2 = vcmp.eq.s32.totalorder %v958_v52, 1  ;;  %v3085_v45 = vpop.permute.xlu0 %924 }
 0x1c5   : > { %v3089_v18 = vsel %vm980_vm1, %v2797_v46, %v2666_v53  ;;  %v3093_v12 = vsel %vm980_vm1, %v2800_v49, %v2669_v51  ;;  %v3097_v35 = vsel %vm990_vm2, %v2797_v46, %v2937_v43  ;;  %v3101_v41 = vsel %vm990_vm2, %v2800_v49, %v2940_v63  ;;  %v1781_v51 = vld [vmem:[%s3494_s3] sm:$0xff]  ;;  %v1384_v43 = vld [vmem:[%s2152_s13 + $0x10] sm:$0xff] }
 0x1c6   : > { %3545 = vst [vmem:[#allocation32_spill] sm:$0xff] %v3097_v35  ;;  %v3107_v53 = vperm.slane %v1780_v61, 3  ;;  %v3112_v39 = vperm.slane %v1781_v51, 3  ;;  %v994_v63 = vsel %vm961_vm3, %v2797_v46, %v2550_v27  ;;  %v3133_v27 = vld [vmem:[%s3495_s4] ss:$0 sm:$0xff] }
 0x1c7   : > { %3546 = vst [vmem:[#allocation33_spill] sm:$0xff] %v3101_v41  ;;  %v1319_v41 = vsel %vm961_vm3, %v2800_v49, %v2553_v26 }
 0x1cb   : > { %v937_v40 = vpop.permute.xlu1 %936  ;;  %v1096_v13 = vpop.permute.xlu2 %1095 }
 0x1cc   : > { %vm983_vm4 = vcmp.eq.s32.totalorder %v937_v40, 1  ;;  %vm1186_vm5 = vcmp.eq.s32.totalorder %v1096_v13, 1  ;;  %v3117_v28 = vpop.permute.xlu0 %933 }
 0x1cd   : > { %v3121_v52 = vsel %vm983_vm4, %v2797_v46, %v2703_v29  ;;  %v3125_v61 = vsel %vm983_vm4, %v2800_v49, %v2706_v57  ;;  %v1219_v51 = vsel %vm1186_vm5, %v3107_v53, %v994_v63  ;;  %v1352_v13 = vsel %vm1186_vm5, %v3112_v39, %v1319_v41 }
 0x1ce   : > { %v1416_v40 = vsub.f32 %v1384_v43, %v1219_v51  ;;  %v997_v63 = vsel %vm964_vm6, %v2797_v46, %v2586_v7  ;;  %v1322_v41 = vsel %vm964_vm6, %v2800_v49, %v2589_v25  ;;  %vm976_vm4 = vcmp.eq.s32.totalorder %v3064_v56, 1 }
 0x1d0   : > { %v1448_v35 = vmul.f32 %v1416_v40, %v1352_v13 }
 0x1d2   : > { %v1484_v29 = vadd.f32 %v3133_v27, %v1448_v35 }
 0x1d3   : > { %v946_v57 = vpop.permute.xlu1 %945  ;;  %v1105_v33 = vpop.permute.xlu2 %1104 }
 0x1d4   : > { %1516 = vst [vmem:[%s3142_s26 + $0x10] sm:$0xff] %v1484_v29  ;;  %vm986_vm7 = vcmp.eq.s32.totalorder %v946_v57, 1  ;;  %vm1189_vm8 = vcmp.eq.s32.totalorder %v1105_v33, 1  ;;  %v3145_v26 = vpop.permute.xlu0 %942 }
 0x1d5   : > { %v3149_v38 = vsel %vm986_vm7, %v2797_v46, %v2740_v36  ;;  %v3153_v35 = vsel %vm986_vm7, %v2800_v49, %v2743_v62  ;;  %v1222_v7 = vsel %vm1189_vm8, %v3107_v53, %v997_v63  ;;  %v1355_v51 = vsel %vm1189_vm8, %v3112_v39, %v1322_v41  ;;  %v1390_v36 = vld [vmem:[%s2152_s13 + $0x40] sm:$0xff] }
 0x1d6   : > { %v1419_v43 = vsub.f32 %v1387_v16, %v1222_v7  ;;  %v1000_v62 = vsel %vm967_vm10, %v2797_v46, %v2623_v34  ;;  %v1325_v34 = vsel %vm967_vm10, %v2800_v49, %v2626_v31  ;;  %vm979_vm8 = vcmp.eq.s32.totalorder %v3085_v45, 1 }
 0x1d8   : > { %v1451_v40 = vmul.f32 %v1419_v43, %v1355_v51 }
 0x1da   : > { %v1487_v33 = vadd.f32 %v3133_v27, %v1451_v40  ;;  %v1393_v40 = vld [vmem:[%s2152_s13 + $0x58] sm:$0xff] }
 0x1db   : > { %v955_v13 = vpop.permute.xlu1 %954  ;;  %v1114_v29 = vpop.permute.xlu2 %1113 }
 0x1dc   : > { %1519 = vst [vmem:[%s3142_s26 + $0x28] sm:$0xff] %v1487_v33  ;;  %vm989_vm11 = vcmp.eq.s32.totalorder %v955_v13, 1  ;;  %vm1192_vm9 = vcmp.eq.s32.totalorder %v1114_v29, 1  ;;  %v3165_v25 = vpop.permute.xlu0 %951  ;;  %v1382_v29 = vld [vmem:[%s2152_s13] sm:$0xff] }
 0x1dd   : > { %v3169_v16 = vsel %vm989_vm11, %v2797_v46, %v2777_v42  ;;  %v3173_v44 = vsel %vm989_vm11, %v2800_v49, %v2780_v9  ;;  %v1225_v57 = vsel %vm1192_vm9, %v3107_v53, %v1000_v62  ;;  %v1358_v7 = vsel %vm1192_vm9, %v3112_v39, %v1325_v34  ;;  %v1383_v42 = vld [vmem:[%s2152_s13 + $0x8] sm:$0xff]  ;;  %v3547_v34 = vld [vmem:[#allocation16_spill] sm:$0xff] }
 0x1de   : > { %v1422_v63 = vsub.f32 %v1390_v36, %v1225_v57  ;;  %v1003_v9 = vsel %vm970_vm12, %v2797_v46, %v2660_v58  ;;  %vm982_vm12 = vcmp.eq.s32.totalorder %v3117_v28, 1 }
 0x1e0   : > { %v1454_v41 = vmul.f32 %v1422_v63, %v1358_v7 }
 0x1e2   : > { %v1490_v43 = vadd.f32 %v3133_v27, %v1454_v41 }
 0x1e3   : > { %v1093_v51 = vpop.permute.xlu1 %1092  ;;  %v1123_v33 = vpop.permute.xlu2 %1122 }
 0x1e4   : > { %1522 = vst [vmem:[%s3142_s26 + $0x40] sm:$0xff] %v1490_v43  ;;  %vm1185_vm13 = vcmp.eq.s32.totalorder %v1093_v51, 1  ;;  %vm1195_vm14 = vcmp.eq.s32.totalorder %v1123_v33, 1  ;;  %v1090_v31 = vpop.permute.xlu0 %1089  ;;  %v1386_v33 = vld [vmem:[%s2152_s13 + $0x20] sm:$0xff] }
 0x1e5   : > { %v1218_v13 = vsel %vm1185_vm13, %v3107_v53, %v2818_v23  ;;  %v1228_v36 = vsel %vm1195_vm14, %v3107_v53, %v1003_v9  ;;  %vm1184_vm15 = vcmp.eq.s32.totalorder %v1090_v31, 1  ;;  %v1351_v58 = vsel %vm1185_vm13, %v3112_v39, %v3547_v34  ;;  %v1396_v31 = vld [vmem:[%s2152_s13 + $0x70] sm:$0xff]  ;;  %v3549_v34 = vld [vmem:[#allocation20_spill] sm:$0xff] }
 0x1e6   : > { %v1415_v62 = vsub.f32 %v1383_v42, %v1218_v13  ;;  %v1425_v57 = vsub.f32 %v1393_v40, %v1228_v36  ;;  %v1361_v63 = vsel %vm1195_vm14, %v3112_v39, %v1328_v11  ;;  %v1217_v23 = vsel %vm1184_vm15, %v3107_v53, %v2917_v0  ;;  %v3548_v13 = vld [vmem:[#allocation19_spill] sm:$0xff] }
 0x1e7   : > { %v1414_v43 = vsub.f32 %v1382_v29, %v1217_v23  ;;  %v1350_v37 = vsel %vm1184_vm15, %v3112_v39, %v2921_v21  ;;  %v1006_v36 = vsel %vm973_vm0, %v2797_v46, %v3548_v13  ;;  %v1399_v13 = vld [vmem:[%s2152_s13 + $0x88] sm:$0xff] }
 0x1e8   : > { %v1447_v7 = vmul.f32 %v1415_v62, %v1351_v58  ;;  %v1457_v41 = vmul.f32 %v1425_v57, %v1361_v63  ;;  %v1385_v57 = vld [vmem:[%s2152_s13 + $0x18] sm:$0xff]  ;;  %v1331_v58 = vsel %vm973_vm0, %v2800_v49, %v3549_v34  ;;  %v3552_v34 = vld [vmem:[#allocation22_spill] sm:$0xff]  ;;  %vm985_vm0 = vcmp.eq.s32.totalorder %v3145_v26, 1 }
 0x1e9   : > { %v1446_v40 = vmul.f32 %v1414_v43, %v1350_v37 }
 0x1ea   : > { %v1483_v42 = vadd.f32 %v3133_v27, %v1447_v7  ;;  %v1493_v51 = vadd.f32 %v3133_v27, %v1457_v41  ;;  %v3550_v7 = vld [vmem:[#allocation26_spill] sm:$0xff] }
 0x1eb   : > { %v1102_v9 = vpop.permute.xlu1 %1101  ;;  %v1132_v0 = vpop.permute.xlu2 %1131  ;;  %v1482_v29 = vadd.f32 %v3133_v27, %v1446_v40 }
 0x1ec   : > { %1515 = vst [vmem:[%s3142_s26 + $0x8] sm:$0xff] %v1483_v42  ;;  %vm1188_vm1 = vcmp.eq.s32.totalorder %v1102_v9, 1  ;;  %vm1198_vm2 = vcmp.eq.s32.totalorder %v1132_v0, 1  ;;  %v1099_v21 = vpop.permute.xlu0 %1098 }
 0x1ed   : > { %1525 = vst [vmem:[%s3142_s26 + $0x58] sm:$0xff] %v1493_v51  ;;  %v1221_v11 = vsel %vm1188_vm1, %v3107_v53, %v2854_v50  ;;  %v1231_v62 = vsel %vm1198_vm2, %v3107_v53, %v1006_v36  ;;  %vm1187_vm3 = vcmp.eq.s32.totalorder %v1099_v21, 1  ;;  %v1354_v41 = vsel %vm1188_vm1, %v3112_v39, %v3550_v7  ;;  %v3551_v36 = vld [vmem:[#allocation21_spill] sm:$0xff] }
 0x1ee   : > { %1514 = vst [vmem:[%s3142_s26] sm:$0xff] %v1482_v29  ;;  %v1418_v63 = vsub.f32 %v1386_v33, %v1221_v11  ;;  %v1428_v23 = vsub.f32 %v1396_v31, %v1231_v62  ;;  %v1364_v50 = vsel %vm1198_vm2, %v3112_v39, %v1331_v58  ;;  %v1220_v43 = vsel %vm1187_vm3, %v3107_v53, %v2950_v10  ;;  %v1389_v31 = vld [vmem:[%s2152_s13 + $0x38] sm:$0xff] }
 0x1ef   : > { %v1417_v51 = vsub.f32 %v1385_v57, %v1220_v43  ;;  %v1353_v19 = vsel %vm1187_vm3, %v3112_v39, %v2954_v48  ;;  %v1009_v29 = vsel %vm976_vm4, %v2797_v46, %v3551_v36  ;;  %v1388_v57 = vld [vmem:[%s2152_s13 + $0x30] sm:$0xff]  ;;  %v1334_v58 = vsel %vm976_vm4, %v2800_v49, %v3552_v34  ;;  %v1391_v36 = vld [vmem:[%s2152_s13 + $0x48] sm:$0xff] }
 0x1f0   : > { %v1450_v37 = vmul.f32 %v1418_v63, %v1354_v41  ;;  %v1460_v42 = vmul.f32 %v1428_v23, %v1364_v50  ;;  %vm988_vm4 = vcmp.eq.s32.totalorder %v3165_v25, 1 }
 0x1f1   : > { %v1449_v9 = vmul.f32 %v1417_v51, %v1353_v19  ;;  %v1392_v19 = vld [vmem:[%s2152_s13 + $0x50] sm:$0xff] }
 0x1f2   : > { %v1486_v40 = vadd.f32 %v3133_v27, %v1450_v37  ;;  %v1496_v33 = vadd.f32 %v3133_v27, %v1460_v42 }
 0x1f3   : > { %v1111_v0 = vpop.permute.xlu1 %1110  ;;  %v1141_v10 = vpop.permute.xlu2 %1140  ;;  %v1485_v21 = vadd.f32 %v3133_v27, %v1449_v9  ;;  %v3553_v9 = vld [vmem:[#allocation23_spill] sm:$0xff] }
 0x1f4   : > { %1518 = vst [vmem:[%s3142_s26 + $0x20] sm:$0xff] %v1486_v40  ;;  %vm1191_vm5 = vcmp.eq.s32.totalorder %v1111_v0, 1  ;;  %vm1201_vm6 = vcmp.eq.s32.totalorder %v1141_v10, 1  ;;  %v1108_v48 = vpop.permute.xlu0 %1107 }
 0x1f5   : > { %1528 = vst [vmem:[%s3142_s26 + $0x70] sm:$0xff] %v1496_v33  ;;  %v1224_v11 = vsel %vm1191_vm5, %v3107_v53, %v2890_v60  ;;  %v1234_v62 = vsel %vm1201_vm6, %v3107_v53, %v1009_v29  ;;  %vm1190_vm7 = vcmp.eq.s32.totalorder %v1108_v48, 1  ;;  %v1357_v7 = vsel %vm1191_vm5, %v3112_v39, %v2894_v55  ;;  %v1402_v33 = vld [vmem:[%s2152_s13 + $0xa0] sm:$0xff] }
 0x1f6   : > { %1517 = vst [vmem:[%s3142_s26 + $0x18] sm:$0xff] %v1485_v21  ;;  %v1421_v63 = vsub.f32 %v1389_v31, %v1224_v11  ;;  %v1431_v23 = vsub.f32 %v1399_v13, %v1234_v62  ;;  %v1367_v60 = vsel %vm1201_vm6, %v3112_v39, %v1334_v58  ;;  %v1223_v41 = vsel %vm1190_vm7, %v3107_v53, %v2974_v20  ;;  %v3554_v29 = vld [vmem:[#allocation24_spill] sm:$0xff] }
 0x1f7   : > { %v1420_v37 = vsub.f32 %v1388_v57, %v1223_v41  ;;  %v1356_v56 = vsel %vm1190_vm7, %v3112_v39, %v2978_v6  ;;  %v1012_v31 = vsel %vm979_vm8, %v2797_v46, %v3553_v9  ;;  %v1337_v21 = vsel %vm979_vm8, %v2800_v49, %v3554_v29  ;;  %v1398_v29 = vld [vmem:[%s2152_s13 + $0x80] sm:$0xff] }
 0x1f8   : > { %v1453_v50 = vmul.f32 %v1421_v63, %v1357_v7  ;;  %v1463_v43 = vmul.f32 %v1431_v23, %v1367_v60  ;;  %v1395_v60 = vld [vmem:[%s2152_s13 + $0x68] sm:$0xff] }
 0x1f9   : > { %v1452_v51 = vmul.f32 %v1420_v37, %v1356_v56 }
 0x1fa   : > { %v1489_v42 = vadd.f32 %v3133_v27, %v1453_v50  ;;  %v1499_v55 = vadd.f32 %v3133_v27, %v1463_v43  ;;  %v1405_v50 = vld [vmem:[%s2152_s13 + $0xb8] sm:$0xff]  ;;  %v3555_v43 = vld [vmem:[#allocation12_spill] sm:$0xff] }
 0x1fb   : > { %v1120_v40 = vpop.permute.xlu1 %1119  ;;  %v1150_v20 = vpop.permute.xlu2 %1149  ;;  %v1488_v0 = vadd.f32 %v3133_v27, %v1452_v51  ;;  %v1015_v37 = vsel %vm982_vm12, %v2797_v46, %v3555_v43  ;;  %v1394_v51 = vld [vmem:[%s2152_s13 + $0x60] sm:$0xff] }
 0x1fc   : > { %1521 = vst [vmem:[%s3142_s26 + $0x38] sm:$0xff] %v1489_v42  ;;  %vm1194_vm10 = vcmp.eq.s32.totalorder %v1120_v40, 1  ;;  %vm1204_vm11 = vcmp.eq.s32.totalorder %v1150_v20, 1  ;;  %v1117_v6 = vpop.permute.xlu0 %1116 }
 0x1fd   : > { %1531 = vst [vmem:[%s3142_s26 + $0x88] sm:$0xff] %v1499_v55  ;;  %v1227_v13 = vsel %vm1194_vm10, %v3107_v53, %v2925_v22  ;;  %v1237_v10 = vsel %vm1204_vm11, %v3107_v53, %v1012_v31  ;;  %vm1193_vm9 = vcmp.eq.s32.totalorder %v1117_v6, 1  ;;  %v1360_v62 = vsel %vm1194_vm10, %v3112_v39, %v2929_v59 }
 0x1fe   : > { %1520 = vst [vmem:[%s3142_s26 + $0x30] sm:$0xff] %v1488_v0  ;;  %v1424_v48 = vsub.f32 %v1392_v19, %v1227_v13  ;;  %v1434_v11 = vsub.f32 %v1402_v33, %v1237_v10  ;;  %v1370_v22 = vsel %vm1204_vm11, %v3112_v39, %v1337_v21  ;;  %v1226_v57 = vsel %vm1193_vm9, %v3107_v53, %v2998_v5  ;;  %v3556_v19 = vld [vmem:[#allocation15_spill] sm:$0xff] }
 0x1ff   : > { %v1423_v63 = vsub.f32 %v1391_v36, %v1226_v57  ;;  %v1359_v45 = vsel %vm1193_vm9, %v3112_v39, %v3002_v24  ;;  %v1340_v40 = vsel %vm982_vm12, %v2800_v49, %v3556_v19 }
 0x200   : > { %v1456_v34 = vmul.f32 %v1424_v48, %v1360_v62  ;;  %v1466_v58 = vmul.f32 %v1434_v11, %v1370_v22  ;;  %v1408_v48 = vld [vmem:[%s2152_s13 + $0xd0] sm:$0xff]  ;;  %v3557_v11 = vld [vmem:[#allocation13_spill] sm:$0xff] }
 0x201   : > { %v1455_v7 = vmul.f32 %v1423_v63, %v1359_v45  ;;  %v1018_v62 = vsel %vm985_vm0, %v2797_v46, %v3557_v11  ;;  %v3558_v63 = vld [vmem:[#allocation25_spill] sm:$0xff] }
 0x202   : > { %v1492_v23 = vadd.f32 %v3133_v27, %v1456_v34  ;;  %v1502_v59 = vadd.f32 %v3133_v27, %v1466_v58  ;;  %v1397_v58 = vld [vmem:[%s2152_s13 + $0x78] sm:$0xff]  ;;  %v1343_v45 = vsel %vm985_vm0, %v2800_v49, %v3558_v63 }
 0x203   : > { %v1129_v41 = vpop.permute.xlu1 %1128  ;;  %v1159_v5 = vpop.permute.xlu2 %1158  ;;  %v1491_v56 = vadd.f32 %v3133_v27, %v1455_v7 }
 0x204   : > { %1524 = vst [vmem:[%s3142_s26 + $0x50] sm:$0xff] %v1492_v23  ;;  %vm1197_vm13 = vcmp.eq.s32.totalorder %v1129_v41, 1  ;;  %vm1207_vm14 = vcmp.eq.s32.totalorder %v1159_v5, 1  ;;  %v1126_v24 = vpop.permute.xlu0 %1125 }
 0x205   : > { %1534 = vst [vmem:[%s3142_s26 + $0xa0] sm:$0xff] %v1502_v59  ;;  %v1230_v42 = vsel %vm1197_vm13, %v3107_v53, %v2958_v54  ;;  %v1240_v55 = vsel %vm1207_vm14, %v3107_v53, %v1015_v37  ;;  %vm1196_vm15 = vcmp.eq.s32.totalorder %v1126_v24, 1  ;;  %v1363_v9 = vsel %vm1197_vm13, %v3112_v39, %v2962_v3 }
 0x206   : > { %1523 = vst [vmem:[%s3142_s26 + $0x48] sm:$0xff] %v1491_v56  ;;  %v1427_v33 = vsub.f32 %v1395_v60, %v1230_v42  ;;  %v1437_v20 = vsub.f32 %v1405_v50, %v1240_v55  ;;  %v1373_v54 = vsel %vm1207_vm14, %v3112_v39, %v1340_v40  ;;  %v1229_v31 = vsel %vm1196_vm15, %v3107_v53, %v3022_v4  ;;  %v1401_v56 = vld [vmem:[%s2152_s13 + $0x98] sm:$0xff]  ;;  %v1411_v42 = vld [vmem:[%s2152_s13 + $0xe8] sm:$0xff]  ;;  %v3559_v55 = vld [vmem:[#allocation14_spill] sm:$0xff] }
 0x207   : > { %v1426_v13 = vsub.f32 %v1394_v51, %v1229_v31  ;;  %v1362_v28 = vsel %vm1196_vm15, %v3112_v39, %v3026_v32  ;;  %v1021_v51 = vsel %vm988_vm4, %v2797_v46, %v3559_v55  ;;  %v3560_v40 = vld [vmem:[#allocation17_spill] sm:$0xff] }
 0x208   : > { %v1459_v0 = vmul.f32 %v1427_v33, %v1363_v9  ;;  %v1469_v6 = vmul.f32 %v1437_v20, %v1373_v54  ;;  %v1400_v9 = vld [vmem:[%s2152_s13 + $0x90] sm:$0xff]  ;;  %v3561_v54 = vld [vmem:[#allocation27_spill] sm:$0xff] }
 0x209   : > { %v1458_v36 = vmul.f32 %v1426_v13, %v1362_v28  ;;  %v1346_v31 = vsel %vm988_vm4, %v2800_v49, %v3561_v54 }
 0x20a   : > { %v1495_v10 = vadd.f32 %v3133_v27, %v1459_v0  ;;  %v1505_v3 = vadd.f32 %v3133_v27, %v1469_v6  ;;  %v3562_v6 = vld [vmem:[#allocation18_spill] sm:$0xff] }
 0x20b   : > { %v1138_v21 = vpop.permute.xlu1 %1137  ;;  %v1168_v4 = vpop.permute.xlu2 %1167  ;;  %v1494_v22 = vadd.f32 %v3133_v27, %v1458_v36 }
 0x20c   : > { %1527 = vst [vmem:[%s3142_s26 + $0x68] sm:$0xff] %v1495_v10  ;;  %vm1200_vm1 = vcmp.eq.s32.totalorder %v1138_v21, 1  ;;  %vm1210_vm2 = vcmp.eq.s32.totalorder %v1168_v4, 1  ;;  %v1135_v32 = vpop.permute.xlu0 %1134  ;;  %v1404_v4 = vld [vmem:[%s2152_s13 + $0xb0] sm:$0xff] }
 0x20d   : > { %1537 = vst [vmem:[%s3142_s26 + $0xb8] sm:$0xff] %v1505_v3  ;;  %v1233_v57 = vsel %vm1200_vm1, %v3107_v53, %v2982_v1  ;;  %v1243_v34 = vsel %vm1210_vm2, %v3107_v53, %v1018_v62  ;;  %vm1199_vm3 = vcmp.eq.s32.totalorder %v1135_v32, 1  ;;  %v1366_v7 = vsel %vm1200_vm1, %v3112_v39, %v2986_v47 }
 0x20e   : > { %1526 = vst [vmem:[%s3142_s26 + $0x60] sm:$0xff] %v1494_v22  ;;  %v1430_v23 = vsub.f32 %v1398_v29, %v1233_v57  ;;  %v1440_v59 = vsub.f32 %v1408_v48, %v1243_v34  ;;  %v1376_v1 = vsel %vm1210_vm2, %v3112_v39, %v1343_v45  ;;  %v1232_v60 = vsel %vm1199_vm3, %v3107_v53, %v3046_v17  ;;  %v3563_v34 = vld [vmem:[#allocation28_spill] sm:$0xff] }
 0x20f   : > { %v1429_v5 = vsub.f32 %v1397_v58, %v1232_v60  ;;  %v1365_v26 = vsel %vm1199_vm3, %v3112_v39, %v3050_v30 }
 0x210   : > { %v1462_v41 = vmul.f32 %v1430_v23, %v1366_v7  ;;  %v1472_v50 = vmul.f32 %v1440_v59, %v1376_v1  ;;  %v1407_v1 = vld [vmem:[%s2152_s13 + $0xc8] sm:$0xff] }
 0x211   : > { %v1461_v37 = vmul.f32 %v1429_v5, %v1365_v26  ;;  %v3564_v26 = vld [vmem:[#allocation29_spill] sm:$0xff] }
 0x212   : > { %v1498_v43 = vadd.f32 %v3133_v27, %v1462_v41  ;;  %v1508_v47 = vadd.f32 %v3133_v27, %v1472_v50  ;;  %v1406_v41 = vld [vmem:[%s2152_s13 + $0xc0] sm:$0xff] }
 0x213   : > { %v1147_v24 = vpop.permute.xlu1 %1146  ;;  %v1177_v17 = vpop.permute.xlu2 %1176  ;;  %v1497_v19 = vadd.f32 %v3133_v27, %v1461_v37 }
 0x214   : > { %1530 = vst [vmem:[%s3142_s26 + $0x80] sm:$0xff] %v1498_v43  ;;  %vm1203_vm5 = vcmp.eq.s32.totalorder %v1147_v24, 1  ;;  %vm1213_vm6 = vcmp.eq.s32.totalorder %v1177_v17, 1  ;;  %v1144_v30 = vpop.permute.xlu0 %1143 }
 0x215   : > { %1540 = vst [vmem:[%s3142_s26 + $0xd0] sm:$0xff] %v1508_v47  ;;  %v1236_v33 = vsel %vm1203_vm5, %v3107_v53, %v3560_v40  ;;  %v1246_v20 = vsel %vm1213_vm6, %v3107_v53, %v1021_v51  ;;  %vm1202_vm7 = vcmp.eq.s32.totalorder %v1144_v30, 1  ;;  %v1369_v13 = vsel %vm1203_vm5, %v3112_v39, %v3562_v6  ;;  %v1409_v51 = vld [vmem:[%s2152_s13 + $0xd8] sm:$0xff] }
 0x216   : > { %1529 = vst [vmem:[%s3142_s26 + $0x78] sm:$0xff] %v1497_v19  ;;  %v1433_v46 = vsub.f32 %v1401_v56, %v1236_v33  ;;  %v1443_v0 = vsub.f32 %v1411_v42, %v1246_v20  ;;  %v1379_v28 = vsel %vm1213_vm6, %v3112_v39, %v1346_v31  ;;  %v1235_v10 = vsel %vm1202_vm7, %v3107_v53, %v3069_v2  ;;  %v1403_v2 = vld [vmem:[%s2152_s13 + $0xa8] sm:$0xff]  ;;  %v3565_v19 = vld [vmem:[#allocation30_spill] sm:$0xff]  ;;  %v3566_v33 = vld [vmem:[#allocation31_spill] sm:$0xff] }
 0x217   : > { %v1432_v25 = vsub.f32 %v1400_v9, %v1235_v10  ;;  %v1368_v49 = vsel %vm1202_vm7, %v3112_v39, %v3073_v15 }
 0x218   : > { %v1465_v3 = vmul.f32 %v1433_v46, %v1369_v13  ;;  %v1475_v36 = vmul.f32 %v1443_v0, %v1379_v28  ;;  %v1413_v13 = vld [vmem:[%s2152_s13 + $0xf8] sm:$0xff] }
 0x219   : > { %v1464_v48 = vmul.f32 %v1432_v25, %v1368_v49  ;;  %v3568_v49 = vld [vmem:[#allocation33_spill] sm:$0xff] }
 0x21a   : > { %v1501_v29 = vadd.f32 %v3133_v27, %v1465_v3  ;;  %v1511_v21 = vadd.f32 %v3133_v27, %v1475_v36  ;;  %v3567_v3 = vld [vmem:[#allocation32_spill] sm:$0xff] }
 0x21b   : > { %v1156_v11 = vpop.permute.xlu1 %1155  ;;  %v1500_v62 = vadd.f32 %v3133_v27, %v1464_v48 }
 0x21c   : > { %1533 = vst [vmem:[%s3142_s26 + $0x98] sm:$0xff] %v1501_v29  ;;  %vm1206_vm8 = vcmp.eq.s32.totalorder %v1156_v11, 1  ;;  %v1153_v22 = vpop.permute.xlu0 %1152 }
 0x21d   : > { %1543 = vst [vmem:[%s3142_s26 + $0xe8] sm:$0xff] %v1511_v21  ;;  %v1239_v32 = vsel %vm1206_vm8, %v3107_v53, %v3030_v14  ;;  %vm1205_vm10 = vcmp.eq.s32.totalorder %v1153_v22, 1  ;;  %v1372_v58 = vsel %vm1206_vm8, %v3112_v39, %v3563_v34 }
 0x21e   : > { %1532 = vst [vmem:[%s3142_s26 + $0x90] sm:$0xff] %v1500_v62  ;;  %v1436_v15 = vsub.f32 %v1404_v4, %v1239_v32  ;;  %v1238_v57 = vsel %vm1205_vm10, %v3107_v53, %v3089_v18  ;;  %v1371_v23 = vsel %vm1205_vm10, %v3112_v39, %v3093_v12 }
 0x21f   : > { %v1435_v63 = vsub.f32 %v1403_v2, %v1238_v57 }
 0x220   : > { %v1468_v45 = vmul.f32 %v1436_v15, %v1372_v58 }
 0x221   : > { %v1467_v59 = vmul.f32 %v1435_v63, %v1371_v23 }
 0x222   : > { %v1504_v7 = vadd.f32 %v3133_v27, %v1468_v45 }
 0x223   : > { %v1503_v14 = vadd.f32 %v3133_v27, %v1467_v59  ;;  %v1165_v60 = vpop.permute.xlu1 %1164 }
 0x224   : > { %1536 = vst [vmem:[%s3142_s26 + $0xb0] sm:$0xff] %v1504_v7  ;;  %vm1209_vm11 = vcmp.eq.s32.totalorder %v1165_v60, 1  ;;  %v1162_v18 = vpop.permute.xlu0 %1161 }
 0x225   : > { %1535 = vst [vmem:[%s3142_s26 + $0xa8] sm:$0xff] %v1503_v14  ;;  %v1242_v50 = vsel %vm1209_vm11, %v3107_v53, %v3054_v8  ;;  %vm1208_vm9 = vcmp.eq.s32.totalorder %v1162_v18, 1  ;;  %v1375_v43 = vsel %vm1209_vm11, %v3112_v39, %v3564_v26  ;;  %v1410_v8 = vld [vmem:[%s2152_s13 + $0xe0] sm:$0xff] }
 0x226   : > { %v1439_v12 = vsub.f32 %v1407_v1, %v1242_v50  ;;  %v1241_v5 = vsel %vm1208_vm9, %v3107_v53, %v3121_v52  ;;  %v1374_v56 = vsel %vm1208_vm9, %v3112_v39, %v3125_v61 }
 0x227   : > { %v1438_v47 = vsub.f32 %v1406_v41, %v1241_v5 }
 0x228   : > { %v1471_v37 = vmul.f32 %v1439_v12, %v1375_v43 }
 0x229   : > { %v1470_v24 = vmul.f32 %v1438_v47, %v1374_v56 }
 0x22a   : > { %v1507_v42 = vadd.f32 %v3133_v27, %v1471_v37 }
 0x22b   : > { %v1506_v17 = vadd.f32 %v3133_v27, %v1470_v24  ;;  %v1174_v55 = vpop.permute.xlu1 %1173 }
 0x22c   : > { %1539 = vst [vmem:[%s3142_s26 + $0xc8] sm:$0xff] %v1507_v42  ;;  %vm1212_vm12 = vcmp.eq.s32.totalorder %v1174_v55, 1  ;;  %v1171_v52 = vpop.permute.xlu0 %1170 }
 0x22d   : > { %1538 = vst [vmem:[%s3142_s26 + $0xc0] sm:$0xff] %v1506_v17  ;;  %v1245_v30 = vsel %vm1212_vm12, %v3107_v53, %v3565_v19  ;;  %vm1211_vm13 = vcmp.eq.s32.totalorder %v1171_v52, 1  ;;  %v1378_v20 = vsel %vm1212_vm12, %v3112_v39, %v3566_v33 }
 0x22e   : > { %v1442_v61 = vsub.f32 %v1410_v8, %v1245_v30  ;;  %v1244_v40 = vsel %vm1211_vm13, %v3107_v53, %v3149_v38  ;;  %v1377_v31 = vsel %vm1211_vm13, %v3112_v39, %v3153_v35  ;;  %v1412_v38 = vld [vmem:[%s2152_s13 + $0xf0] sm:$0xff] }
 0x22f   : > { %v1441_v9 = vsub.f32 %v1409_v51, %v1244_v40 }
 0x230   : > { %v1474_v54 = vmul.f32 %v1442_v61, %v1378_v20 }
 0x231   : > { %v1473_v46 = vmul.f32 %v1441_v9, %v1377_v31 }
 0x232   : > { %v1510_v0 = vadd.f32 %v3133_v27, %v1474_v54 }
 0x233   : > { %v1509_v6 = vadd.f32 %v3133_v27, %v1473_v46  ;;  %v1183_v28 = vpop.permute.xlu1 %1182 }
 0x234   : > { %1542 = vst [vmem:[%s3142_s26 + $0xe0] sm:$0xff] %v1510_v0  ;;  %vm1215_vm14 = vcmp.eq.s32.totalorder %v1183_v28, 1  ;;  %v1180_v10 = vpop.permute.xlu0 %1179 }
 0x235   : > { %1541 = vst [vmem:[%s3142_s26 + $0xd8] sm:$0xff] %v1509_v6  ;;  %v1248_v36 = vsel %vm1215_vm14, %v3107_v53, %v3567_v3  ;;  %vm1214_vm15 = vcmp.eq.s32.totalorder %v1180_v10, 1  ;;  %v1381_v29 = vsel %vm1215_vm14, %v3112_v39, %v3568_v49 }
 0x236   : > { %v1445_v35 = vsub.f32 %v1413_v13, %v1248_v36  ;;  %v1247_v25 = vsel %vm1214_vm15, %v3107_v53, %v3169_v16  ;;  %v1380_v4 = vsel %vm1214_vm15, %v3112_v39, %v3173_v44 }
 0x237   : > { %v1444_v21 = vsub.f32 %v1412_v38, %v1247_v25 }
 0x238   : > { %v1477_v48 = vmul.f32 %v1445_v35, %v1381_v29 }
 0x239   : > { %v1476_v11 = vmul.f32 %v1444_v21, %v1380_v4  ;;  %1553 = sbr.rel (!%p2031_p9) target bundleno = 605 (0x25d), region = 52 }
 0x23a   : > { %v1513_v62 = vadd.f32 %v3133_v27, %v1477_v48 }
 0x23b   : > { %v1512_v2 = vadd.f32 %v3133_v27, %v1476_v11 }
 0x23c   : > { %1545 = vst [vmem:[%s3142_s26 + $0xf8] sm:$0xff] %v1513_v62 }
 0x23d   : > { %1544 = vst [vmem:[%s3142_s26 + $0xf0] sm:$0xff] %v1512_v2 }
 0x23e   : > { %s3581_s25 = smov (!%p1556_p6, %s1555_s25), 32 }
 0x23f   : > { %s1688_s17 = sshll.u32 %s3581_s25, 3 }
 0x240   : > { %s1559_s13 = ssub.s32 256, %s1688_s17 }
 0x241   : > { %s1560_s29 = sshll.u32 %s1559_s13, 4 }
 0x242   : > { %1561 = vsyncadd %s1547_s10, %s1560_s29  ;;  %p3438_p5 = scmp.ne.s32.totalorder %s1688_s17, 0  ;;  %s1697_s15 = sshll.u32 %s2004_s22, 8 }
 0x243   : > { %s1564_s8 = scalar_lea.hbm %s3496_s5, %s1697_s15  ;;  %s1566_s7 = sshll.u32 %s3142_s26, 4  ;;  %s3447_s7 = int_to_ptr.vmem [resolvable:$true] %s1566_s7 }
 0x244   : > { %s1568_s12 = sshll.u32 %s1564_s8, 4  ;;  %s1692_s23 = sshll.u32 %s3581_s25, 7  ;;  %s3449_s12 = int_to_ptr.hbm [resolvable:$true] %s1568_s12 }
 0x245   : > { %s1860_s16 = sshra.s32 %s3447_s7, 4  ;;  %s1862_s9 = sshrl.u32 %s1692_s23, 4  ;;  %s1861_s16 = int_to_ptr.vmem [resolvable:$true] %s1860_s16 }
 0x246   : > { %s1867_s28 = scalar_lea.vmem %s1861_s16, %s1862_s9  ;;  %s1950_s22 = smov [#allocation7]  }
 0x247   : > { %p1868_p9 = scmp.ne.s32.totalorder %s1861_s16, %s1867_s28  ;;  %s1871_s17 = scalar_lea.vmem %s1950_s22, 512 }
 0x248   : > { %p1873_p11 = scmp.lt.s32.totalorder %s1871_s17, %s1867_s28 }
 0x249   : > { %p1869_p7 = pnand %p1868_p9, %p3438_p5 }
 0x24b   : > { %p1870_p8 = pneg %p1869_p7 }
 0x24d   : > { %p1875_p12 = pnand %p1873_p11, %p1870_p8 }
 0x24f   : > { %1878 = shalt.err (!%p1875_p12)
}
 0x250   : > { %s1879_s26 = sshra.s32 %s3449_s12, 4  ;;  %s1890_s27 = scalar_lea.hbm %s3496_s5, 600  ;;  %s1880_s26 = int_to_ptr.hbm [resolvable:$true] %s1879_s26 }
 0x251   : > { %s1886_s13 = scalar_lea.hbm %s1880_s26, %s1862_s9  ;;  %p1891_p13 = scmp.lt.s32.totalorder %s1880_s26, %s3496_s5 }
 0x252   : > { %p1887_p0 = scmp.ne.s32.totalorder %s1880_s26, %s1886_s13  ;;  %p1892_p2 = scmp.lt.s32.totalorder %s1890_s27, %s1886_s13 }
 0x254   : > { %p1888_p1 = pnand %p1887_p0, %p3438_p5  ;;  %p1893_p3 = por %p1892_p2, %p1891_p13 }
 0x256   : > { %p1889_p10 = pneg %p1888_p1 }
 0x258   : > { %p1894_p4 = pnand %p1893_p3, %p1889_p10 }
 0x25a   : > { %1897 = shalt.err (!%p1894_p4)
}
 0x25b   : > { %s1951_s16 = smov 128   ;;  %s1952_s9 = smov 8  }
 0x25c   : > { %1574 = dma.vmem_to_hbm [thread:$0]  (%p3438_p5), %s3447_s7, %s1692_s23, %s3449_s12, %s1547_s10, %s1951_s16, %s1951_s16, %s1952_s9  }
 0x25d PF: > { %p1705_p6 = scmp.ge.s32.totalorder %s1941_s21, 2  ;;  %s1583_s28 = sand.u32 1, %s1929_s18  }
 0x25e   : > { %p3570_p9 = scmp.ne.s32.totalorder %s3506_s6, 0  ;;  %s1584_s22 = scalar_lea.sflag [#allocation4], %s1583_s28 }
 0x260   : > { %p1702_p7 = pnand %p1705_p6, %p3570_p9 }
 0x262   : > { %p1703_p8 = pneg %p1702_p7 }
 0x264   : > { %1924 = dma.done.wait (%p1703_p8), %s1584_s22, 4096  }
 0x265   : > { %1926 = vsyncadd (%p1703_p8), %s1584_s22, 4294963200  ;;  %s3571_s30 = sld [smem:[#allocation11_spill]]  ;;  %p21_p11 = scmp.ge.s32.totalorder %s2008_s24, 5  }
 0x266   : > { %s3572_s18 = smov %s1933_s19  ;;  %s3573_s19 = smov %s1937_s20 }
 0x267   : > { %s3575_s21 = smov %s2008_s24  ;;  %23 = sbr.rel (!%p21_p11) target bundleno = 7 (0x7), region = 98 }
 0x26b   : > { %s3574_s20 = smov %s3571_s30 }
 0x26c   :  { %1590 = vsyncpa [#allocation3], 1 }
 0x26d   :  { %1592 = vsyncpa [#allocation3 + $0x1], 1 }
 0x26e   :  { %1593 = vsyncpa [#allocation6], 1 }
 0x26f   :  { %1595 = vsyncpa [#allocation6 + $0x1], 1 }
 0x270   :  { %1596 = vsyncpa [#allocation4], 1 }
 0x271   :  { %1598 = vsyncpa [#allocation4 + $0x1], 1 }

</bundles_post_ra>
